<compile_context>
chip_gen: v7x
topology: tpu7x:2x2x1
jax: 0.10.0
libtpu: 0.0.40
codegen_flags: <defaults>
</compile_context>

<pallas_src>
import functools
import numpy as np
import jax
import jax.numpy as jnp
from jax.experimental import pallas as pl
from jax.experimental.pallas import tpu as pltpu

# BatchNorm1d with deterministic init (gamma=1, beta=0, mean=0, var=1) in eval
# mode reduces to a constant scale 1/sqrt(1 + eps) applied after ReLU.
BN_SCALE = float(1.0 / np.sqrt(1.0 + 1e-5))


def _round_up(n, m):
    return ((n + m - 1) // m) * m


def _device_kind():
    try:
        return jax.devices()[0].device_kind.lower()
    except Exception:
        return ""


def _vmem_limit_bytes(kind):
    """Generation-specific scoped-VMEM cap (leave headroom under physical)."""
    if "v7" in kind:
        return 56 * 1024 * 1024        # v7x: 64 MiB physical per TensorCore
    if "v5" in kind or "v6" in kind:
        return 100 * 1024 * 1024       # v5e / v6e: 128 MiB physical
    return 48 * 1024 * 1024            # conservative default


def _edge_tile_rows(n, vmem_limit, k, c_aug=65, h=64):
    """Query-row tile for EdgeConv from an explicit VMEM budget.

    Live working set per grid step ~ resident keys (N*(C+1)*2 B bf16, batch ids,
    weights) + TM*N*(dist f32 + mask/temps + k bf16 one-hots).
    """
    budget = vmem_limit // 2                         # headroom for pipeline bufs
    resident = n * c_aug * 2 + n * 4 + 4 * c_aug * h * 2
    per_row = n * (4 + 4 + 2 * k + 4)
    avail = max(budget - resident, 0)
    tm = int(max(16, min(128, avail // max(per_row, 1))))
    p = 16                                           # power of two >= 16 keeps the
    while p * 2 <= tm:                               # dynamic bf16 row slice aligned
        p *= 2
    return p
    # TODO(synk): for N too large for resident keys (first binds on v7x), add a
    # key-tiled inner 'arbitrary' grid axis with an online running-top-k.


# ---------------------------------------------------------------------------
# DynamicEdgeConv kernel (one query-row tile per grid step):
#   - kNN graph (k nearest, same batch, no self loops) in feature space
#   - edge message mlp([x_i, x_j - x_i]) with Lin->ReLU->BN, Lin->ReLU->BN
#   - max aggregation over the k neighbors
# Input/keys carry an extra trailing lane holding |x|^2 (augmented feature);
# the output writes the same augmentation for the next layer.
# ---------------------------------------------------------------------------
def _edge_conv_kernel(k, tm, bq_ref, bk_ref, xk_ref,
                      w1a_ref, w1b_ref, b1_ref, w2_ref, b2_ref, o_ref):
    n, c_aug = xk_ref.shape
    h_dim = w2_ref.shape[1]

    xk_aug = xk_ref[...]                              # (N, C+1) bf16 resident keys
    bq = bq_ref[...]                                  # (TM, 1) int32 query batch ids
    bk = bk_ref[...]                                  # (1,  N) int32 key batch ids

    # Query tile sliced from the resident keys (no duplicate xq DMA stream).
    row_off = pl.multiple_of(pl.program_id(0) * tm, tm)
    xq_aug = xk_ref[pl.ds(row_off, tm), :]            # (TM, C+1) bf16

    # --- distances via ONE augmented matmul:  [-2*x_i, 1] @ [x_j | |x_j|^2]^T
    lane = jax.lax.broadcasted_iota(jnp.int32, (tm, c_aug), 1)
    lhs = jnp.where(lane == c_aug - 1, 1.0,
                    xq_aug.astype(jnp.float32) * -2.0).astype(jnp.bfloat16)
    dist0 = jax.lax.dot_general(lhs, xk_aug, (((1,), (1,)), ((), ())),
                                preferred_element_type=jnp.float32)   # (TM, N)
    # (|x_i|^2 dropped: per-row constant never changes the per-row argmin.)

    rowid = jax.lax.broadcasted_iota(jnp.int32, (tm, n), 0) + row_off
    colid = jax.lax.broadcasted_iota(jnp.int32, (tm, n), 1)
    big = jnp.float32(1e30)
    valid = (bq == bk) & (rowid != colid)             # same graph, not self
    dist = jnp.where(valid, dist0, big)

    # --- phase 1: k selection steps (VPU/XLU only), stash one-hot masks ------
    # (two lane reductions per step; the packed value+index single-argmin
    #  micro-opt is skipped — it perturbs ranking among near-equal distances)
    onehots = []
    masks = []
    for _ in range(k):
        mind = jnp.min(dist, axis=-1, keepdims=True)              # (TM, 1)
        has = mind < big                                          # valid neighbor left?
        cand = jnp.where(dist <= mind, colid, n)                  # tie-break: smallest idx
        idx = jnp.min(cand, axis=-1, keepdims=True)               # (TM, 1)
        sel = (colid == idx) & has                                # (TM, N) one-hot
        onehots.append(sel.astype(jnp.bfloat16))
        masks.append(has)
        dist = jnp.where(sel, big, dist)                          # remove selected

    # --- phase 2: ONE wide gather matmul + ONE edge-MLP chain over all k -----
    onehot_all = jnp.concatenate(onehots, axis=0)                 # (k*TM, N) bf16
    neigh = jnp.dot(onehot_all, xk_aug,
                    preferred_element_type=jnp.float32)           # (k*TM, C+1)

    # loop-invariant first-layer projection of x_i (computed once, tiled k times)
    h1 = jnp.dot(xq_aug, w1a_ref[...],
                 preferred_element_type=jnp.float32) + b1_ref[...]  # (TM, H)
    h1_all = jnp.concatenate([h1] * k, axis=0)                      # (k*TM, H)
    xq_all = jnp.concatenate([xq_aug.astype(jnp.float32)] * k, axis=0)

    diff = (neigh - xq_all).astype(jnp.bfloat16)                    # (k*TM, C+1)
    e = jnp.maximum(
        h1_all + jnp.dot(diff, w1b_ref[...], preferred_element_type=jnp.float32),
        0.0)
    e = jnp.maximum(
        jnp.dot(e.astype(jnp.bfloat16), w2_ref[...],
                preferred_element_type=jnp.float32) + b2_ref[...],
        0.0)                                                        # (k*TM, H)

    # --- max aggregation over the k neighbors (exhausted rows -> 0, PyG fill)
    acc = jnp.zeros((tm, h_dim), jnp.float32)
    for j in range(k):
        ej = e[j * tm:(j + 1) * tm, :]
        acc = jnp.maximum(acc, jnp.where(masks[j], ej, 0.0))

    out = acc * BN_SCALE          # second BN (commutes with max of ReLU output)
    o_ref[:, :h_dim] = out.astype(jnp.bfloat16)
    # write |out|^2 as the augmented lane for the next layer's distance matmul
    o_ref[:, h_dim:] = jnp.sum(out * out, axis=-1, keepdims=True).astype(jnp.bfloat16)


def edge_conv(x_aug, bq, bk, w1, b1, w2, b2, *, k, tm, vmem_limit):
    n, c_aug = x_aug.shape
    c = c_aug - 1
    h = w2.shape[1]

    # Split W1 = [W1a ; W1b] acting on [x_i , x_j - x_i]; append a zero row so
    # the augmented |x|^2 lane is ignored by the edge MLP.
    zrow = jnp.zeros((1, h), w1.dtype)
    w1a = jnp.concatenate([w1[:c, :], zrow], axis=0).astype(jnp.bfloat16)
    w1b = jnp.concatenate([w1[c:, :], zrow], axis=0).astype(jnp.bfloat16)
    w2s = (BN_SCALE * w2).astype(jnp.bfloat16)          # first BN folded into W2
    b1f = b1.astype(jnp.float32)
    b2f = b2.astype(jnp.float32)

    full = lambda i: (0, 0)
    kernel = functools.partial(_edge_conv_kernel, k, tm)
    # TODO(synk): mark the resident operands (bk, keys, weights) with
    # pipeline_mode=pl.Buffered(1) once single-buffering is confirmed on the
    # target jax version; kept at the default here to guarantee compilation.
    return pl.pallas_call(
        kernel,
        out_shape=jax.ShapeDtypeStruct((n, h + 1), jnp.bfloat16),
        grid=(n // tm,),
        in_specs=[
            pl.BlockSpec((tm, 1), lambda i: (i, 0)),   # query batch ids
            pl.BlockSpec((1, n), full),                # key batch ids (resident)
            pl.BlockSpec((n, c_aug), full),            # augmented keys (resident)
            pl.BlockSpec((c_aug, h), full),            # W1a (+zero row)
            pl.BlockSpec((c_aug, h), full),            # W1b (+zero row)
            pl.BlockSpec((1, h), full),                # b1
            pl.BlockSpec((h, h), full),                # W2 (BN folded)
            pl.BlockSpec((1, h), full),                # b2
        ],
        out_specs=pl.BlockSpec((tm, h + 1), lambda i: (i, 0)),
        compiler_params=pltpu.CompilerParams(
            dimension_semantics=("parallel",),
            vmem_limit_bytes=vmem_limit),
    )(bq, bk, x_aug, w1a, w1b, b1f, w2s, b2f)


# ---------------------------------------------------------------------------
# Head kernel: lin1 (3*64 -> 1024, split over x1/x2/x3 so no wrapper concat) +
# MLP(1024->256) + MLP(256->128) + Lin(128->out) + log_softmax(dim=1).
# BN scales folded into the following layer's weights; Dropout is eval-mode
# identity.
# ---------------------------------------------------------------------------
def _head_kernel(x1_ref, x2_ref, x3_ref, w1a_ref, w1b_ref, w1c_ref, bl1_ref,
                 wa_ref, ba_ref, wb_ref, bb_ref, wc_ref, bc_ref, o_ref):
    h = jnp.dot(x1_ref[...], w1a_ref[...], preferred_element_type=jnp.float32)
    h = h + jnp.dot(x2_ref[...], w1b_ref[...], preferred_element_type=jnp.float32)
    h = h + jnp.dot(x3_ref[...], w1c_ref[...], preferred_element_type=jnp.float32)
    h = jnp.maximum(h + bl1_ref[...], 0.0)             # lin1 (its BN folded into wa)

    # TODO(synk): Dropout(0.5) layers are identity in eval mode (no RNG masking).
    h = jnp.maximum(jnp.dot(h.astype(jnp.bfloat16), wa_ref[...],
                            preferred_element_type=jnp.float32) + ba_ref[...], 0.0)
    h = jnp.maximum(jnp.dot(h.astype(jnp.bfloat16), wb_ref[...],
                            preferred_element_type=jnp.float32) + bb_ref[...], 0.0)
    logits = jnp.dot(h.astype(jnp.bfloat16), wc_ref[...],
                     preferred_element_type=jnp.float32) + bc_ref[...]

    # log_softmax over the feature dim (dim=1)
    m = jnp.max(logits, axis=-1, keepdims=True)
    lse = m + jnp.log(jnp.sum(jnp.exp(logits - m), axis=-1, keepdims=True))
    o_ref[...] = logits - lse


def head(x1, x2, x3, params, *, tm, vmem_limit):
    n, c_aug = x1.shape                                # (N_pad, 64+1)
    c = c_aug - 1
    wl1, bl1 = params["lin1"]
    wa, ba = params["mlp_a"]
    wb, bb = params["mlp_b"]
    wc, bc = params["lin_out"]

    # Split lin1 over the three conv outputs (no wrapper-side concat) and add a
    # zero row so each input's augmented |x|^2 lane is ignored.
    z = jnp.zeros((1, wl1.shape[1]), wl1.dtype)
    w1a = jnp.concatenate([wl1[:c], z], axis=0).astype(jnp.bfloat16)
    w1b = jnp.concatenate([wl1[c:2 * c], z], axis=0).astype(jnp.bfloat16)
    w1c = jnp.concatenate([wl1[2 * c:], z], axis=0).astype(jnp.bfloat16)
    waf = (BN_SCALE * wa).astype(jnp.bfloat16)          # lin1 BN folded
    wbf = (BN_SCALE * wb).astype(jnp.bfloat16)          # mlp_a BN folded
    wcf = (BN_SCALE * wc).astype(jnp.bfloat16)          # mlp_b BN folded
    out_ch = wc.shape[1]

    full = lambda i: (0, 0)
    xspec = pl.BlockSpec((tm, c_aug), lambda i: (i, 0))
    return pl.pallas_call(
        _head_kernel,
        out_shape=jax.ShapeDtypeStruct((n, out_ch), jnp.float32),
        grid=(n // tm,),
        in_specs=[xspec, xspec, xspec,
                  pl.BlockSpec(w1a.shape, full), pl.BlockSpec(w1b.shape, full),
                  pl.BlockSpec(w1c.shape, full), pl.BlockSpec(bl1.shape, full),
                  pl.BlockSpec(waf.shape, full), pl.BlockSpec(ba.shape, full),
                  pl.BlockSpec(wbf.shape, full), pl.BlockSpec(bb.shape, full),
                  pl.BlockSpec(wcf.shape, full), pl.BlockSpec(bc.shape, full)],
        out_specs=pl.BlockSpec((tm, out_ch), lambda i: (i, 0)),
        compiler_params=pltpu.CompilerParams(
            dimension_semantics=("parallel",),
            vmem_limit_bytes=vmem_limit),
    )(x1, x2, x3, w1a, w1b, w1c, bl1, waf, ba, wbf, bb, wcf, bc)


# ---------------------------------------------------------------------------
# Parameter init (deterministic, synthetic) and full forward.
# ---------------------------------------------------------------------------
def _init_linear(key, fan_in, fan_out):
    kw, kb = jax.random.split(key)
    w = jax.random.normal(kw, (fan_in, fan_out), jnp.float32) / np.sqrt(fan_in)
    b = 0.01 * jax.random.normal(kb, (1, fan_out), jnp.float32)
    return w, b


def init_params(key, out_channels):
    keys = jax.random.split(key, 10)
    params = {}
    # conv1: MLP([2*6, 64, 64]);  conv2/conv3: MLP([2*64, 64, 64])
    params["conv1"] = (_init_linear(keys[0], 2 * 6, 64), _init_linear(keys[1], 64, 64))
    params["conv2"] = (_init_linear(keys[2], 2 * 64, 64), _init_linear(keys[3], 64, 64))
    params["conv3"] = (_init_linear(keys[4], 2 * 64, 64), _init_linear(keys[5], 64, 64))
    params["lin1"] = _init_linear(keys[6], 3 * 64, 1024)          # MLP([192, 1024])
    params["mlp_a"] = _init_linear(keys[7], 1024, 256)            # MLP([1024, 256])
    params["mlp_b"] = _init_linear(keys[8], 256, 128)             # MLP([256, 128])
    params["lin_out"] = _init_linear(keys[9], 128, out_channels)  # Lin(128, out)
    return params


def net_forward(x, pos, batch, params, *, k=3):
    n = x.shape[0]
    kind = _device_kind()
    vmem_limit = _vmem_limit_bytes(kind)

    # Tile sizes: edge-conv TM from an explicit VMEM budget; rows padded to a
    # tile multiple (masked-tail replacement) so TM never degrades to N.
    n16 = _round_up(n, 16)
    tm_cap = _edge_tile_rows(n16, vmem_limit, k)
    if n16 <= tm_cap:
        tm_edge, n_pad = n16, n16
    else:
        tm_edge = tm_cap
        n_pad = _round_up(n, tm_edge)

    head_target = 256 if ("v6" in kind or "v7" in kind) else 128   # MXU rows
    if n_pad <= head_target:
        tm_head = n_pad
    elif n_pad % head_target == 0:
        tm_head = head_target
    else:
        tm_head = tm_edge

    # Pad rows; padded rows get batch id -1 so no real point ever selects them.
    x0 = jnp.concatenate([x, pos], axis=-1).astype(jnp.float32)    # (N, 6)
    x0 = jnp.pad(x0, ((0, n_pad - n), (0, 0)))
    bfull = jnp.pad(batch.astype(jnp.int32), (0, n_pad - n), constant_values=-1)
    bq = bfull[:, None]                                            # (N_pad, 1)
    bk = bfull[None, :]                                            # (1, N_pad)

    # conv1's augmented input (features | |x|^2); later layers write their own.
    x0_aug = jnp.concatenate(
        [x0, jnp.sum(x0 * x0, axis=-1, keepdims=True)], axis=-1
    ).astype(jnp.bfloat16)                                         # (N_pad, 7)

    (w1, b1), (w2, b2) = params["conv1"]
    x1 = edge_conv(x0_aug, bq, bk, w1, b1, w2, b2, k=k, tm=tm_edge,
                   vmem_limit=vmem_limit)
    (w1, b1), (w2, b2) = params["conv2"]
    x2 = edge_conv(x1, bq, bk, w1, b1, w2, b2, k=k, tm=tm_edge,
                   vmem_limit=vmem_limit)
    (w1, b1), (w2, b2) = params["conv3"]
    x3 = edge_conv(x2, bq, bk, w1, b1, w2, b2, k=k, tm=tm_edge,
                   vmem_limit=vmem_limit)

    out = head(x1, x2, x3, params, tm=tm_head, vmem_limit=vmem_limit)
    return out[:n]                                                 # drop padded rows


if __name__ == "__main__":
    OUT_CHANNELS = 8
    K = 3
    PTS_PER_GRAPH = 16
    N_GRAPHS = 2
    N = PTS_PER_GRAPH * N_GRAPHS

    key = jax.random.PRNGKey(0)
    kx, kp, kparams = jax.random.split(key, 3)
    x = jax.random.normal(kx, (N, 3), jnp.float32)       # point features
    pos = jax.random.normal(kp, (N, 3), jnp.float32)     # point positions
    batch = jnp.repeat(jnp.arange(N_GRAPHS, dtype=jnp.int32), PTS_PER_GRAPH)

    params = init_params(kparams, OUT_CHANNELS)

    out = jax.jit(functools.partial(net_forward, k=K))(x, pos, batch, params)
    out = jax.block_until_ready(out)

    assert out.shape == (N, OUT_CHANNELS)
    # rows of log_softmax should sum (in prob space) to ~1
    assert np.allclose(np.exp(np.asarray(out)).sum(axis=1), 1.0, atol=1e-3)
    print("KERNEL_OK")
</pallas_src>

<mosaic_0001>
module attributes {stable_mosaic.version = 11 : i64} {
  func.func @_edge_conv_kernel(%arg0: i32, %arg1: memref<32x1xi32, #tpu.memory_space<vmem>>, %arg2: memref<1x32xi32, #tpu.memory_space<vmem>>, %arg3: memref<32x7xbf16, #tpu.memory_space<vmem>>, %arg4: memref<7x64xbf16, #tpu.memory_space<vmem>>, %arg5: memref<7x64xbf16, #tpu.memory_space<vmem>>, %arg6: memref<1x64xf32, #tpu.memory_space<vmem>>, %arg7: memref<64x64xbf16, #tpu.memory_space<vmem>>, %arg8: memref<1x64xf32, #tpu.memory_space<vmem>>, %arg9: memref<32x65xbf16, #tpu.memory_space<vmem>>) attributes {dimension_semantics = [#tpu.dimension_semantics<parallel>], iteration_bounds = array<i64: 1>, scalar_prefetch = 0 : i64, scratch_operands = 0 : i64, tpu.core_type = #tpu.core_type<tc>, window_params = [{transform_indices = @transform_0, window_bounds = array<i64: 32, 1>}, {pipeline_mode = #tpu.pipeline_mode<synchronous>, transform_indices = @transform_1, window_bounds = array<i64: 1, 32>}, {pipeline_mode = #tpu.pipeline_mode<synchronous>, transform_indices = @transform_2, window_bounds = array<i64: 32, 7>}, {pipeline_mode = #tpu.pipeline_mode<synchronous>, transform_indices = @transform_3, window_bounds = array<i64: 7, 64>}, {pipeline_mode = #tpu.pipeline_mode<synchronous>, transform_indices = @transform_4, window_bounds = array<i64: 7, 64>}, {pipeline_mode = #tpu.pipeline_mode<synchronous>, transform_indices = @transform_5, window_bounds = array<i64: 1, 64>}, {pipeline_mode = #tpu.pipeline_mode<synchronous>, transform_indices = @transform_6, window_bounds = array<i64: 64, 64>}, {pipeline_mode = #tpu.pipeline_mode<synchronous>, transform_indices = @transform_7, window_bounds = array<i64: 1, 64>}, {transform_indices = @transform_8, window_bounds = array<i64: 32, 65>}]} {
    %c0 = arith.constant 0 : index
    %c0_0 = arith.constant 0 : index
    %0 = vector.load %arg3[%c0, %c0_0] : memref<32x7xbf16, #tpu.memory_space<vmem>>, vector<32x7xbf16>
    %c0_1 = arith.constant 0 : index
    %c0_2 = arith.constant 0 : index
    %1 = vector.load %arg1[%c0_1, %c0_2] : memref<32x1xi32, #tpu.memory_space<vmem>>, vector<32x1xi32>
    %c0_3 = arith.constant 0 : index
    %c0_4 = arith.constant 0 : index
    %2 = vector.load %arg2[%c0_3, %c0_4] : memref<1x32xi32, #tpu.memory_space<vmem>>, vector<1x32xi32>
    %c32_i32 = arith.constant 32 : i32
    %3 = arith.muli %arg0, %c32_i32 : i32
    %4 = tpu.assume_multiple %3, 32 : i32
    %5 = arith.index_cast %4 : i32 to index
    %c0_5 = arith.constant 0 : index
    %6 = vector.load %arg3[%5, %c0_5] : memref<32x7xbf16, #tpu.memory_space<vmem>>, vector<32x7xbf16>
    %7 = tpu.iota {dimensions = array<i32: 1>} : vector<32x7xi32>
    %c6_i32 = arith.constant 6 : i32
    %8 = vector.broadcast %c6_i32 : i32 to vector<32x7xi32>
    %9 = arith.cmpi eq, %7, %8 : vector<32x7xi32>
    %10 = arith.extf %6 : vector<32x7xbf16> to vector<32x7xf32>
    %cst = arith.constant -2.000000e+00 : f32
    %11 = vector.broadcast %cst : f32 to vector<32x7xf32>
    %12 = arith.mulf %10, %11 : vector<32x7xf32>
    %cst_6 = arith.constant 1.000000e+00 : f32
    %13 = vector.broadcast %cst_6 : f32 to vector<32x7xf32>
    %14 = arith.select %9, %13, %12 : vector<32x7xi1>, vector<32x7xf32>
    %15 = arith.truncf %14 : vector<32x7xf32> to vector<32x7xbf16>
    %cst_7 = arith.constant dense<0.000000e+00> : vector<32x32xf32>
    %16 = tpu.matmul %15, %0, %cst_7 {dimension_numbers = #tpu.dot_dimension_numbers<[1], [1], [0], [0], [0, 0, 1, 0], [], []>} : vector<32x7xbf16>, vector<32x7xbf16>, vector<32x32xf32> -> vector<32x32xf32>
    %17 = tpu.iota {dimensions = array<i32: 0>} : vector<32x32xi32>
    %18 = vector.broadcast %4 : i32 to vector<32x32xi32>
    %19 = arith.addi %17, %18 : vector<32x32xi32>
    %20 = tpu.iota {dimensions = array<i32: 1>} : vector<32x32xi32>
    %21 = vector.broadcast %1 : vector<32x1xi32> to vector<32x32xi32>
    %22 = vector.broadcast %2 : vector<1x32xi32> to vector<32x32xi32>
    %23 = arith.cmpi eq, %21, %22 : vector<32x32xi32>
    %24 = arith.cmpi ne, %19, %20 : vector<32x32xi32>
    %25 = arith.andi %23, %24 : vector<32x32xi1>
    %cst_8 = arith.constant 1.000000e+30 : f32
    %26 = vector.broadcast %cst_8 : f32 to vector<32x32xf32>
    %27 = arith.select %25, %16, %26 : vector<32x32xi1>, vector<32x32xf32>
    %cst_9 = arith.constant dense<0x7F800000> : vector<32xf32>
    %28 = vector.multi_reduction <minimumf>, %27, %cst_9 [1] : vector<32x32xf32> to vector<32xf32>
    %29 = vector.shape_cast %28 : vector<32xf32> to vector<32x1xf32>
    %cst_10 = arith.constant 1.000000e+30 : f32
    %30 = vector.broadcast %cst_10 : f32 to vector<32x1xf32>
    %31 = arith.cmpf olt, %29, %30 : vector<32x1xf32>
    %32 = vector.broadcast %29 : vector<32x1xf32> to vector<32x32xf32>
    %33 = arith.cmpf ole, %27, %32 : vector<32x32xf32>
    %c32_i32_11 = arith.constant 32 : i32
    %34 = vector.broadcast %c32_i32_11 : i32 to vector<32x32xi32>
    %35 = arith.select %33, %20, %34 : vector<32x32xi1>, vector<32x32xi32>
    %cst_12 = arith.constant dense<2147483647> : vector<32xi32>
    %36 = vector.multi_reduction <minsi>, %35, %cst_12 [1] : vector<32x32xi32> to vector<32xi32>
    %37 = vector.shape_cast %36 : vector<32xi32> to vector<32x1xi32>
    %38 = vector.broadcast %37 : vector<32x1xi32> to vector<32x32xi32>
    %39 = arith.cmpi eq, %20, %38 : vector<32x32xi32>
    %40 = vector.broadcast %31 : vector<32x1xi1> to vector<32x32xi1>
    %41 = arith.andi %39, %40 : vector<32x32xi1>
    %42 = arith.extui %41 : vector<32x32xi1> to vector<32x32xi32>
    %43 = arith.sitofp %42 : vector<32x32xi32> to vector<32x32xf32>
    %44 = arith.truncf %43 : vector<32x32xf32> to vector<32x32xbf16>
    %cst_13 = arith.constant 1.000000e+30 : f32
    %45 = vector.broadcast %cst_13 : f32 to vector<32x32xf32>
    %46 = arith.select %41, %45, %27 : vector<32x32xi1>, vector<32x32xf32>
    %cst_14 = arith.constant dense<0x7F800000> : vector<32xf32>
    %47 = vector.multi_reduction <minimumf>, %46, %cst_14 [1] : vector<32x32xf32> to vector<32xf32>
    %48 = vector.shape_cast %47 : vector<32xf32> to vector<32x1xf32>
    %cst_15 = arith.constant 1.000000e+30 : f32
    %49 = vector.broadcast %cst_15 : f32 to vector<32x1xf32>
    %50 = arith.cmpf olt, %48, %49 : vector<32x1xf32>
    %51 = vector.broadcast %48 : vector<32x1xf32> to vector<32x32xf32>
    %52 = arith.cmpf ole, %46, %51 : vector<32x32xf32>
    %c32_i32_16 = arith.constant 32 : i32
    %53 = vector.broadcast %c32_i32_16 : i32 to vector<32x32xi32>
    %54 = arith.select %52, %20, %53 : vector<32x32xi1>, vector<32x32xi32>
    %cst_17 = arith.constant dense<2147483647> : vector<32xi32>
    %55 = vector.multi_reduction <minsi>, %54, %cst_17 [1] : vector<32x32xi32> to vector<32xi32>
    %56 = vector.shape_cast %55 : vector<32xi32> to vector<32x1xi32>
    %57 = vector.broadcast %56 : vector<32x1xi32> to vector<32x32xi32>
    %58 = arith.cmpi eq, %20, %57 : vector<32x32xi32>
    %59 = vector.broadcast %50 : vector<32x1xi1> to vector<32x32xi1>
    %60 = arith.andi %58, %59 : vector<32x32xi1>
    %61 = arith.extui %60 : vector<32x32xi1> to vector<32x32xi32>
    %62 = arith.sitofp %61 : vector<32x32xi32> to vector<32x32xf32>
    %63 = arith.truncf %62 : vector<32x32xf32> to vector<32x32xbf16>
    %cst_18 = arith.constant 1.000000e+30 : f32
    %64 = vector.broadcast %cst_18 : f32 to vector<32x32xf32>
    %65 = arith.select %60, %64, %46 : vector<32x32xi1>, vector<32x32xf32>
    %cst_19 = arith.constant dense<0x7F800000> : vector<32xf32>
    %66 = vector.multi_reduction <minimumf>, %65, %cst_19 [1] : vector<32x32xf32> to vector<32xf32>
    %67 = vector.shape_cast %66 : vector<32xf32> to vector<32x1xf32>
    %cst_20 = arith.constant 1.000000e+30 : f32
    %68 = vector.broadcast %cst_20 : f32 to vector<32x1xf32>
    %69 = arith.cmpf olt, %67, %68 : vector<32x1xf32>
    %70 = vector.broadcast %67 : vector<32x1xf32> to vector<32x32xf32>
    %71 = arith.cmpf ole, %65, %70 : vector<32x32xf32>
    %c32_i32_21 = arith.constant 32 : i32
    %72 = vector.broadcast %c32_i32_21 : i32 to vector<32x32xi32>
    %73 = arith.select %71, %20, %72 : vector<32x32xi1>, vector<32x32xi32>
    %cst_22 = arith.constant dense<2147483647> : vector<32xi32>
    %74 = vector.multi_reduction <minsi>, %73, %cst_22 [1] : vector<32x32xi32> to vector<32xi32>
    %75 = vector.shape_cast %74 : vector<32xi32> to vector<32x1xi32>
    %76 = vector.broadcast %75 : vector<32x1xi32> to vector<32x32xi32>
    %77 = arith.cmpi eq, %20, %76 : vector<32x32xi32>
    %78 = vector.broadcast %69 : vector<32x1xi1> to vector<32x32xi1>
    %79 = arith.andi %77, %78 : vector<32x32xi1>
    %80 = arith.extui %79 : vector<32x32xi1> to vector<32x32xi32>
    %81 = arith.sitofp %80 : vector<32x32xi32> to vector<32x32xf32>
    %82 = arith.truncf %81 : vector<32x32xf32> to vector<32x32xbf16>
    %83 = tpu.concatenate %44, %63, %82 in 0 : vector<32x32xbf16>, vector<32x32xbf16>, vector<32x32xbf16> -> vector<96x32xbf16>
    %cst_23 = arith.constant dense<0.000000e+00> : vector<96x7xf32>
    %84 = tpu.matmul %83, %0, %cst_23 {dimension_numbers = #tpu.dot_dimension_numbers<[1], [0], [0], [1], [0, 0, 1, 1], [], []>} : vector<96x32xbf16>, vector<32x7xbf16>, vector<96x7xf32> -> vector<96x7xf32>
    %c0_24 = arith.constant 0 : index
    %c0_25 = arith.constant 0 : index
    %85 = vector.load %arg4[%c0_24, %c0_25] : memref<7x64xbf16, #tpu.memory_space<vmem>>, vector<7x64xbf16>
    %cst_26 = arith.constant dense<0.000000e+00> : vector<32x64xf32>
    %86 = tpu.matmul %6, %85, %cst_26 {dimension_numbers = #tpu.dot_dimension_numbers<[1], [0], [0], [1], [0, 0, 1, 1], [], []>} : vector<32x7xbf16>, vector<7x64xbf16>, vector<32x64xf32> -> vector<32x64xf32>
    %c0_27 = arith.constant 0 : index
    %c0_28 = arith.constant 0 : index
    %87 = vector.load %arg6[%c0_27, %c0_28] : memref<1x64xf32, #tpu.memory_space<vmem>>, vector<1x64xf32>
    %88 = vector.broadcast %87 : vector<1x64xf32> to vector<32x64xf32>
    %89 = arith.addf %86, %88 : vector<32x64xf32>
    %90 = tpu.concatenate %89, %89, %89 in 0 : vector<32x64xf32>, vector<32x64xf32>, vector<32x64xf32> -> vector<96x64xf32>
    %91 = arith.extf %6 : vector<32x7xbf16> to vector<32x7xf32>
    %92 = tpu.concatenate %91, %91, %91 in 0 : vector<32x7xf32>, vector<32x7xf32>, vector<32x7xf32> -> vector<96x7xf32>
    %93 = arith.subf %84, %92 : vector<96x7xf32>
    %94 = arith.truncf %93 : vector<96x7xf32> to vector<96x7xbf16>
    %c0_29 = arith.constant 0 : index
    %c0_30 = arith.constant 0 : index
    %95 = vector.load %arg5[%c0_29, %c0_30] : memref<7x64xbf16, #tpu.memory_space<vmem>>, vector<7x64xbf16>
    %cst_31 = arith.constant dense<0.000000e+00> : vector<96x64xf32>
    %96 = tpu.matmul %94, %95, %cst_31 {dimension_numbers = #tpu.dot_dimension_numbers<[1], [0], [0], [1], [0, 0, 1, 1], [], []>} : vector<96x7xbf16>, vector<7x64xbf16>, vector<96x64xf32> -> vector<96x64xf32>
    %97 = arith.addf %90, %96 : vector<96x64xf32>
    %cst_32 = arith.constant 0.000000e+00 : f32
    %98 = vector.broadcast %cst_32 : f32 to vector<96x64xf32>
    %99 = arith.maximumf %97, %98 : vector<96x64xf32>
    %100 = arith.truncf %99 : vector<96x64xf32> to vector<96x64xbf16>
    %c0_33 = arith.constant 0 : index
    %c0_34 = arith.constant 0 : index
    %101 = vector.load %arg7[%c0_33, %c0_34] : memref<64x64xbf16, #tpu.memory_space<vmem>>, vector<64x64xbf16>
    %cst_35 = arith.constant dense<0.000000e+00> : vector<96x64xf32>
    %102 = tpu.matmul %100, %101, %cst_35 {dimension_numbers = #tpu.dot_dimension_numbers<[1], [0], [0], [1], [0, 0, 1, 1], [], []>} : vector<96x64xbf16>, vector<64x64xbf16>, vector<96x64xf32> -> vector<96x64xf32>
    %c0_36 = arith.constant 0 : index
    %c0_37 = arith.constant 0 : index
    %103 = vector.load %arg8[%c0_36, %c0_37] : memref<1x64xf32, #tpu.memory_space<vmem>>, vector<1x64xf32>
    %104 = vector.broadcast %103 : vector<1x64xf32> to vector<96x64xf32>
    %105 = arith.addf %102, %104 : vector<96x64xf32>
    %cst_38 = arith.constant 0.000000e+00 : f32
    %106 = vector.broadcast %cst_38 : f32 to vector<96x64xf32>
    %107 = arith.maximumf %105, %106 : vector<96x64xf32>
    %cst_39 = arith.constant 0.000000e+00 : f32
    %108 = vector.broadcast %cst_39 : f32 to vector<32x64xf32>
    %109 = vector.extract_strided_slice %107 {offsets = [0, 0], sizes = [32, 64], strides = [1, 1]} : vector<96x64xf32> to vector<32x64xf32>
    %cst_40 = arith.constant 0.000000e+00 : f32
    %110 = vector.shape_cast %31 : vector<32x1xi1> to vector<32x1xi1>
    %111 = vector.broadcast %110 : vector<32x1xi1> to vector<32x64xi1>
    %112 = vector.broadcast %cst_40 : f32 to vector<32x64xf32>
    %113 = arith.select %111, %109, %112 : vector<32x64xi1>, vector<32x64xf32>
    %114 = arith.maximumf %108, %113 : vector<32x64xf32>
    %115 = vector.extract_strided_slice %107 {offsets = [32, 0], sizes = [32, 64], strides = [1, 1]} : vector<96x64xf32> to vector<32x64xf32>
    %cst_41 = arith.constant 0.000000e+00 : f32
    %116 = vector.shape_cast %50 : vector<32x1xi1> to vector<32x1xi1>
    %117 = vector.broadcast %116 : vector<32x1xi1> to vector<32x64xi1>
    %118 = vector.broadcast %cst_41 : f32 to vector<32x64xf32>
    %119 = arith.select %117, %115, %118 : vector<32x64xi1>, vector<32x64xf32>
    %120 = arith.maximumf %114, %119 : vector<32x64xf32>
    %121 = vector.extract_strided_slice %107 {offsets = [64, 0], sizes = [32, 64], strides = [1, 1]} : vector<96x64xf32> to vector<32x64xf32>
    %cst_42 = arith.constant 0.000000e+00 : f32
    %122 = vector.shape_cast %69 : vector<32x1xi1> to vector<32x1xi1>
    %123 = vector.broadcast %122 : vector<32x1xi1> to vector<32x64xi1>
    %124 = vector.broadcast %cst_42 : f32 to vector<32x64xf32>
    %125 = arith.select %123, %121, %124 : vector<32x64xi1>, vector<32x64xf32>
    %126 = arith.maximumf %120, %125 : vector<32x64xf32>
    %cst_43 = arith.constant 0.999994993 : f32
    %127 = vector.broadcast %cst_43 : f32 to vector<32x64xf32>
    %128 = arith.mulf %126, %127 : vector<32x64xf32>
    %129 = arith.truncf %128 : vector<32x64xf32> to vector<32x64xbf16>
    %c0_44 = arith.constant 0 : index
    %c0_45 = arith.constant 0 : index
    %130 = vector.load %arg9[%c0_44, %c0_45] : memref<32x65xbf16, #tpu.memory_space<vmem>>, vector<32x64xbf16>
    tpu.vector_store %arg9[%c0_44, %c0_45], %129 {strides = array<i32>} : memref<32x65xbf16, #tpu.memory_space<vmem>>, vector<32x64xbf16>,
    %131 = arith.mulf %128, %128 : vector<32x64xf32>
    %cst_46 = arith.constant dense<0.000000e+00> : vector<32xf32>
    %132 = vector.multi_reduction <add>, %131, %cst_46 [1] : vector<32x64xf32> to vector<32xf32>
    %133 = vector.shape_cast %132 : vector<32xf32> to vector<32x1xf32>
    %134 = arith.truncf %133 : vector<32x1xf32> to vector<32x1xbf16>
    %c0_47 = arith.constant 0 : index
    %c64 = arith.constant 64 : index
    %135 = vector.load %arg9[%c0_47, %c64] : memref<32x65xbf16, #tpu.memory_space<vmem>>, vector<32x1xbf16>
    tpu.vector_store %arg9[%c0_47, %c64], %134 {strides = array<i32>} : memref<32x65xbf16, #tpu.memory_space<vmem>>, vector<32x1xbf16>,
    return
  }
  func.func @transform_0(%arg0: i32) -> (i32, i32) {
    %c0_i32 = arith.constant 0 : i32
    %c0_i32_0 = arith.constant 0 : i32
    return %arg0, %c0_i32 : i32, i32
  }
  func.func @transform_1(%arg0: i32) -> (i32, i32) {
    %c0_i32 = arith.constant 0 : i32
    %c0_i32_0 = arith.constant 0 : i32
    %c0_i32_1 = arith.constant 0 : i32
    return %c0_i32, %c0_i32_0 : i32, i32
  }
  func.func @transform_2(%arg0: i32) -> (i32, i32) {
    %c0_i32 = arith.constant 0 : i32
    %c0_i32_0 = arith.constant 0 : i32
    %c0_i32_1 = arith.constant 0 : i32
    return %c0_i32, %c0_i32_0 : i32, i32
  }
  func.func @transform_3(%arg0: i32) -> (i32, i32) {
    %c0_i32 = arith.constant 0 : i32
    %c0_i32_0 = arith.constant 0 : i32
    %c0_i32_1 = arith.constant 0 : i32
    return %c0_i32, %c0_i32_0 : i32, i32
  }
  func.func @transform_4(%arg0: i32) -> (i32, i32) {
    %c0_i32 = arith.constant 0 : i32
    %c0_i32_0 = arith.constant 0 : i32
    %c0_i32_1 = arith.constant 0 : i32
    return %c0_i32, %c0_i32_0 : i32, i32
  }
  func.func @transform_5(%arg0: i32) -> (i32, i32) {
    %c0_i32 = arith.constant 0 : i32
    %c0_i32_0 = arith.constant 0 : i32
    %c0_i32_1 = arith.constant 0 : i32
    return %c0_i32, %c0_i32_0 : i32, i32
  }
  func.func @transform_6(%arg0: i32) -> (i32, i32) {
    %c0_i32 = arith.constant 0 : i32
    %c0_i32_0 = arith.constant 0 : i32
    %c0_i32_1 = arith.constant 0 : i32
    return %c0_i32, %c0_i32_0 : i32, i32
  }
  func.func @transform_7(%arg0: i32) -> (i32, i32) {
    %c0_i32 = arith.constant 0 : i32
    %c0_i32_0 = arith.constant 0 : i32
    %c0_i32_1 = arith.constant 0 : i32
    return %c0_i32, %c0_i32_0 : i32, i32
  }
  func.func @transform_8(%arg0: i32) -> (i32, i32) {
    %c0_i32 = arith.constant 0 : i32
    %c0_i32_0 = arith.constant 0 : i32
    return %arg0, %c0_i32 : i32, i32
  }
}

module attributes {stable_mosaic.version = 11 : i64} {
  func.func @_edge_conv_kernel(%arg0: i32, %arg1: memref<32x1xi32, #tpu.memory_space<vmem>>, %arg2: memref<1x32xi32, #tpu.memory_space<vmem>>, %arg3: memref<32x65xbf16, #tpu.memory_space<vmem>>, %arg4: memref<65x64xbf16, #tpu.memory_space<vmem>>, %arg5: memref<65x64xbf16, #tpu.memory_space<vmem>>, %arg6: memref<1x64xf32, #tpu.memory_space<vmem>>, %arg7: memref<64x64xbf16, #tpu.memory_space<vmem>>, %arg8: memref<1x64xf32, #tpu.memory_space<vmem>>, %arg9: memref<32x65xbf16, #tpu.memory_space<vmem>>) attributes {dimension_semantics = [#tpu.dimension_semantics<parallel>], iteration_bounds = array<i64: 1>, scalar_prefetch = 0 : i64, scratch_operands = 0 : i64, tpu.core_type = #tpu.core_type<tc>, window_params = [{transform_indices = @transform_0, window_bounds = array<i64: 32, 1>}, {pipeline_mode = #tpu.pipeline_mode<synchronous>, transform_indices = @transform_1, window_bounds = array<i64: 1, 32>}, {pipeline_mode = #tpu.pipeline_mode<synchronous>, transform_indices = @transform_2, window_bounds = array<i64: 32, 65>}, {pipeline_mode = #tpu.pipeline_mode<synchronous>, transform_indices = @transform_3, window_bounds = array<i64: 65, 64>}, {pipeline_mode = #tpu.pipeline_mode<synchronous>, transform_indices = @transform_4, window_bounds = array<i64: 65, 64>}, {pipeline_mode = #tpu.pipeline_mode<synchronous>, transform_indices = @transform_5, window_bounds = array<i64: 1, 64>}, {pipeline_mode = #tpu.pipeline_mode<synchronous>, transform_indices = @transform_6, window_bounds = array<i64: 64, 64>}, {pipeline_mode = #tpu.pipeline_mode<synchronous>, transform_indices = @transform_7, window_bounds = array<i64: 1, 64>}, {transform_indices = @transform_8, window_bounds = array<i64: 32, 65>}]} {
    %c0 = arith.constant 0 : index
    %c0_0 = arith.constant 0 : index
    %0 = vector.load %arg3[%c0, %c0_0] : memref<32x65xbf16, #tpu.memory_space<vmem>>, vector<32x65xbf16>
    %c0_1 = arith.constant 0 : index
    %c0_2 = arith.constant 0 : index
    %1 = vector.load %arg1[%c0_1, %c0_2] : memref<32x1xi32, #tpu.memory_space<vmem>>, vector<32x1xi32>
    %c0_3 = arith.constant 0 : index
    %c0_4 = arith.constant 0 : index
    %2 = vector.load %arg2[%c0_3, %c0_4] : memref<1x32xi32, #tpu.memory_space<vmem>>, vector<1x32xi32>
    %c32_i32 = arith.constant 32 : i32
    %3 = arith.muli %arg0, %c32_i32 : i32
    %4 = tpu.assume_multiple %3, 32 : i32
    %5 = arith.index_cast %4 : i32 to index
    %c0_5 = arith.constant 0 : index
    %6 = vector.load %arg3[%5, %c0_5] : memref<32x65xbf16, #tpu.memory_space<vmem>>, vector<32x65xbf16>
    %7 = tpu.iota {dimensions = array<i32: 1>} : vector<32x65xi32>
    %c64_i32 = arith.constant 64 : i32
    %8 = vector.broadcast %c64_i32 : i32 to vector<32x65xi32>
    %9 = arith.cmpi eq, %7, %8 : vector<32x65xi32>
    %10 = arith.extf %6 : vector<32x65xbf16> to vector<32x65xf32>
    %cst = arith.constant -2.000000e+00 : f32
    %11 = vector.broadcast %cst : f32 to vector<32x65xf32>
    %12 = arith.mulf %10, %11 : vector<32x65xf32>
    %cst_6 = arith.constant 1.000000e+00 : f32
    %13 = vector.broadcast %cst_6 : f32 to vector<32x65xf32>
    %14 = arith.select %9, %13, %12 : vector<32x65xi1>, vector<32x65xf32>
    %15 = arith.truncf %14 : vector<32x65xf32> to vector<32x65xbf16>
    %cst_7 = arith.constant dense<0.000000e+00> : vector<32x32xf32>
    %16 = tpu.matmul %15, %0, %cst_7 {dimension_numbers = #tpu.dot_dimension_numbers<[1], [1], [0], [0], [0, 0, 1, 0], [], []>} : vector<32x65xbf16>, vector<32x65xbf16>, vector<32x32xf32> -> vector<32x32xf32>
    %17 = tpu.iota {dimensions = array<i32: 0>} : vector<32x32xi32>
    %18 = vector.broadcast %4 : i32 to vector<32x32xi32>
    %19 = arith.addi %17, %18 : vector<32x32xi32>
    %20 = tpu.iota {dimensions = array<i32: 1>} : vector<32x32xi32>
    %21 = vector.broadcast %1 : vector<32x1xi32> to vector<32x32xi32>
    %22 = vector.broadcast %2 : vector<1x32xi32> to vector<32x32xi32>
    %23 = arith.cmpi eq, %21, %22 : vector<32x32xi32>
    %24 = arith.cmpi ne, %19, %20 : vector<32x32xi32>
    %25 = arith.andi %23, %24 : vector<32x32xi1>
    %cst_8 = arith.constant 1.000000e+30 : f32
    %26 = vector.broadcast %cst_8 : f32 to vector<32x32xf32>
    %27 = arith.select %25, %16, %26 : vector<32x32xi1>, vector<32x32xf32>
    %cst_9 = arith.constant dense<0x7F800000> : vector<32xf32>
    %28 = vector.multi_reduction <minimumf>, %27, %cst_9 [1] : vector<32x32xf32> to vector<32xf32>
    %29 = vector.shape_cast %28 : vector<32xf32> to vector<32x1xf32>
    %cst_10 = arith.constant 1.000000e+30 : f32
    %30 = vector.broadcast %cst_10 : f32 to vector<32x1xf32>
    %31 = arith.cmpf olt, %29, %30 : vector<32x1xf32>
    %32 = vector.broadcast %29 : vector<32x1xf32> to vector<32x32xf32>
    %33 = arith.cmpf ole, %27, %32 : vector<32x32xf32>
    %c32_i32_11 = arith.constant 32 : i32
    %34 = vector.broadcast %c32_i32_11 : i32 to vector<32x32xi32>
    %35 = arith.select %33, %20, %34 : vector<32x32xi1>, vector<32x32xi32>
    %cst_12 = arith.constant dense<2147483647> : vector<32xi32>
    %36 = vector.multi_reduction <minsi>, %35, %cst_12 [1] : vector<32x32xi32> to vector<32xi32>
    %37 = vector.shape_cast %36 : vector<32xi32> to vector<32x1xi32>
    %38 = vector.broadcast %37 : vector<32x1xi32> to vector<32x32xi32>
    %39 = arith.cmpi eq, %20, %38 : vector<32x32xi32>
    %40 = vector.broadcast %31 : vector<32x1xi1> to vector<32x32xi1>
    %41 = arith.andi %39, %40 : vector<32x32xi1>
    %42 = arith.extui %41 : vector<32x32xi1> to vector<32x32xi32>
    %43 = arith.sitofp %42 : vector<32x32xi32> to vector<32x32xf32>
    %44 = arith.truncf %43 : vector<32x32xf32> to vector<32x32xbf16>
    %cst_13 = arith.constant 1.000000e+30 : f32
    %45 = vector.broadcast %cst_13 : f32 to vector<32x32xf32>
    %46 = arith.select %41, %45, %27 : vector<32x32xi1>, vector<32x32xf32>
    %cst_14 = arith.constant dense<0x7F800000> : vector<32xf32>
    %47 = vector.multi_reduction <minimumf>, %46, %cst_14 [1] : vector<32x32xf32> to vector<32xf32>
    %48 = vector.shape_cast %47 : vector<32xf32> to vector<32x1xf32>
    %cst_15 = arith.constant 1.000000e+30 : f32
    %49 = vector.broadcast %cst_15 : f32 to vector<32x1xf32>
    %50 = arith.cmpf olt, %48, %49 : vector<32x1xf32>
    %51 = vector.broadcast %48 : vector<32x1xf32> to vector<32x32xf32>
    %52 = arith.cmpf ole, %46, %51 : vector<32x32xf32>
    %c32_i32_16 = arith.constant 32 : i32
    %53 = vector.broadcast %c32_i32_16 : i32 to vector<32x32xi32>
    %54 = arith.select %52, %20, %53 : vector<32x32xi1>, vector<32x32xi32>
    %cst_17 = arith.constant dense<2147483647> : vector<32xi32>
    %55 = vector.multi_reduction <minsi>, %54, %cst_17 [1] : vector<32x32xi32> to vector<32xi32>
    %56 = vector.shape_cast %55 : vector<32xi32> to vector<32x1xi32>
    %57 = vector.broadcast %56 : vector<32x1xi32> to vector<32x32xi32>
    %58 = arith.cmpi eq, %20, %57 : vector<32x32xi32>
    %59 = vector.broadcast %50 : vector<32x1xi1> to vector<32x32xi1>
    %60 = arith.andi %58, %59 : vector<32x32xi1>
    %61 = arith.extui %60 : vector<32x32xi1> to vector<32x32xi32>
    %62 = arith.sitofp %61 : vector<32x32xi32> to vector<32x32xf32>
    %63 = arith.truncf %62 : vector<32x32xf32> to vector<32x32xbf16>
    %cst_18 = arith.constant 1.000000e+30 : f32
    %64 = vector.broadcast %cst_18 : f32 to vector<32x32xf32>
    %65 = arith.select %60, %64, %46 : vector<32x32xi1>, vector<32x32xf32>
    %cst_19 = arith.constant dense<0x7F800000> : vector<32xf32>
    %66 = vector.multi_reduction <minimumf>, %65, %cst_19 [1] : vector<32x32xf32> to vector<32xf32>
    %67 = vector.shape_cast %66 : vector<32xf32> to vector<32x1xf32>
    %cst_20 = arith.constant 1.000000e+30 : f32
    %68 = vector.broadcast %cst_20 : f32 to vector<32x1xf32>
    %69 = arith.cmpf olt, %67, %68 : vector<32x1xf32>
    %70 = vector.broadcast %67 : vector<32x1xf32> to vector<32x32xf32>
    %71 = arith.cmpf ole, %65, %70 : vector<32x32xf32>
    %c32_i32_21 = arith.constant 32 : i32
    %72 = vector.broadcast %c32_i32_21 : i32 to vector<32x32xi32>
    %73 = arith.select %71, %20, %72 : vector<32x32xi1>, vector<32x32xi32>
    %cst_22 = arith.constant dense<2147483647> : vector<32xi32>
    %74 = vector.multi_reduction <minsi>, %73, %cst_22 [1] : vector<32x32xi32> to vector<32xi32>
    %75 = vector.shape_cast %74 : vector<32xi32> to vector<32x1xi32>
    %76 = vector.broadcast %75 : vector<32x1xi32> to vector<32x32xi32>
    %77 = arith.cmpi eq, %20, %76 : vector<32x32xi32>
    %78 = vector.broadcast %69 : vector<32x1xi1> to vector<32x32xi1>
    %79 = arith.andi %77, %78 : vector<32x32xi1>
    %80 = arith.extui %79 : vector<32x32xi1> to vector<32x32xi32>
    %81 = arith.sitofp %80 : vector<32x32xi32> to vector<32x32xf32>
    %82 = arith.truncf %81 : vector<32x32xf32> to vector<32x32xbf16>
    %83 = tpu.concatenate %44, %63, %82 in 0 : vector<32x32xbf16>, vector<32x32xbf16>, vector<32x32xbf16> -> vector<96x32xbf16>
    %cst_23 = arith.constant dense<0.000000e+00> : vector<96x65xf32>
    %84 = tpu.matmul %83, %0, %cst_23 {dimension_numbers = #tpu.dot_dimension_numbers<[1], [0], [0], [1], [0, 0, 1, 1], [], []>} : vector<96x32xbf16>, vector<32x65xbf16>, vector<96x65xf32> -> vector<96x65xf32>
    %c0_24 = arith.constant 0 : index
    %c0_25 = arith.constant 0 : index
    %85 = vector.load %arg4[%c0_24, %c0_25] : memref<65x64xbf16, #tpu.memory_space<vmem>>, vector<65x64xbf16>
    %cst_26 = arith.constant dense<0.000000e+00> : vector<32x64xf32>
    %86 = tpu.matmul %6, %85, %cst_26 {dimension_numbers = #tpu.dot_dimension_numbers<[1], [0], [0], [1], [0, 0, 1, 1], [], []>} : vector<32x65xbf16>, vector<65x64xbf16>, vector<32x64xf32> -> vector<32x64xf32>
    %c0_27 = arith.constant 0 : index
    %c0_28 = arith.constant 0 : index
    %87 = vector.load %arg6[%c0_27, %c0_28] : memref<1x64xf32, #tpu.memory_space<vmem>>, vector<1x64xf32>
    %88 = vector.broadcast %87 : vector<1x64xf32> to vector<32x64xf32>
    %89 = arith.addf %86, %88 : vector<32x64xf32>
    %90 = tpu.concatenate %89, %89, %89 in 0 : vector<32x64xf32>, vector<32x64xf32>, vector<32x64xf32> -> vector<96x64xf32>
    %91 = arith.extf %6 : vector<32x65xbf16> to vector<32x65xf32>
    %92 = tpu.concatenate %91, %91, %91 in 0 : vector<32x65xf32>, vector<32x65xf32>, vector<32x65xf32> -> vector<96x65xf32>
    %93 = arith.subf %84, %92 : vector<96x65xf32>
    %94 = arith.truncf %93 : vector<96x65xf32> to vector<96x65xbf16>
    %c0_29 = arith.constant 0 : index
    %c0_30 = arith.constant 0 : index
    %95 = vector.load %arg5[%c0_29, %c0_30] : memref<65x64xbf16, #tpu.memory_space<vmem>>, vector<65x64xbf16>
    %cst_31 = arith.constant dense<0.000000e+00> : vector<96x64xf32>
    %96 = tpu.matmul %94, %95, %cst_31 {dimension_numbers = #tpu.dot_dimension_numbers<[1], [0], [0], [1], [0, 0, 1, 1], [], []>} : vector<96x65xbf16>, vector<65x64xbf16>, vector<96x64xf32> -> vector<96x64xf32>
    %97 = arith.addf %90, %96 : vector<96x64xf32>
    %cst_32 = arith.constant 0.000000e+00 : f32
    %98 = vector.broadcast %cst_32 : f32 to vector<96x64xf32>
    %99 = arith.maximumf %97, %98 : vector<96x64xf32>
    %100 = arith.truncf %99 : vector<96x64xf32> to vector<96x64xbf16>
    %c0_33 = arith.constant 0 : index
    %c0_34 = arith.constant 0 : index
    %101 = vector.load %arg7[%c0_33, %c0_34] : memref<64x64xbf16, #tpu.memory_space<vmem>>, vector<64x64xbf16>
    %cst_35 = arith.constant dense<0.000000e+00> : vector<96x64xf32>
    %102 = tpu.matmul %100, %101, %cst_35 {dimension_numbers = #tpu.dot_dimension_numbers<[1], [0], [0], [1], [0, 0, 1, 1], [], []>} : vector<96x64xbf16>, vector<64x64xbf16>, vector<96x64xf32> -> vector<96x64xf32>
    %c0_36 = arith.constant 0 : index
    %c0_37 = arith.constant 0 : index
    %103 = vector.load %arg8[%c0_36, %c0_37] : memref<1x64xf32, #tpu.memory_space<vmem>>, vector<1x64xf32>
    %104 = vector.broadcast %103 : vector<1x64xf32> to vector<96x64xf32>
    %105 = arith.addf %102, %104 : vector<96x64xf32>
    %cst_38 = arith.constant 0.000000e+00 : f32
    %106 = vector.broadcast %cst_38 : f32 to vector<96x64xf32>
    %107 = arith.maximumf %105, %106 : vector<96x64xf32>
    %cst_39 = arith.constant 0.000000e+00 : f32
    %108 = vector.broadcast %cst_39 : f32 to vector<32x64xf32>
    %109 = vector.extract_strided_slice %107 {offsets = [0, 0], sizes = [32, 64], strides = [1, 1]} : vector<96x64xf32> to vector<32x64xf32>
    %cst_40 = arith.constant 0.000000e+00 : f32
    %110 = vector.shape_cast %31 : vector<32x1xi1> to vector<32x1xi1>
    %111 = vector.broadcast %110 : vector<32x1xi1> to vector<32x64xi1>
    %112 = vector.broadcast %cst_40 : f32 to vector<32x64xf32>
    %113 = arith.select %111, %109, %112 : vector<32x64xi1>, vector<32x64xf32>
    %114 = arith.maximumf %108, %113 : vector<32x64xf32>
    %115 = vector.extract_strided_slice %107 {offsets = [32, 0], sizes = [32, 64], strides = [1, 1]} : vector<96x64xf32> to vector<32x64xf32>
    %cst_41 = arith.constant 0.000000e+00 : f32
    %116 = vector.shape_cast %50 : vector<32x1xi1> to vector<32x1xi1>
    %117 = vector.broadcast %116 : vector<32x1xi1> to vector<32x64xi1>
    %118 = vector.broadcast %cst_41 : f32 to vector<32x64xf32>
    %119 = arith.select %117, %115, %118 : vector<32x64xi1>, vector<32x64xf32>
    %120 = arith.maximumf %114, %119 : vector<32x64xf32>
    %121 = vector.extract_strided_slice %107 {offsets = [64, 0], sizes = [32, 64], strides = [1, 1]} : vector<96x64xf32> to vector<32x64xf32>
    %cst_42 = arith.constant 0.000000e+00 : f32
    %122 = vector.shape_cast %69 : vector<32x1xi1> to vector<32x1xi1>
    %123 = vector.broadcast %122 : vector<32x1xi1> to vector<32x64xi1>
    %124 = vector.broadcast %cst_42 : f32 to vector<32x64xf32>
    %125 = arith.select %123, %121, %124 : vector<32x64xi1>, vector<32x64xf32>
    %126 = arith.maximumf %120, %125 : vector<32x64xf32>
    %cst_43 = arith.constant 0.999994993 : f32
    %127 = vector.broadcast %cst_43 : f32 to vector<32x64xf32>
    %128 = arith.mulf %126, %127 : vector<32x64xf32>
    %129 = arith.truncf %128 : vector<32x64xf32> to vector<32x64xbf16>
    %c0_44 = arith.constant 0 : index
    %c0_45 = arith.constant 0 : index
    %130 = vector.load %arg9[%c0_44, %c0_45] : memref<32x65xbf16, #tpu.memory_space<vmem>>, vector<32x64xbf16>
    tpu.vector_store %arg9[%c0_44, %c0_45], %129 {strides = array<i32>} : memref<32x65xbf16, #tpu.memory_space<vmem>>, vector<32x64xbf16>,
    %131 = arith.mulf %128, %128 : vector<32x64xf32>
    %cst_46 = arith.constant dense<0.000000e+00> : vector<32xf32>
    %132 = vector.multi_reduction <add>, %131, %cst_46 [1] : vector<32x64xf32> to vector<32xf32>
    %133 = vector.shape_cast %132 : vector<32xf32> to vector<32x1xf32>
    %134 = arith.truncf %133 : vector<32x1xf32> to vector<32x1xbf16>
    %c0_47 = arith.constant 0 : index
    %c64 = arith.constant 64 : index
    %135 = vector.load %arg9[%c0_47, %c64] : memref<32x65xbf16, #tpu.memory_space<vmem>>, vector<32x1xbf16>
    tpu.vector_store %arg9[%c0_47, %c64], %134 {strides = array<i32>} : memref<32x65xbf16, #tpu.memory_space<vmem>>, vector<32x1xbf16>,
    return
  }
  func.func @transform_0(%arg0: i32) -> (i32, i32) {
    %c0_i32 = arith.constant 0 : i32
    %c0_i32_0 = arith.constant 0 : i32
    return %arg0, %c0_i32 : i32, i32
  }
  func.func @transform_1(%arg0: i32) -> (i32, i32) {
    %c0_i32 = arith.constant 0 : i32
    %c0_i32_0 = arith.constant 0 : i32
    %c0_i32_1 = arith.constant 0 : i32
    return %c0_i32, %c0_i32_0 : i32, i32
  }
  func.func @transform_2(%arg0: i32) -> (i32, i32) {
    %c0_i32 = arith.constant 0 : i32
    %c0_i32_0 = arith.constant 0 : i32
    %c0_i32_1 = arith.constant 0 : i32
    return %c0_i32, %c0_i32_0 : i32, i32
  }
  func.func @transform_3(%arg0: i32) -> (i32, i32) {
    %c0_i32 = arith.constant 0 : i32
    %c0_i32_0 = arith.constant 0 : i32
    %c0_i32_1 = arith.constant 0 : i32
    return %c0_i32, %c0_i32_0 : i32, i32
  }
  func.func @transform_4(%arg0: i32) -> (i32, i32) {
    %c0_i32 = arith.constant 0 : i32
    %c0_i32_0 = arith.constant 0 : i32
    %c0_i32_1 = arith.constant 0 : i32
    return %c0_i32, %c0_i32_0 : i32, i32
  }
  func.func @transform_5(%arg0: i32) -> (i32, i32) {
    %c0_i32 = arith.constant 0 : i32
    %c0_i32_0 = arith.constant 0 : i32
    %c0_i32_1 = arith.constant 0 : i32
    return %c0_i32, %c0_i32_0 : i32, i32
  }
  func.func @transform_6(%arg0: i32) -> (i32, i32) {
    %c0_i32 = arith.constant 0 : i32
    %c0_i32_0 = arith.constant 0 : i32
    %c0_i32_1 = arith.constant 0 : i32
    return %c0_i32, %c0_i32_0 : i32, i32
  }
  func.func @transform_7(%arg0: i32) -> (i32, i32) {
    %c0_i32 = arith.constant 0 : i32
    %c0_i32_0 = arith.constant 0 : i32
    %c0_i32_1 = arith.constant 0 : i32
    return %c0_i32, %c0_i32_0 : i32, i32
  }
  func.func @transform_8(%arg0: i32) -> (i32, i32) {
    %c0_i32 = arith.constant 0 : i32
    %c0_i32_0 = arith.constant 0 : i32
    return %arg0, %c0_i32 : i32, i32
  }
}

module attributes {stable_mosaic.version = 11 : i64} {
  func.func @_edge_conv_kernel(%arg0: i32, %arg1: memref<32x1xi32, #tpu.memory_space<vmem>>, %arg2: memref<1x32xi32, #tpu.memory_space<vmem>>, %arg3: memref<32x65xbf16, #tpu.memory_space<vmem>>, %arg4: memref<65x64xbf16, #tpu.memory_space<vmem>>, %arg5: memref<65x64xbf16, #tpu.memory_space<vmem>>, %arg6: memref<1x64xf32, #tpu.memory_space<vmem>>, %arg7: memref<64x64xbf16, #tpu.memory_space<vmem>>, %arg8: memref<1x64xf32, #tpu.memory_space<vmem>>, %arg9: memref<32x65xbf16, #tpu.memory_space<vmem>>) attributes {dimension_semantics = [#tpu.dimension_semantics<parallel>], iteration_bounds = array<i64: 1>, scalar_prefetch = 0 : i64, scratch_operands = 0 : i64, tpu.core_type = #tpu.core_type<tc>, window_params = [{transform_indices = @transform_0, window_bounds = array<i64: 32, 1>}, {pipeline_mode = #tpu.pipeline_mode<synchronous>, transform_indices = @transform_1, window_bounds = array<i64: 1, 32>}, {pipeline_mode = #tpu.pipeline_mode<synchronous>, transform_indices = @transform_2, window_bounds = array<i64: 32, 65>}, {pipeline_mode = #tpu.pipeline_mode<synchronous>, transform_indices = @transform_3, window_bounds = array<i64: 65, 64>}, {pipeline_mode = #tpu.pipeline_mode<synchronous>, transform_indices = @transform_4, window_bounds = array<i64: 65, 64>}, {pipeline_mode = #tpu.pipeline_mode<synchronous>, transform_indices = @transform_5, window_bounds = array<i64: 1, 64>}, {pipeline_mode = #tpu.pipeline_mode<synchronous>, transform_indices = @transform_6, window_bounds = array<i64: 64, 64>}, {pipeline_mode = #tpu.pipeline_mode<synchronous>, transform_indices = @transform_7, window_bounds = array<i64: 1, 64>}, {transform_indices = @transform_8, window_bounds = array<i64: 32, 65>}]} {
    %c0 = arith.constant 0 : index
    %c0_0 = arith.constant 0 : index
    %0 = vector.load %arg3[%c0, %c0_0] : memref<32x65xbf16, #tpu.memory_space<vmem>>, vector<32x65xbf16>
    %c0_1 = arith.constant 0 : index
    %c0_2 = arith.constant 0 : index
    %1 = vector.load %arg1[%c0_1, %c0_2] : memref<32x1xi32, #tpu.memory_space<vmem>>, vector<32x1xi32>
    %c0_3 = arith.constant 0 : index
    %c0_4 = arith.constant 0 : index
    %2 = vector.load %arg2[%c0_3, %c0_4] : memref<1x32xi32, #tpu.memory_space<vmem>>, vector<1x32xi32>
    %c32_i32 = arith.constant 32 : i32
    %3 = arith.muli %arg0, %c32_i32 : i32
    %4 = tpu.assume_multiple %3, 32 : i32
    %5 = arith.index_cast %4 : i32 to index
    %c0_5 = arith.constant 0 : index
    %6 = vector.load %arg3[%5, %c0_5] : memref<32x65xbf16, #tpu.memory_space<vmem>>, vector<32x65xbf16>
    %7 = tpu.iota {dimensions = array<i32: 1>} : vector<32x65xi32>
    %c64_i32 = arith.constant 64 : i32
    %8 = vector.broadcast %c64_i32 : i32 to vector<32x65xi32>
    %9 = arith.cmpi eq, %7, %8 : vector<32x65xi32>
    %10 = arith.extf %6 : vector<32x65xbf16> to vector<32x65xf32>
    %cst = arith.constant -2.000000e+00 : f32
    %11 = vector.broadcast %cst : f32 to vector<32x65xf32>
    %12 = arith.mulf %10, %11 : vector<32x65xf32>
    %cst_6 = arith.constant 1.000000e+00 : f32
    %13 = vector.broadcast %cst_6 : f32 to vector<32x65xf32>
    %14 = arith.select %9, %13, %12 : vector<32x65xi1>, vector<32x65xf32>
    %15 = arith.truncf %14 : vector<32x65xf32> to vector<32x65xbf16>
    %cst_7 = arith.constant dense<0.000000e+00> : vector<32x32xf32>
    %16 = tpu.matmul %15, %0, %cst_7 {dimension_numbers = #tpu.dot_dimension_numbers<[1], [1], [0], [0], [0, 0, 1, 0], [], []>} : vector<32x65xbf16>, vector<32x65xbf16>, vector<32x32xf32> -> vector<32x32xf32>
    %17 = tpu.iota {dimensions = array<i32: 0>} : vector<32x32xi32>
    %18 = vector.broadcast %4 : i32 to vector<32x32xi32>
    %19 = arith.addi %17, %18 : vector<32x32xi32>
    %20 = tpu.iota {dimensions = array<i32: 1>} : vector<32x32xi32>
    %21 = vector.broadcast %1 : vector<32x1xi32> to vector<32x32xi32>
    %22 = vector.broadcast %2 : vector<1x32xi32> to vector<32x32xi32>
    %23 = arith.cmpi eq, %21, %22 : vector<32x32xi32>
    %24 = arith.cmpi ne, %19, %20 : vector<32x32xi32>
    %25 = arith.andi %23, %24 : vector<32x32xi1>
    %cst_8 = arith.constant 1.000000e+30 : f32
    %26 = vector.broadcast %cst_8 : f32 to vector<32x32xf32>
    %27 = arith.select %25, %16, %26 : vector<32x32xi1>, vector<32x32xf32>
    %cst_9 = arith.constant dense<0x7F800000> : vector<32xf32>
    %28 = vector.multi_reduction <minimumf>, %27, %cst_9 [1] : vector<32x32xf32> to vector<32xf32>
    %29 = vector.shape_cast %28 : vector<32xf32> to vector<32x1xf32>
    %cst_10 = arith.constant 1.000000e+30 : f32
    %30 = vector.broadcast %cst_10 : f32 to vector<32x1xf32>
    %31 = arith.cmpf olt, %29, %30 : vector<32x1xf32>
    %32 = vector.broadcast %29 : vector<32x1xf32> to vector<32x32xf32>
    %33 = arith.cmpf ole, %27, %32 : vector<32x32xf32>
    %c32_i32_11 = arith.constant 32 : i32
    %34 = vector.broadcast %c32_i32_11 : i32 to vector<32x32xi32>
    %35 = arith.select %33, %20, %34 : vector<32x32xi1>, vector<32x32xi32>
    %cst_12 = arith.constant dense<2147483647> : vector<32xi32>
    %36 = vector.multi_reduction <minsi>, %35, %cst_12 [1] : vector<32x32xi32> to vector<32xi32>
    %37 = vector.shape_cast %36 : vector<32xi32> to vector<32x1xi32>
    %38 = vector.broadcast %37 : vector<32x1xi32> to vector<32x32xi32>
    %39 = arith.cmpi eq, %20, %38 : vector<32x32xi32>
    %40 = vector.broadcast %31 : vector<32x1xi1> to vector<32x32xi1>
    %41 = arith.andi %39, %40 : vector<32x32xi1>
    %42 = arith.extui %41 : vector<32x32xi1> to vector<32x32xi32>
    %43 = arith.sitofp %42 : vector<32x32xi32> to vector<32x32xf32>
    %44 = arith.truncf %43 : vector<32x32xf32> to vector<32x32xbf16>
    %cst_13 = arith.constant 1.000000e+30 : f32
    %45 = vector.broadcast %cst_13 : f32 to vector<32x32xf32>
    %46 = arith.select %41, %45, %27 : vector<32x32xi1>, vector<32x32xf32>
    %cst_14 = arith.constant dense<0x7F800000> : vector<32xf32>
    %47 = vector.multi_reduction <minimumf>, %46, %cst_14 [1] : vector<32x32xf32> to vector<32xf32>
    %48 = vector.shape_cast %47 : vector<32xf32> to vector<32x1xf32>
    %cst_15 = arith.constant 1.000000e+30 : f32
    %49 = vector.broadcast %cst_15 : f32 to vector<32x1xf32>
    %50 = arith.cmpf olt, %48, %49 : vector<32x1xf32>
    %51 = vector.broadcast %48 : vector<32x1xf32> to vector<32x32xf32>
    %52 = arith.cmpf ole, %46, %51 : vector<32x32xf32>
    %c32_i32_16 = arith.constant 32 : i32
    %53 = vector.broadcast %c32_i32_16 : i32 to vector<32x32xi32>
    %54 = arith.select %52, %20, %53 : vector<32x32xi1>, vector<32x32xi32>
    %cst_17 = arith.constant dense<2147483647> : vector<32xi32>
    %55 = vector.multi_reduction <minsi>, %54, %cst_17 [1] : vector<32x32xi32> to vector<32xi32>
    %56 = vector.shape_cast %55 : vector<32xi32> to vector<32x1xi32>
    %57 = vector.broadcast %56 : vector<32x1xi32> to vector<32x32xi32>
    %58 = arith.cmpi eq, %20, %57 : vector<32x32xi32>
    %59 = vector.broadcast %50 : vector<32x1xi1> to vector<32x32xi1>
    %60 = arith.andi %58, %59 : vector<32x32xi1>
    %61 = arith.extui %60 : vector<32x32xi1> to vector<32x32xi32>
    %62 = arith.sitofp %61 : vector<32x32xi32> to vector<32x32xf32>
    %63 = arith.truncf %62 : vector<32x32xf32> to vector<32x32xbf16>
    %cst_18 = arith.constant 1.000000e+30 : f32
    %64 = vector.broadcast %cst_18 : f32 to vector<32x32xf32>
    %65 = arith.select %60, %64, %46 : vector<32x32xi1>, vector<32x32xf32>
    %cst_19 = arith.constant dense<0x7F800000> : vector<32xf32>
    %66 = vector.multi_reduction <minimumf>, %65, %cst_19 [1] : vector<32x32xf32> to vector<32xf32>
    %67 = vector.shape_cast %66 : vector<32xf32> to vector<32x1xf32>
    %cst_20 = arith.constant 1.000000e+30 : f32
    %68 = vector.broadcast %cst_20 : f32 to vector<32x1xf32>
    %69 = arith.cmpf olt, %67, %68 : vector<32x1xf32>
    %70 = vector.broadcast %67 : vector<32x1xf32> to vector<32x32xf32>
    %71 = arith.cmpf ole, %65, %70 : vector<32x32xf32>
    %c32_i32_21 = arith.constant 32 : i32
    %72 = vector.broadcast %c32_i32_21 : i32 to vector<32x32xi32>
    %73 = arith.select %71, %20, %72 : vector<32x32xi1>, vector<32x32xi32>
    %cst_22 = arith.constant dense<2147483647> : vector<32xi32>
    %74 = vector.multi_reduction <minsi>, %73, %cst_22 [1] : vector<32x32xi32> to vector<32xi32>
    %75 = vector.shape_cast %74 : vector<32xi32> to vector<32x1xi32>
    %76 = vector.broadcast %75 : vector<32x1xi32> to vector<32x32xi32>
    %77 = arith.cmpi eq, %20, %76 : vector<32x32xi32>
    %78 = vector.broadcast %69 : vector<32x1xi1> to vector<32x32xi1>
    %79 = arith.andi %77, %78 : vector<32x32xi1>
    %80 = arith.extui %79 : vector<32x32xi1> to vector<32x32xi32>
    %81 = arith.sitofp %80 : vector<32x32xi32> to vector<32x32xf32>
    %82 = arith.truncf %81 : vector<32x32xf32> to vector<32x32xbf16>
    %83 = tpu.concatenate %44, %63, %82 in 0 : vector<32x32xbf16>, vector<32x32xbf16>, vector<32x32xbf16> -> vector<96x32xbf16>
    %cst_23 = arith.constant dense<0.000000e+00> : vector<96x65xf32>
    %84 = tpu.matmul %83, %0, %cst_23 {dimension_numbers = #tpu.dot_dimension_numbers<[1], [0], [0], [1], [0, 0, 1, 1], [], []>} : vector<96x32xbf16>, vector<32x65xbf16>, vector<96x65xf32> -> vector<96x65xf32>
    %c0_24 = arith.constant 0 : index
    %c0_25 = arith.constant 0 : index
    %85 = vector.load %arg4[%c0_24, %c0_25] : memref<65x64xbf16, #tpu.memory_space<vmem>>, vector<65x64xbf16>
    %cst_26 = arith.constant dense<0.000000e+00> : vector<32x64xf32>
    %86 = tpu.matmul %6, %85, %cst_26 {dimension_numbers = #tpu.dot_dimension_numbers<[1], [0], [0], [1], [0, 0, 1, 1], [], []>} : vector<32x65xbf16>, vector<65x64xbf16>, vector<32x64xf32> -> vector<32x64xf32>
    %c0_27 = arith.constant 0 : index
    %c0_28 = arith.constant 0 : index
    %87 = vector.load %arg6[%c0_27, %c0_28] : memref<1x64xf32, #tpu.memory_space<vmem>>, vector<1x64xf32>
    %88 = vector.broadcast %87 : vector<1x64xf32> to vector<32x64xf32>
    %89 = arith.addf %86, %88 : vector<32x64xf32>
    %90 = tpu.concatenate %89, %89, %89 in 0 : vector<32x64xf32>, vector<32x64xf32>, vector<32x64xf32> -> vector<96x64xf32>
    %91 = arith.extf %6 : vector<32x65xbf16> to vector<32x65xf32>
    %92 = tpu.concatenate %91, %91, %91 in 0 : vector<32x65xf32>, vector<32x65xf32>, vector<32x65xf32> -> vector<96x65xf32>
    %93 = arith.subf %84, %92 : vector<96x65xf32>
    %94 = arith.truncf %93 : vector<96x65xf32> to vector<96x65xbf16>
    %c0_29 = arith.constant 0 : index
    %c0_30 = arith.constant 0 : index
    %95 = vector.load %arg5[%c0_29, %c0_30] : memref<65x64xbf16, #tpu.memory_space<vmem>>, vector<65x64xbf16>
    %cst_31 = arith.constant dense<0.000000e+00> : vector<96x64xf32>
    %96 = tpu.matmul %94, %95, %cst_31 {dimension_numbers = #tpu.dot_dimension_numbers<[1], [0], [0], [1], [0, 0, 1, 1], [], []>} : vector<96x65xbf16>, vector<65x64xbf16>, vector<96x64xf32> -> vector<96x64xf32>
    %97 = arith.addf %90, %96 : vector<96x64xf32>
    %cst_32 = arith.constant 0.000000e+00 : f32
    %98 = vector.broadcast %cst_32 : f32 to vector<96x64xf32>
    %99 = arith.maximumf %97, %98 : vector<96x64xf32>
    %100 = arith.truncf %99 : vector<96x64xf32> to vector<96x64xbf16>
    %c0_33 = arith.constant 0 : index
    %c0_34 = arith.constant 0 : index
    %101 = vector.load %arg7[%c0_33, %c0_34] : memref<64x64xbf16, #tpu.memory_space<vmem>>, vector<64x64xbf16>
    %cst_35 = arith.constant dense<0.000000e+00> : vector<96x64xf32>
    %102 = tpu.matmul %100, %101, %cst_35 {dimension_numbers = #tpu.dot_dimension_numbers<[1], [0], [0], [1], [0, 0, 1, 1], [], []>} : vector<96x64xbf16>, vector<64x64xbf16>, vector<96x64xf32> -> vector<96x64xf32>
    %c0_36 = arith.constant 0 : index
    %c0_37 = arith.constant 0 : index
    %103 = vector.load %arg8[%c0_36, %c0_37] : memref<1x64xf32, #tpu.memory_space<vmem>>, vector<1x64xf32>
    %104 = vector.broadcast %103 : vector<1x64xf32> to vector<96x64xf32>
    %105 = arith.addf %102, %104 : vector<96x64xf32>
    %cst_38 = arith.constant 0.000000e+00 : f32
    %106 = vector.broadcast %cst_38 : f32 to vector<96x64xf32>
    %107 = arith.maximumf %105, %106 : vector<96x64xf32>
    %cst_39 = arith.constant 0.000000e+00 : f32
    %108 = vector.broadcast %cst_39 : f32 to vector<32x64xf32>
    %109 = vector.extract_strided_slice %107 {offsets = [0, 0], sizes = [32, 64], strides = [1, 1]} : vector<96x64xf32> to vector<32x64xf32>
    %cst_40 = arith.constant 0.000000e+00 : f32
    %110 = vector.shape_cast %31 : vector<32x1xi1> to vector<32x1xi1>
    %111 = vector.broadcast %110 : vector<32x1xi1> to vector<32x64xi1>
    %112 = vector.broadcast %cst_40 : f32 to vector<32x64xf32>
    %113 = arith.select %111, %109, %112 : vector<32x64xi1>, vector<32x64xf32>
    %114 = arith.maximumf %108, %113 : vector<32x64xf32>
    %115 = vector.extract_strided_slice %107 {offsets = [32, 0], sizes = [32, 64], strides = [1, 1]} : vector<96x64xf32> to vector<32x64xf32>
    %cst_41 = arith.constant 0.000000e+00 : f32
    %116 = vector.shape_cast %50 : vector<32x1xi1> to vector<32x1xi1>
    %117 = vector.broadcast %116 : vector<32x1xi1> to vector<32x64xi1>
    %118 = vector.broadcast %cst_41 : f32 to vector<32x64xf32>
    %119 = arith.select %117, %115, %118 : vector<32x64xi1>, vector<32x64xf32>
    %120 = arith.maximumf %114, %119 : vector<32x64xf32>
    %121 = vector.extract_strided_slice %107 {offsets = [64, 0], sizes = [32, 64], strides = [1, 1]} : vector<96x64xf32> to vector<32x64xf32>
    %cst_42 = arith.constant 0.000000e+00 : f32
    %122 = vector.shape_cast %69 : vector<32x1xi1> to vector<32x1xi1>
    %123 = vector.broadcast %122 : vector<32x1xi1> to vector<32x64xi1>
    %124 = vector.broadcast %cst_42 : f32 to vector<32x64xf32>
    %125 = arith.select %123, %121, %124 : vector<32x64xi1>, vector<32x64xf32>
    %126 = arith.maximumf %120, %125 : vector<32x64xf32>
    %cst_43 = arith.constant 0.999994993 : f32
    %127 = vector.broadcast %cst_43 : f32 to vector<32x64xf32>
    %128 = arith.mulf %126, %127 : vector<32x64xf32>
    %129 = arith.truncf %128 : vector<32x64xf32> to vector<32x64xbf16>
    %c0_44 = arith.constant 0 : index
    %c0_45 = arith.constant 0 : index
    %130 = vector.load %arg9[%c0_44, %c0_45] : memref<32x65xbf16, #tpu.memory_space<vmem>>, vector<32x64xbf16>
    tpu.vector_store %arg9[%c0_44, %c0_45], %129 {strides = array<i32>} : memref<32x65xbf16, #tpu.memory_space<vmem>>, vector<32x64xbf16>,
    %131 = arith.mulf %128, %128 : vector<32x64xf32>
    %cst_46 = arith.constant dense<0.000000e+00> : vector<32xf32>
    %132 = vector.multi_reduction <add>, %131, %cst_46 [1] : vector<32x64xf32> to vector<32xf32>
    %133 = vector.shape_cast %132 : vector<32xf32> to vector<32x1xf32>
    %134 = arith.truncf %133 : vector<32x1xf32> to vector<32x1xbf16>
    %c0_47 = arith.constant 0 : index
    %c64 = arith.constant 64 : index
    %135 = vector.load %arg9[%c0_47, %c64] : memref<32x65xbf16, #tpu.memory_space<vmem>>, vector<32x1xbf16>
    tpu.vector_store %arg9[%c0_47, %c64], %134 {strides = array<i32>} : memref<32x65xbf16, #tpu.memory_space<vmem>>, vector<32x1xbf16>,
    return
  }
  func.func @transform_0(%arg0: i32) -> (i32, i32) {
    %c0_i32 = arith.constant 0 : i32
    %c0_i32_0 = arith.constant 0 : i32
    return %arg0, %c0_i32 : i32, i32
  }
  func.func @transform_1(%arg0: i32) -> (i32, i32) {
    %c0_i32 = arith.constant 0 : i32
    %c0_i32_0 = arith.constant 0 : i32
    %c0_i32_1 = arith.constant 0 : i32
    return %c0_i32, %c0_i32_0 : i32, i32
  }
  func.func @transform_2(%arg0: i32) -> (i32, i32) {
    %c0_i32 = arith.constant 0 : i32
    %c0_i32_0 = arith.constant 0 : i32
    %c0_i32_1 = arith.constant 0 : i32
    return %c0_i32, %c0_i32_0 : i32, i32
  }
  func.func @transform_3(%arg0: i32) -> (i32, i32) {
    %c0_i32 = arith.constant 0 : i32
    %c0_i32_0 = arith.constant 0 : i32
    %c0_i32_1 = arith.constant 0 : i32
    return %c0_i32, %c0_i32_0 : i32, i32
  }
  func.func @transform_4(%arg0: i32) -> (i32, i32) {
    %c0_i32 = arith.constant 0 : i32
    %c0_i32_0 = arith.constant 0 : i32
    %c0_i32_1 = arith.constant 0 : i32
    return %c0_i32, %c0_i32_0 : i32, i32
  }
  func.func @transform_5(%arg0: i32) -> (i32, i32) {
    %c0_i32 = arith.constant 0 : i32
    %c0_i32_0 = arith.constant 0 : i32
    %c0_i32_1 = arith.constant 0 : i32
    return %c0_i32, %c0_i32_0 : i32, i32
  }
  func.func @transform_6(%arg0: i32) -> (i32, i32) {
    %c0_i32 = arith.constant 0 : i32
    %c0_i32_0 = arith.constant 0 : i32
    %c0_i32_1 = arith.constant 0 : i32
    return %c0_i32, %c0_i32_0 : i32, i32
  }
  func.func @transform_7(%arg0: i32) -> (i32, i32) {
    %c0_i32 = arith.constant 0 : i32
    %c0_i32_0 = arith.constant 0 : i32
    %c0_i32_1 = arith.constant 0 : i32
    return %c0_i32, %c0_i32_0 : i32, i32
  }
  func.func @transform_8(%arg0: i32) -> (i32, i32) {
    %c0_i32 = arith.constant 0 : i32
    %c0_i32_0 = arith.constant 0 : i32
    return %arg0, %c0_i32 : i32, i32
  }
}

module attributes {stable_mosaic.version = 11 : i64} {
  func.func @_head_kernel(%arg0: i32, %arg1: memref<32x65xbf16, #tpu.memory_space<vmem>>, %arg2: memref<32x65xbf16, #tpu.memory_space<vmem>>, %arg3: memref<32x65xbf16, #tpu.memory_space<vmem>>, %arg4: memref<65x1024xbf16, #tpu.memory_space<vmem>>, %arg5: memref<65x1024xbf16, #tpu.memory_space<vmem>>, %arg6: memref<65x1024xbf16, #tpu.memory_space<vmem>>, %arg7: memref<1x1024xf32, #tpu.memory_space<vmem>>, %arg8: memref<1024x256xbf16, #tpu.memory_space<vmem>>, %arg9: memref<1x256xf32, #tpu.memory_space<vmem>>, %arg10: memref<256x128xbf16, #tpu.memory_space<vmem>>, %arg11: memref<1x128xf32, #tpu.memory_space<vmem>>, %arg12: memref<128x8xbf16, #tpu.memory_space<vmem>>, %arg13: memref<1x8xf32, #tpu.memory_space<vmem>>, %arg14: memref<32x8xf32, #tpu.memory_space<vmem>>) attributes {dimension_semantics = [#tpu.dimension_semantics<parallel>], iteration_bounds = array<i64: 1>, scalar_prefetch = 0 : i64, scratch_operands = 0 : i64, tpu.core_type = #tpu.core_type<tc>, window_params = [{transform_indices = @transform_0, window_bounds = array<i64: 32, 65>}, {transform_indices = @transform_1, window_bounds = array<i64: 32, 65>}, {transform_indices = @transform_2, window_bounds = array<i64: 32, 65>}, {pipeline_mode = #tpu.pipeline_mode<synchronous>, transform_indices = @transform_3, window_bounds = array<i64: 65, 1024>}, {pipeline_mode = #tpu.pipeline_mode<synchronous>, transform_indices = @transform_4, window_bounds = array<i64: 65, 1024>}, {pipeline_mode = #tpu.pipeline_mode<synchronous>, transform_indices = @transform_5, window_bounds = array<i64: 65, 1024>}, {pipeline_mode = #tpu.pipeline_mode<synchronous>, transform_indices = @transform_6, window_bounds = array<i64: 1, 1024>}, {pipeline_mode = #tpu.pipeline_mode<synchronous>, transform_indices = @transform_7, window_bounds = array<i64: 1024, 256>}, {pipeline_mode = #tpu.pipeline_mode<synchronous>, transform_indices = @transform_8, window_bounds = array<i64: 1, 256>}, {pipeline_mode = #tpu.pipeline_mode<synchronous>, transform_indices = @transform_9, window_bounds = array<i64: 256, 128>}, {pipeline_mode = #tpu.pipeline_mode<synchronous>, transform_indices = @transform_10, window_bounds = array<i64: 1, 128>}, {pipeline_mode = #tpu.pipeline_mode<synchronous>, transform_indices = @transform_11, window_bounds = array<i64: 128, 8>}, {pipeline_mode = #tpu.pipeline_mode<synchronous>, transform_indices = @transform_12, window_bounds = array<i64: 1, 8>}, {transform_indices = @transform_13, window_bounds = array<i64: 32, 8>}]} {
    %c0 = arith.constant 0 : index
    %c0_0 = arith.constant 0 : index
    %0 = vector.load %arg1[%c0, %c0_0] : memref<32x65xbf16, #tpu.memory_space<vmem>>, vector<32x65xbf16>
    %c0_1 = arith.constant 0 : index
    %c0_2 = arith.constant 0 : index
    %1 = vector.load %arg4[%c0_1, %c0_2] : memref<65x1024xbf16, #tpu.memory_space<vmem>>, vector<65x1024xbf16>
    %cst = arith.constant dense<0.000000e+00> : vector<32x1024xf32>
    %2 = tpu.matmul %0, %1, %cst {dimension_numbers = #tpu.dot_dimension_numbers<[1], [0], [0], [1], [0, 0, 1, 1], [], []>} : vector<32x65xbf16>, vector<65x1024xbf16>, vector<32x1024xf32> -> vector<32x1024xf32>
    %c0_3 = arith.constant 0 : index
    %c0_4 = arith.constant 0 : index
    %3 = vector.load %arg2[%c0_3, %c0_4] : memref<32x65xbf16, #tpu.memory_space<vmem>>, vector<32x65xbf16>
    %c0_5 = arith.constant 0 : index
    %c0_6 = arith.constant 0 : index
    %4 = vector.load %arg5[%c0_5, %c0_6] : memref<65x1024xbf16, #tpu.memory_space<vmem>>, vector<65x1024xbf16>
    %cst_7 = arith.constant dense<0.000000e+00> : vector<32x1024xf32>
    %5 = tpu.matmul %3, %4, %cst_7 {dimension_numbers = #tpu.dot_dimension_numbers<[1], [0], [0], [1], [0, 0, 1, 1], [], []>} : vector<32x65xbf16>, vector<65x1024xbf16>, vector<32x1024xf32> -> vector<32x1024xf32>
    %6 = arith.addf %2, %5 : vector<32x1024xf32>
    %c0_8 = arith.constant 0 : index
    %c0_9 = arith.constant 0 : index
    %7 = vector.load %arg3[%c0_8, %c0_9] : memref<32x65xbf16, #tpu.memory_space<vmem>>, vector<32x65xbf16>
    %c0_10 = arith.constant 0 : index
    %c0_11 = arith.constant 0 : index
    %8 = vector.load %arg6[%c0_10, %c0_11] : memref<65x1024xbf16, #tpu.memory_space<vmem>>, vector<65x1024xbf16>
    %cst_12 = arith.constant dense<0.000000e+00> : vector<32x1024xf32>
    %9 = tpu.matmul %7, %8, %cst_12 {dimension_numbers = #tpu.dot_dimension_numbers<[1], [0], [0], [1], [0, 0, 1, 1], [], []>} : vector<32x65xbf16>, vector<65x1024xbf16>, vector<32x1024xf32> -> vector<32x1024xf32>
    %10 = arith.addf %6, %9 : vector<32x1024xf32>
    %c0_13 = arith.constant 0 : index
    %c0_14 = arith.constant 0 : index
    %11 = vector.load %arg7[%c0_13, %c0_14] : memref<1x1024xf32, #tpu.memory_space<vmem>>, vector<1x1024xf32>
    %12 = vector.broadcast %11 : vector<1x1024xf32> to vector<32x1024xf32>
    %13 = arith.addf %10, %12 : vector<32x1024xf32>
    %cst_15 = arith.constant 0.000000e+00 : f32
    %14 = vector.broadcast %cst_15 : f32 to vector<32x1024xf32>
    %15 = arith.maximumf %13, %14 : vector<32x1024xf32>
    %16 = arith.truncf %15 : vector<32x1024xf32> to vector<32x1024xbf16>
    %c0_16 = arith.constant 0 : index
    %c0_17 = arith.constant 0 : index
    %17 = vector.load %arg8[%c0_16, %c0_17] : memref<1024x256xbf16, #tpu.memory_space<vmem>>, vector<1024x256xbf16>
    %cst_18 = arith.constant dense<0.000000e+00> : vector<32x256xf32>
    %18 = tpu.matmul %16, %17, %cst_18 {dimension_numbers = #tpu.dot_dimension_numbers<[1], [0], [0], [1], [0, 0, 1, 1], [], []>} : vector<32x1024xbf16>, vector<1024x256xbf16>, vector<32x256xf32> -> vector<32x256xf32>
    %c0_19 = arith.constant 0 : index
    %c0_20 = arith.constant 0 : index
    %19 = vector.load %arg9[%c0_19, %c0_20] : memref<1x256xf32, #tpu.memory_space<vmem>>, vector<1x256xf32>
    %20 = vector.broadcast %19 : vector<1x256xf32> to vector<32x256xf32>
    %21 = arith.addf %18, %20 : vector<32x256xf32>
    %cst_21 = arith.constant 0.000000e+00 : f32
    %22 = vector.broadcast %cst_21 : f32 to vector<32x256xf32>
    %23 = arith.maximumf %21, %22 : vector<32x256xf32>
    %24 = arith.truncf %23 : vector<32x256xf32> to vector<32x256xbf16>
    %c0_22 = arith.constant 0 : index
    %c0_23 = arith.constant 0 : index
    %25 = vector.load %arg10[%c0_22, %c0_23] : memref<256x128xbf16, #tpu.memory_space<vmem>>, vector<256x128xbf16>
    %cst_24 = arith.constant dense<0.000000e+00> : vector<32x128xf32>
    %26 = tpu.matmul %24, %25, %cst_24 {dimension_numbers = #tpu.dot_dimension_numbers<[1], [0], [0], [1], [0, 0, 1, 1], [], []>} : vector<32x256xbf16>, vector<256x128xbf16>, vector<32x128xf32> -> vector<32x128xf32>
    %c0_25 = arith.constant 0 : index
    %c0_26 = arith.constant 0 : index
    %27 = vector.load %arg11[%c0_25, %c0_26] : memref<1x128xf32, #tpu.memory_space<vmem>>, vector<1x128xf32>
    %28 = vector.broadcast %27 : vector<1x128xf32> to vector<32x128xf32>
    %29 = arith.addf %26, %28 : vector<32x128xf32>
    %cst_27 = arith.constant 0.000000e+00 : f32
    %30 = vector.broadcast %cst_27 : f32 to vector<32x128xf32>
    %31 = arith.maximumf %29, %30 : vector<32x128xf32>
    %32 = arith.truncf %31 : vector<32x128xf32> to vector<32x128xbf16>
    %c0_28 = arith.constant 0 : index
    %c0_29 = arith.constant 0 : index
    %33 = vector.load %arg12[%c0_28, %c0_29] : memref<128x8xbf16, #tpu.memory_space<vmem>>, vector<128x8xbf16>
    %cst_30 = arith.constant dense<0.000000e+00> : vector<32x8xf32>
    %34 = tpu.matmul %32, %33, %cst_30 {dimension_numbers = #tpu.dot_dimension_numbers<[1], [0], [0], [1], [0, 0, 1, 1], [], []>} : vector<32x128xbf16>, vector<128x8xbf16>, vector<32x8xf32> -> vector<32x8xf32>
    %c0_31 = arith.constant 0 : index
    %c0_32 = arith.constant 0 : index
    %35 = vector.load %arg13[%c0_31, %c0_32] : memref<1x8xf32, #tpu.memory_space<vmem>>, vector<1x8xf32>
    %36 = vector.broadcast %35 : vector<1x8xf32> to vector<32x8xf32>
    %37 = arith.addf %34, %36 : vector<32x8xf32>
    %cst_33 = arith.constant dense<0xFF800000> : vector<32xf32>
    %38 = vector.multi_reduction <maximumf>, %37, %cst_33 [1] : vector<32x8xf32> to vector<32xf32>
    %39 = vector.shape_cast %38 : vector<32xf32> to vector<32x1xf32>
    %40 = vector.broadcast %39 : vector<32x1xf32> to vector<32x8xf32>
    %41 = arith.subf %37, %40 : vector<32x8xf32>
    %42 = math.exp %41 : vector<32x8xf32>
    %cst_34 = arith.constant dense<0.000000e+00> : vector<32xf32>
    %43 = vector.multi_reduction <add>, %42, %cst_34 [1] : vector<32x8xf32> to vector<32xf32>
    %44 = vector.shape_cast %43 : vector<32xf32> to vector<32x1xf32>
    %45 = math.log %44 : vector<32x1xf32>
    %46 = arith.addf %39, %45 : vector<32x1xf32>
    %47 = vector.broadcast %46 : vector<32x1xf32> to vector<32x8xf32>
    %48 = arith.subf %37, %47 : vector<32x8xf32>
    %c0_35 = arith.constant 0 : index
    %c0_36 = arith.constant 0 : index
    %49 = vector.load %arg14[%c0_35, %c0_36] : memref<32x8xf32, #tpu.memory_space<vmem>>, vector<32x8xf32>
    tpu.vector_store %arg14[%c0_35, %c0_36], %48 {strides = array<i32>} : memref<32x8xf32, #tpu.memory_space<vmem>>, vector<32x8xf32>,
    return
  }
  func.func @transform_0(%arg0: i32) -> (i32, i32) {
    %c0_i32 = arith.constant 0 : i32
    %c0_i32_0 = arith.constant 0 : i32
    return %arg0, %c0_i32 : i32, i32
  }
  func.func @transform_1(%arg0: i32) -> (i32, i32) {
    %c0_i32 = arith.constant 0 : i32
    %c0_i32_0 = arith.constant 0 : i32
    return %arg0, %c0_i32 : i32, i32
  }
  func.func @transform_2(%arg0: i32) -> (i32, i32) {
    %c0_i32 = arith.constant 0 : i32
    %c0_i32_0 = arith.constant 0 : i32
    return %arg0, %c0_i32 : i32, i32
  }
  func.func @transform_3(%arg0: i32) -> (i32, i32) {
    %c0_i32 = arith.constant 0 : i32
    %c0_i32_0 = arith.constant 0 : i32
    %c0_i32_1 = arith.constant 0 : i32
    return %c0_i32, %c0_i32_0 : i32, i32
  }
  func.func @transform_4(%arg0: i32) -> (i32, i32) {
    %c0_i32 = arith.constant 0 : i32
    %c0_i32_0 = arith.constant 0 : i32
    %c0_i32_1 = arith.constant 0 : i32
    return %c0_i32, %c0_i32_0 : i32, i32
  }
  func.func @transform_5(%arg0: i32) -> (i32, i32) {
    %c0_i32 = arith.constant 0 : i32
    %c0_i32_0 = arith.constant 0 : i32
    %c0_i32_1 = arith.constant 0 : i32
    return %c0_i32, %c0_i32_0 : i32, i32
  }
  func.func @transform_6(%arg0: i32) -> (i32, i32) {
    %c0_i32 = arith.constant 0 : i32
    %c0_i32_0 = arith.constant 0 : i32
    %c0_i32_1 = arith.constant 0 : i32
    return %c0_i32, %c0_i32_0 : i32, i32
  }
  func.func @transform_7(%arg0: i32) -> (i32, i32) {
    %c0_i32 = arith.constant 0 : i32
    %c0_i32_0 = arith.constant 0 : i32
    %c0_i32_1 = arith.constant 0 : i32
    return %c0_i32, %c0_i32_0 : i32, i32
  }
  func.func @transform_8(%arg0: i32) -> (i32, i32) {
    %c0_i32 = arith.constant 0 : i32
    %c0_i32_0 = arith.constant 0 : i32
    %c0_i32_1 = arith.constant 0 : i32
    return %c0_i32, %c0_i32_0 : i32, i32
  }
  func.func @transform_9(%arg0: i32) -> (i32, i32) {
    %c0_i32 = arith.constant 0 : i32
    %c0_i32_0 = arith.constant 0 : i32
    %c0_i32_1 = arith.constant 0 : i32
    return %c0_i32, %c0_i32_0 : i32, i32
  }
  func.func @transform_10(%arg0: i32) -> (i32, i32) {
    %c0_i32 = arith.constant 0 : i32
    %c0_i32_0 = arith.constant 0 : i32
    %c0_i32_1 = arith.constant 0 : i32
    return %c0_i32, %c0_i32_0 : i32, i32
  }
  func.func @transform_11(%arg0: i32) -> (i32, i32) {
    %c0_i32 = arith.constant 0 : i32
    %c0_i32_0 = arith.constant 0 : i32
    %c0_i32_1 = arith.constant 0 : i32
    return %c0_i32, %c0_i32_0 : i32, i32
  }
  func.func @transform_12(%arg0: i32) -> (i32, i32) {
    %c0_i32 = arith.constant 0 : i32
    %c0_i32_0 = arith.constant 0 : i32
    %c0_i32_1 = arith.constant 0 : i32
    return %c0_i32, %c0_i32_0 : i32, i32
  }
  func.func @transform_13(%arg0: i32) -> (i32, i32) {
    %c0_i32 = arith.constant 0 : i32
    %c0_i32_0 = arith.constant 0 : i32
    return %arg0, %c0_i32 : i32, i32
  }
}

</mosaic_0001>

<bundles_post_ra>
// kernel: net_forward.5
= control target key start
LH: loop header
LB: loop body
LE: loop exit
PB: predicated region body
PF: predicated region fallthrough
CT: control target
= control target key end

     0   :  { %13 = vsyncpa [#allocation3], 0  ;;  %s1987_s0 = inlined_call_operand.vmem [shape: s32[32,1], index: 0, kind: input, shape index: {}]   ;;  %s1988_s1 = inlined_call_operand.hbm [shape: s32[1,32], index: 1, kind: input, shape index: {}]   ;;  %s1989_s2 = inlined_call_operand.vmem [shape: bf16[32,65], index: 2, kind: input, shape index: {}]   ;;  %s1990_s3 = inlined_call_operand.vmem [shape: bf16[65,64], index: 3, kind: input, shape index: {}]   ;;  %s1991_s4 = inlined_call_operand.vmem [shape: bf16[65,64], index: 4, kind: input, shape index: {}]   ;;  %s1992_s5 = inlined_call_operand.hbm [shape: f32[1,64], index: 5, kind: input, shape index: {}]   ;;  %s1993_s6 = inlined_call_operand.vmem [shape: bf16[64,64], index: 6, kind: input, shape index: {}]   ;;  %s1994_s7 = inlined_call_operand.hbm [shape: f32[1,64], index: 7, kind: input, shape index: {}]   ;;  %s1995_s8 = inlined_call_operand.vmem [shape: bf16[32,65], index: 8, kind: output, shape index: {}]  }
   0x1   :  { %14 = vsyncpa [#allocation5], 0  ;;  %s1503_s27 = smov [#allocation4]   ;;  %s1504_s29 = smov [#allocation2]  }
   0x2   :  { %s39_s28 = sshll.u32 %s1503_s27, 4  ;;  %s23_s30 = sshll.u32 %s1504_s29, 4  ;;  %s40_s28 = int_to_ptr.vmem [resolvable:$true] %s39_s28  ;;  %s24_s30 = int_to_ptr.vmem [resolvable:$true] %s23_s30 }
   0x3   :  { %s1433_s11 = scalar_lea.hbm %s1992_s5, 16 }
   0x4   :  { %p1434_p0 = scmp.ne.s32.totalorder %s1992_s5, %s1433_s11  ;;  %p1437_p1 = scmp.lt.u32.totalorder %s1433_s11, %s1992_s5 }
   0x6   :  { %p1439_p2 = pnand %p1437_p1, %p1434_p0 }
   0x8   :  { %1442 = shalt.err (!%p1439_p2)
}
   0x9   :  { %s1443_s16 = scalar_lea.vmem %s40_s28, 16  ;;  %s1447_s17 = scalar_lea.vmem %s40_s28, 32 }
   0xa   :  { %p1444_p3 = scmp.ne.s32.totalorder %s40_s28, %s1443_s16  ;;  %p1448_p4 = scmp.lt.s32.totalorder %s40_s28, %s40_s28 }
   0xb   :  { %p1449_p5 = scmp.lt.s32.totalorder %s1447_s17, %s1443_s16 }
   0xd   :  { %p1450_p6 = por %p1449_p5, %p1448_p4 }
   0xf   :  { %p1451_p7 = pnand %p1450_p6, %p1444_p3 }
  0x11   :  { %1454 = shalt.err (!%p1451_p7)
}
  0x12   :  { %42 = dma.hbm_to_vmem [thread:$0]  %s1992_s5, 16, %s40_s28, [#allocation5]  }
  0x13   :  { %s1455_s22 = scalar_lea.hbm %s1988_s1, 16 }
  0x14   :  { %p1456_p8 = scmp.ne.s32.totalorder %s1988_s1, %s1455_s22  ;;  %p1459_p9 = scmp.lt.u32.totalorder %s1455_s22, %s1988_s1 }
  0x16   :  { %p1461_p10 = pnand %p1459_p9, %p1456_p8 }
  0x18   :  { %1464 = shalt.err (!%p1461_p10)
}
  0x19   :  { %s1465_s27 = scalar_lea.vmem %s24_s30, 16  ;;  %s1469_s29 = scalar_lea.vmem %s24_s30, 32 }
  0x1a   :  { %p1466_p11 = scmp.ne.s32.totalorder %s24_s30, %s1465_s27  ;;  %p1470_p12 = scmp.lt.s32.totalorder %s24_s30, %s24_s30 }
  0x1b   :  { %p1471_p13 = scmp.lt.s32.totalorder %s1469_s29, %s1465_s27 }
  0x1d   :  { %p1472_p0 = por %p1471_p13, %p1470_p12 }
  0x1f   :  { %p1473_p1 = pnand %p1472_p0, %p1466_p11 }
  0x21   :  { %1476 = shalt.err (!%p1473_p1)
}
  0x22   :  { %26 = dma.hbm_to_vmem [thread:$0]  %s1988_s1, 16, %s24_s30, [#allocation3]  }
  0x23   :  { %s1505_s9 = smov [#allocation6]   ;;  %s1477_s13 = scalar_lea.hbm %s1994_s7, 16 }
  0x24   :  { %s51_s10 = sshll.u32 %s1505_s9, 4  ;;  %p1478_p2 = scmp.ne.s32.totalorder %s1994_s7, %s1477_s13  ;;  %s52_s10 = int_to_ptr.vmem [resolvable:$true] %s51_s10 }
  0x25   :  { %p1481_p3 = scmp.lt.u32.totalorder %s1477_s13, %s1994_s7 }
  0x27   :  { %p1483_p4 = pnand %p1481_p3, %p1478_p2 }
  0x29   :  { %1486 = shalt.err (!%p1483_p4)
}
  0x2a   :  { %s1487_s18 = scalar_lea.vmem %s52_s10, 16  ;;  %s1491_s1 = scalar_lea.vmem %s52_s10, 32 }
  0x2b   :  { %p1488_p5 = scmp.ne.s32.totalorder %s52_s10, %s1487_s18  ;;  %p1492_p6 = scmp.lt.s32.totalorder %s52_s10, %s52_s10 }
  0x2c   :  { %p1493_p7 = scmp.lt.s32.totalorder %s1491_s1, %s1487_s18 }
  0x2e   :  { %p1494_p8 = por %p1493_p7, %p1492_p6 }
  0x30   :  { %p1495_p9 = pnand %p1494_p8, %p1488_p5 }
  0x32   :  { %1498 = shalt.err (!%p1495_p9)
}
  0x33   :  { %54 = dma.hbm_to_vmem [thread:$0]  %s1994_s7, 16, %s52_s10, [#allocation5]  }
  0x34   :  { %1499 = dma.done.wait [#allocation3], 16  }
  0x35   :  { %1500 = vsyncadd [#allocation3], 4294967280 }
  0x36   :  { %1501 = dma.done.wait [#allocation5], 32  }
  0x37   :  { %1502 = vsyncadd [#allocation5], 4294967264  ;;  %v1506_v0 = vmov 0   ;;  %v83_v1 = vlaneseq  ;;  %vm110_vm0 = vcmask 531456   ;;  %v1413_v2 = vld [vmem:[%s1989_s2] sm:$0xff]   ;;  %v1414_v4 = vld [vmem:[%s1989_s2 + $0x8] sm:$0xff]  }
  0x38   :  { %1411 = vset.pattern.permute.xlu0 %v1506_v0  ;;  %1412 = vset.pattern.permute.xlu1 %v1506_v0  ;;  %v118_v5 = vsel %vm110_vm0, %v1413_v2, 0  ;;  %v1606_v6 = vld [vmem:[%s1989_s2] sm:$0xff]   ;;  %v1611_v7 = vld [vmem:[%s1989_s2 + $0x8] sm:$0xff]   ;;  %v71_v12 = vld [vmem:[%s1987_s0 + $0x10] sm:$0xff]  ;;  %v121_v20 = vsel %vm110_vm0, %v1414_v4, 0  ;;  %vm214_vm9 = vcmask 261120  }
  0x39   :  { %v1596_v3 = vand.u32 127, %v83_v1  ;;  %1402 = vmatprep.subr.msk.bf16.mxu0 %vm110_vm0, %v1413_v2  ;;  %v69_v8 = vld [vmem:[%s1987_s0] sm:$0xff]  ;;  %1330 = vmatprep.subr.bf16.mxu1 %v1413_v2  ;;  %v1617_v9 = vunpack.c.l.bf16 %v1606_v6  ;;  %v1620_v10 = vunpack.c.h.bf16 %v1606_v6  ;;  %v1623_v11 = vunpack.c.l.bf16 %v1611_v7  ;;  %v70_v14 = vld [vmem:[%s1987_s0 + $0x8] sm:$0xff]  ;;  %v72_v18 = vld [vmem:[%s1987_s0 + $0x18] sm:$0xff] }
  0x3a   :  { %1323 = vmatpush3.bf16.xpose.msra.mxu0 %v118_v5  ;;  %183 = vperm.xlu0 %1411, %v69_v8   ;;  %v1631_v13 = vunpack.c.h.bf16 %v1611_v7  ;;  %v1654_v27 = vshrl.u32 %v83_v1, 7  ;;  %v1223_v29 = vld [vmem:[#allocation2] ss:$0 sm:$0xff] }
  0x3b   :  { %1403 = vmatprep.subr.msk.bf16.mxu0 %vm110_vm0, %v1414_v4  ;;  %vm85_vm1 = vcmp.eq.s32.totalorder %v1596_v3, 64  ;;  %189 = vperm.xlu1 %1412, %v71_v12   ;;  %v90_v15 = vmul.f32 -2.0, %v1617_v9  ;;  %v91_v16 = vmul.f32 -2.0, %v1620_v10  ;;  %v92_v17 = vmul.f32 -2.0, %v1623_v11 }
  0x3c   :  { %1331 = vmatpush3.bf16.msra.mxu1 %v1413_v2  ;;  %v93_v19 = vmul.f32 -2.0, %v1631_v13  ;;  %v175_v31 = vadd.s32 16, %v1654_v27  ;;  %vm202_vm3 = vcmp.ne.s32.totalorder %v1654_v27, %v1596_v3  ;;  %v174_v32 = vadd.s32 8, %v1654_v27 }
  0x3d   :  { %1332 = vmatprep.subr.bf16.mxu1 %v1414_v4  ;;  %v94_v21 = vsel %vm85_vm1, 1.0, %v90_v15  ;;  %v95_v22 = vsel %vm85_vm1, 1.0, %v91_v16  ;;  %v96_v24 = vsel %vm85_vm1, 1.0, %v92_v17  ;;  %v176_v34 = vadd.s32 24, %v1654_v27 }
  0x3e   :  { %186 = vperm.xlu0 %1411, %v70_v14   ;;  %v98_v23 = vpack.c.bf16 %v95_v22, %v94_v21  ;;  %v97_v25 = vsel %vm85_vm1, 1.0, %v93_v19  ;;  %vm204_vm5 = vcmp.ne.s32.totalorder %v175_v31, %v1596_v3  ;;  %vm203_vm8 = vcmp.ne.s32.totalorder %v174_v32, %v1596_v3 }
  0x3f   :  { %192 = vperm.xlu1 %1412, %v72_v18   ;;  %v99_v26 = vpack.c.bf16 %v97_v25, %v96_v24  ;;  %vm205_vm12 = vcmp.ne.s32.totalorder %v176_v34, %v1596_v3 }
  0x40   :  { %1333 = vmatpush3.bf16.msra.mxu1 %v1414_v4  ;;  %1326 = vmatprep.mubr.msk.bf16.mxu0 %vm110_vm0, %v98_v23 }
  0x42   :  { %1325 = vmatpush3.bf16.xpose.msra.mxu0 %v121_v20 }
  0x49   :  { %1327 = vmatmul.mubr.msk.bf16.vlgmr.msra.gmra.mrb[0].mxu0 %vm110_vm0, %v99_v26 }
  0xb9   :  { %v184_v28 = vpop.permute.xlu0 %183 }
  0xba   :  { %v190_v30 = vpop.permute.xlu1 %189  ;;  %vm198_vm2 = vcmp.eq.s32.totalorder %v184_v28, %v1223_v29 }
  0xbb   :  { %vm200_vm4 = vcmp.eq.s32.totalorder %v190_v30, %v1223_v29  ;;  %vm206_vm6 = vmand %vm198_vm2, %vm202_vm3 }
  0xbc   :  { %vm208_vm10 = vmand %vm200_vm4, %vm204_vm5 }
  0xbd   :  { %v187_v33 = vpop.permute.xlu0 %186 }
  0xbe   :  { %v193_v35 = vpop.permute.xlu1 %192  ;;  %vm199_vm7 = vcmp.eq.s32.totalorder %v187_v33, %v1223_v29 }
  0xbf   :  { %vm201_vm11 = vcmp.eq.s32.totalorder %v193_v35, %v1223_v29  ;;  %vm207_vm13 = vmand %vm199_vm7, %vm203_vm8 }
  0xc0   :  { %vm209_vm14 = vmand %vm201_vm11, %vm205_vm12 }
 0x11c   :  { %v1328_v36 = vpop.f32.mrb[0].mxu0 }
 0x11d   :  { %v157_v37 = vpop.f32.mrb[1].mxu0  ;;  %v1668_v42 = vsel %vm208_vm10, %v1328_v36, 1e+30 }
 0x11e   :  { %v1663_v38 = vsel %vm206_vm6, %v157_v37, 1e+30  ;;  %v1329_v39 = vpop.f32.mrb[2].mxu0  ;;  %v221_v45 = vsel %vm214_vm9, %v1668_v42, inf }
 0x11f   :  { %v160_v40 = vpop.f32.mrb[3].mxu0  ;;  %v215_v41 = vsel %vm214_vm9, %v1663_v38, inf  ;;  %v1676_v46 = vsel %vm209_vm14, %v1329_v39, 1e+30 }
 0x120   :  { %v1670_v43 = vsel %vm207_vm13, %v160_v40, 1e+30  ;;  %216 = vmin.xlane.f32.xlu0 %v215_v41  ;;  %v224_v47 = vsel %vm214_vm9, %v1676_v46, inf }
 0x121   :  { %v218_v44 = vsel %vm214_vm9, %v1670_v43, inf }
 0x122   :  { %219 = vmin.xlane.f32.xlu1 %v218_v44 }
 0x124   :  { %222 = vmin.xlane.f32.xlu0 %v221_v45 }
 0x128   :  { %225 = vmin.xlane.f32.xlu0 %v224_v47 }
 0x1ad   :  { %v1680_v48 = vpop.xlane.xlu0 %216 }
 0x1ae   :  { %vm231_vm15 = vcmp.le.f32.partialorder %v1663_v38, %v1680_v48  ;;  %vm227_vm8 = vcmp.lt.f32.partialorder %v1680_v48, 1e+30 }
 0x1af   :  { %v235_v49 = vsel %vm231_vm15, %v1596_v3, 32  ;;  %v1685_v50 = vpop.xlane.xlu1 %219 }
 0x1b0   :  { %vm232_vm1 = vcmp.le.f32.partialorder %v1670_v43, %v1685_v50  ;;  %v239_v51 = vsel %vm214_vm9, %v235_v49, 2147483647  ;;  %vm228_vm12 = vcmp.lt.f32.partialorder %v1685_v50, 1e+30 }
 0x1b1   :  { %v236_v52 = vsel %vm232_vm1, %v1596_v3, 32  ;;  %v1691_v53 = vpop.xlane.xlu0 %222  ;;  %v241_v54 = vshra.s32 %v239_v51, 16  ;;  %v240_v8 = vand.u32 65535, %v239_v51 }
 0x1b2   :  { %vm233_vm2 = vcmp.le.f32.partialorder %v1668_v42, %v1691_v53  ;;  %v254_v55 = vsel %vm214_vm9, %v236_v52, 2147483647  ;;  %vm229_vm14 = vcmp.lt.f32.partialorder %v1691_v53, 1e+30 }
 0x1b3   :  { %v237_v56 = vsel %vm233_vm2, %v1596_v3, 32  ;;  %v243_v57 = vcvt.s32.f32 %v241_v54  ;;  %v256_v58 = vshra.s32 %v254_v55, 16  ;;  %v255_v12 = vand.u32 65535, %v254_v55 }
 0x1b4   :  { %v269_v59 = vsel %vm214_vm9, %v237_v56, 2147483647  ;;  %v242_v15 = vcvt.s32.f32 %v240_v8  ;;  %v1507_v56 = vmov 0.0  }
 0x1b5   :  { %v1698_v60 = vpop.xlane.xlu0 %225  ;;  %244 = vmin.xlane.f32.xlu1 %v243_v57  ;;  %v258_v61 = vcvt.s32.f32 %v256_v58  ;;  %v271_v62 = vshra.s32 %v269_v59, 16  ;;  %v270_v16 = vand.u32 65535, %v269_v59  ;;  %v257_v19 = vcvt.s32.f32 %v255_v12  ;;  %v1415_v12 = vld [vmem:[%s1991_s4] sm:$0xff]  }
 0x1b6   :  { %vm234_vm3 = vcmp.le.f32.partialorder %v1676_v46, %v1698_v60  ;;  %1360 = vmatprep.subr.bf16.mxu0 %v1415_v12 }
 0x1b7   :  { %v238_v63 = vsel %vm234_vm3, %v1596_v3, 32  ;;  %259 = vmin.xlane.f32.xlu0 %v258_v61  ;;  %v273_v1 = vcvt.s32.f32 %v271_v62  ;;  %v272_v22 = vcvt.s32.f32 %v270_v16  ;;  %vm230_vm3 = vcmp.lt.f32.partialorder %v1698_v60, 1e+30  ;;  %1361 = vmatpush3.bf16.msra.mxu0 %v1415_v12 }
 0x1b8   :  { %v284_v2 = vsel %vm214_vm9, %v238_v63, 2147483647 }
 0x1b9   :  { %274 = vmin.xlane.f32.xlu1 %v273_v1  ;;  %v286_v4 = vshra.s32 %v284_v2, 16  ;;  %v285_v23 = vand.u32 65535, %v284_v2 }
 0x1bb   :  { %v288_v5 = vcvt.s32.f32 %v286_v4  ;;  %v287_v26 = vcvt.s32.f32 %v285_v23 }
 0x1bd   :  { %289 = vmin.xlane.f32.xlu0 %v288_v5 }
 0x242   :  { %v245_v14 = vpop.xlane.xlu1 %244 }
 0x243   :  { %vm246_vm4 = vcmp.eq.f32.partialorder %v243_v57, %v245_v14  ;;  %v251_v29 = vcvt.f32.s32 %v245_v14  ;;  %v1416_v14 = vld [vmem:[%s1991_s4 + $0x8] sm:$0xff]  }
 0x244   :  { %v260_v17 = vpop.xlane.xlu0 %259  ;;  %v247_v18 = vsel %vm246_vm4, %v242_v15, inf  ;;  %1362 = vmatprep.subr.bf16.mxu0 %v1416_v14  ;;  %v1418_v15 = vld [vmem:[%s1991_s4 + $0x18] sm:$0xff]  }
 0x245   :  { %248 = vmin.xlane.f32.xlu1 %v247_v18  ;;  %vm261_vm5 = vcmp.eq.f32.partialorder %v258_v61, %v260_v17  ;;  %v266_v30 = vcvt.f32.s32 %v260_v17  ;;  %v252_v33 = vshll.u32 %v251_v29, 16  ;;  %1363 = vmatpush3.bf16.msra.mxu0 %v1416_v14  ;;  %v1419_v17 = vld [vmem:[%s1991_s4 + $0x20] ss:$0 sps:$4 sm:$0x11]  }
 0x246   :  { %v275_v20 = vpop.xlane.xlu1 %274  ;;  %v262_v21 = vsel %vm261_vm5, %v257_v19, inf }
 0x247   :  { %263 = vmin.xlane.f32.xlu0 %v262_v21  ;;  %vm276_vm6 = vcmp.eq.f32.partialorder %v273_v1, %v275_v20  ;;  %v281_v31 = vcvt.f32.s32 %v275_v20  ;;  %v267_v36 = vshll.u32 %v266_v30, 16 }
 0x248   :  { %v277_v24 = vsel %vm276_vm6, %v272_v22, inf  ;;  %vm713_vm6 = vcmask 1040384  }
 0x249   :  { %278 = vmin.xlane.f32.xlu1 %v277_v24  ;;  %v282_v40 = vshll.u32 %v281_v31, 16  ;;  %v1759_v16 = vsel %vm713_vm6, 65535, %v1506_v0 }
 0x24a   :  { %v290_v25 = vpop.xlane.xlu0 %289  ;;  %v841_v18 = vand.u32 %v1419_v17, %v1759_v16 }
 0x24b   :  { %vm291_vm7 = vcmp.eq.f32.partialorder %v288_v5, %v290_v25  ;;  %v296_v41 = vcvt.f32.s32 %v290_v25 }
 0x24c   :  { %v292_v28 = vsel %vm291_vm7, %v287_v26, inf }
 0x24d   :  { %293 = vmin.xlane.f32.xlu0 %v292_v28  ;;  %v297_v52 = vshll.u32 %v296_v41, 16 }
 0x2d2   :  { %v249_v32 = vpop.xlane.xlu1 %248 }
 0x2d3   :  { %v250_v34 = vcvt.f32.s32 %v249_v32 }
 0x2d4   :  { %v264_v35 = vpop.xlane.xlu0 %263 }
 0x2d5   :  { %v253_v37 = vadd.s32 %v252_v33, %v250_v34  ;;  %v265_v39 = vcvt.f32.s32 %v264_v35 }
 0x2d6   :  { %v279_v44 = vpop.xlane.xlu1 %278 }
 0x2d7   :  { %vm299_vm10 = vcmp.eq.s32.totalorder %v1596_v3, %v253_v37  ;;  %v268_v45 = vadd.s32 %v267_v36, %v265_v39  ;;  %v280_v47 = vcvt.f32.s32 %v279_v44 }
 0x2d8   :  { %vm311_vm11 = vmand %vm299_vm10, %vm227_vm8 }
 0x2d9   :  { %vm300_vm13 = vcmp.eq.s32.totalorder %v1596_v3, %v268_v45  ;;  %v283_v49 = vadd.s32 %v282_v40, %v280_v47  ;;  %v1711_v51 = vsel %vm311_vm11, 1e+30, %v1663_v38  ;;  %v1224_v57 = vsel %vm311_vm11, 1.0, %v1507_v56 }
 0x2da   :  { %v294_v54 = vpop.xlane.xlu0 %293  ;;  %v329_v55 = vsel %vm214_vm9, %v1711_v51, inf  ;;  %vm312_vm15 = vmand %vm300_vm13, %vm228_vm12 }
 0x2db   :  { %vm301_vm1 = vcmp.eq.s32.totalorder %v1596_v3, %v283_v49  ;;  %v295_v58 = vcvt.f32.s32 %v294_v54  ;;  %330 = vmin.xlane.f32.xlu1 %v329_v55  ;;  %v1721_v38 = vsel %vm312_vm15, 1e+30, %v1670_v43  ;;  %v1225_v59 = vsel %vm312_vm15, 1.0, %v1507_v56 }
 0x2dc   :  { %v332_v61 = vsel %vm214_vm9, %v1721_v38, inf  ;;  %v323_v62 = vpack.c.bf16 %v1225_v59, %v1224_v57  ;;  %vm313_vm2 = vmand %vm301_vm1, %vm229_vm14 }
 0x2dd   :  { %v298_v63 = vadd.s32 %v297_v52, %v295_v58  ;;  %333 = vmin.xlane.f32.xlu0 %v332_v61  ;;  %v1729_v1 = vsel %vm313_vm2, 1e+30, %v1668_v42  ;;  %v1226_v2 = vsel %vm313_vm2, 1.0, %v1507_v56 }
 0x2de   :  { %1334 = vmatprep.mubr.msk.bf16.mxu1 %vm214_vm9, %v323_v62  ;;  %v335_v43 = vsel %vm214_vm9, %v1729_v1, inf }
 0x2df   :  { %vm302_vm4 = vcmp.eq.s32.totalorder %v1596_v3, %v298_v63  ;;  %336 = vmin.xlane.f32.xlu1 %v335_v43 }
 0x2e0   :  { %vm314_vm5 = vmand %vm302_vm4, %vm230_vm3 }
 0x2e1   :  { %v1227_v4 = vsel %vm314_vm5, 1.0, %v1507_v56  ;;  %v1741_v42 = vsel %vm314_vm5, 1e+30, %v1676_v46  ;;  %v1417_v46 = vld [vmem:[%s1991_s4 + $0x10] sm:$0xff]  }
 0x2e2   :  { %v338_v5 = vsel %vm214_vm9, %v1741_v42, inf  ;;  %v324_v8 = vpack.c.bf16 %v1227_v4, %v1226_v2  ;;  %1364 = vmatprep.subr.bf16.mxu0 %v1417_v46 }
 0x2e3   :  { %339 = vmin.xlane.f32.xlu0 %v338_v5  ;;  %1365 = vmatpush3.bf16.msra.mxu0 %v1417_v46 }
 0x2e4   :  { %1335 = vmatmul.mubr.msk.bf16.vlgmr.msra.gmra.mrb[0].mxu1 %vm214_vm9, %v324_v8  ;;  %1366 = vmatprep.subr.bf16.mxu0 %v1418_v15 }
 0x2e7   :  { %1367 = vmatpush3.bf16.msra.mxu0 %v1418_v15 }
 0x2e8   :  { %1368 = vmatprep.subr.bf16.mxu0 %v841_v18 }
 0x2eb   :  { %1369 = vmatpush3.bf16.msra.mxu0 %v841_v18 }
 0x368   :  { %v1765_v19 = vpop.xlane.xlu1 %330 }
 0x369   :  { %vm345_vm7 = vcmp.le.f32.partialorder %v1711_v51, %v1765_v19  ;;  %vm341_vm5 = vcmp.lt.f32.partialorder %v1765_v19, 1e+30 }
 0x36a   :  { %v349_v20 = vsel %vm345_vm7, %v1596_v3, 32  ;;  %v1770_v21 = vpop.xlane.xlu0 %333 }
 0x36b   :  { %vm346_vm10 = vcmp.le.f32.partialorder %v1721_v38, %v1770_v21  ;;  %v353_v0 = vsel %vm214_vm9, %v349_v20, 2147483647 }
 0x36c   :  { %v350_v22 = vsel %vm346_vm10, %v1596_v3, 32  ;;  %v1776_v23 = vpop.xlane.xlu1 %336  ;;  %v355_v24 = vshra.s32 %v353_v0, 16  ;;  %v354_v58 = vand.u32 65535, %v353_v0  ;;  %vm1996_vm10 = vcmp.lt.f32.partialorder %v1770_v21, 1e+30 }
 0x36d   :  { %vm347_vm11 = vcmp.le.f32.partialorder %v1729_v1, %v1776_v23  ;;  %v368_v25 = vsel %vm214_vm9, %v350_v22, 2147483647 }
 0x36e   :  { %v351_v26 = vsel %vm347_vm11, %v1596_v3, 32  ;;  %v357_v28 = vcvt.s32.f32 %v355_v24  ;;  %v370_v29 = vshra.s32 %v368_v25, 16  ;;  %v369_v59 = vand.u32 65535, %v368_v25 }
 0x36f   :  { %v383_v30 = vsel %vm214_vm9, %v351_v26, 2147483647  ;;  %v356_v62 = vcvt.s32.f32 %v354_v58 }
 0x370   :  { %v1783_v31 = vpop.xlane.xlu0 %339  ;;  %358 = vmin.xlane.f32.xlu1 %v357_v28  ;;  %v372_v32 = vcvt.s32.f32 %v370_v29  ;;  %v385_v33 = vshra.s32 %v383_v30, 16  ;;  %v384_v63 = vand.u32 65535, %v383_v30  ;;  %v371_v4 = vcvt.s32.f32 %v369_v59 }
 0x371   :  { %vm348_vm13 = vcmp.le.f32.partialorder %v1741_v42, %v1783_v31 }
 0x372   :  { %v352_v34 = vsel %vm348_vm13, %v1596_v3, 32  ;;  %373 = vmin.xlane.f32.xlu0 %v372_v32  ;;  %v387_v35 = vcvt.s32.f32 %v385_v33  ;;  %v386_v12 = vcvt.s32.f32 %v384_v63  ;;  %vm343_vm13 = vcmp.lt.f32.partialorder %v1776_v23, 1e+30 }
 0x373   :  { %v398_v36 = vsel %vm214_vm9, %v352_v34, 2147483647 }
 0x374   :  { %388 = vmin.xlane.f32.xlu1 %v387_v35  ;;  %v400_v37 = vshra.s32 %v398_v36, 16  ;;  %v399_v14 = vand.u32 65535, %v398_v36 }
 0x376   :  { %v402_v39 = vcvt.s32.f32 %v400_v37  ;;  %v401_v17 = vcvt.s32.f32 %v399_v14 }
 0x378   :  { %403 = vmin.xlane.f32.xlu0 %v402_v39 }
 0x3b7   :  { %v1336_v40 = vpop.f32.mrb[0].mxu1 }
 0x3b8   :  { %v607_v41 = vpop.f32.mrb[1].mxu1  ;;  %v770_v45 = vsub.f32 %v1336_v40, %v1623_v11 }
 0x3b9   :  { %v1337_v44 = vpop.f32.mrb[2].mxu1  ;;  %v768_v52 = vsub.f32 %v607_v41, %v1617_v9 }
 0x3ba   :  { %v771_v47 = vsub.f32 %v1337_v44, %v1631_v13  ;;  %v610_v49 = vpop.f32.mrb[3].mxu1 }
 0x3bb   :  { %v769_v54 = vsub.f32 %v610_v49, %v1620_v10 }
 0x3bc   :  { %v781_v55 = vpack.c.bf16 %v771_v47, %v770_v45 }
 0x3bd   :  { %v780_v57 = vpack.c.bf16 %v769_v54, %v768_v52 }
 0x3bf   :  { %1370 = vmatprep.mubr.msk.bf16.mxu0 %vm110_vm0, %v780_v57 }
 0x3c0   :  { %1371 = vmatmul.mubr.msk.bf16.vlgmr.msra.gmra.mrb[4].mxu0 %vm110_vm0, %v781_v55 }
 0x3fd   :  { %v359_v61 = vpop.xlane.xlu1 %358 }
 0x3fe   :  { %vm360_vm15 = vcmp.eq.f32.partialorder %v357_v28, %v359_v61  ;;  %v365_v20 = vcvt.f32.s32 %v359_v61 }
 0x3ff   :  { %v374_v43 = vpop.xlane.xlu0 %373  ;;  %v361_v2 = vsel %vm360_vm15, %v356_v62, inf }
 0x400   :  { %362 = vmin.xlane.f32.xlu1 %v361_v2  ;;  %vm375_vm1 = vcmp.eq.f32.partialorder %v372_v32, %v374_v43  ;;  %v380_v0 = vcvt.f32.s32 %v374_v43  ;;  %v366_v24 = vshll.u32 %v365_v20, 16 }
 0x401   :  { %v389_v5 = vpop.xlane.xlu1 %388  ;;  %v376_v8 = vsel %vm375_vm1, %v371_v4, inf }
 0x402   :  { %377 = vmin.xlane.f32.xlu0 %v376_v8  ;;  %vm390_vm2 = vcmp.eq.f32.partialorder %v387_v35, %v389_v5  ;;  %v395_v25 = vcvt.f32.s32 %v389_v5  ;;  %v381_v29 = vshll.u32 %v380_v0, 16 }
 0x403   :  { %v391_v46 = vsel %vm390_vm2, %v386_v12, inf }
 0x404   :  { %392 = vmin.xlane.f32.xlu1 %v391_v46  ;;  %v396_v35 = vshll.u32 %v395_v25, 16 }
 0x405   :  { %v404_v15 = vpop.xlane.xlu0 %403 }
 0x406   :  { %vm405_vm4 = vcmp.eq.f32.partialorder %v402_v39, %v404_v15  ;;  %v410_v33 = vcvt.f32.s32 %v404_v15 }
 0x407   :  { %v406_v18 = vsel %vm405_vm4, %v401_v17, inf  ;;  %vm344_vm4 = vcmp.lt.f32.partialorder %v1783_v31, 1e+30 }
 0x408   :  { %407 = vmin.xlane.f32.xlu0 %v406_v18  ;;  %v411_v45 = vshll.u32 %v410_v33, 16 }
 0x48d   :  { %v363_v22 = vpop.xlane.xlu1 %362 }
 0x48e   :  { %v364_v26 = vcvt.f32.s32 %v363_v22 }
 0x48f   :  { %v378_v28 = vpop.xlane.xlu0 %377 }
 0x490   :  { %v367_v30 = vadd.s32 %v366_v24, %v364_v26  ;;  %v379_v32 = vcvt.f32.s32 %v378_v28 }
 0x491   :  { %v393_v34 = vpop.xlane.xlu1 %392 }
 0x492   :  { %v382_v36 = vadd.s32 %v381_v29, %v379_v32  ;;  %v394_v37 = vcvt.f32.s32 %v393_v34  ;;  %vm413_vm6 = vcmp.eq.s32.totalorder %v1596_v3, %v367_v30 }
 0x493   :  { %v1797_v39 = vpop.f32.mrb[4].mxu0  ;;  %vm425_vm7 = vmand %vm413_vm6, %vm341_vm5 }
 0x494   :  { %v397_v40 = vadd.s32 %v396_v35, %v394_v37  ;;  %v1802_v41 = vpop.f32.mrb[5].mxu0  ;;  %v439_v44 = vsel %vm425_vm7, 1e+30, %v1711_v51  ;;  %vm414_vm11 = vcmp.eq.s32.totalorder %v1596_v3, %v382_v36  ;;  %v1228_v54 = vsel %vm425_vm7, 1.0, %v1507_v56 }
 0x495   :  { %v408_v47 = vpop.xlane.xlu0 %407  ;;  %v1807_v49 = vpop.f32.mrb[6].mxu0  ;;  %v443_v52 = vsel %vm214_vm9, %v439_v44, inf  ;;  %vm426_vm15 = vmand %vm414_vm11, %vm1996_vm10 }
 0x496   :  { %v409_v55 = vcvt.f32.s32 %v408_v47  ;;  %v1813_v57 = vpop.f32.mrb[7].mxu0  ;;  %444 = vmin.xlane.f32.xlu1 %v443_v52  ;;  %v440_v51 = vsel %vm426_vm15, 1e+30, %v1721_v38  ;;  %v1229_v58 = vsel %vm426_vm15, 1.0, %v1507_v56  ;;  %vm415_vm1 = vcmp.eq.s32.totalorder %v1596_v3, %v397_v40 }
 0x497   :  { %v446_v59 = vsel %vm214_vm9, %v440_v51, inf  ;;  %v437_v61 = vpack.c.bf16 %v1229_v58, %v1228_v54  ;;  %vm427_vm2 = vmand %vm415_vm1, %vm343_vm13 }
 0x498   :  { %v412_v62 = vadd.s32 %v411_v45, %v409_v55  ;;  %447 = vmin.xlane.f32.xlu0 %v446_v59  ;;  %v441_v63 = vsel %vm427_vm2, 1e+30, %v1729_v1  ;;  %v1230_v38 = vsel %vm427_vm2, 1.0, %v1507_v56 }
 0x499   :  { %1338 = vmatprep.mubr.msk.bf16.mxu1 %vm214_vm9, %v437_v61  ;;  %v449_v43 = vsel %vm214_vm9, %v441_v63, inf }
 0x49a   :  { %450 = vmin.xlane.f32.xlu1 %v449_v43  ;;  %vm416_vm6 = vcmp.eq.s32.totalorder %v1596_v3, %v412_v62 }
 0x49b   :  { %vm428_vm7 = vmand %vm416_vm6, %vm344_vm4 }
 0x49c   :  { %v442_v2 = vsel %vm428_vm7, 1e+30, %v1741_v42  ;;  %v1231_v4 = vsel %vm428_vm7, 1.0, %v1507_v56 }
 0x49d   :  { %v452_v1 = vsel %vm214_vm9, %v442_v2, inf  ;;  %v438_v5 = vpack.c.bf16 %v1231_v4, %v1230_v38 }
 0x49e   :  { %453 = vmin.xlane.f32.xlu0 %v452_v1 }
 0x49f   :  { %1339 = vmatmul.mubr.msk.bf16.gmra.mrb[4].mxu1 %vm214_vm9, %v438_v5 }
 0x523   :  { %v1833_v8 = vpop.xlane.xlu1 %444 }
 0x524   :  { %vm459_vm11 = vcmp.le.f32.partialorder %v439_v44, %v1833_v8 }
 0x525   :  { %v463_v12 = vsel %vm459_vm11, %v1596_v3, 32  ;;  %v1837_v14 = vpop.xlane.xlu0 %447 }
 0x526   :  { %vm460_vm15 = vcmp.le.f32.partialorder %v440_v51, %v1837_v14  ;;  %v467_v42 = vsel %vm214_vm9, %v463_v12, 2147483647 }
 0x527   :  { %v464_v46 = vsel %vm460_vm15, %v1596_v3, 32  ;;  %v1842_v15 = vpop.xlane.xlu1 %450  ;;  %v469_v17 = vshra.s32 %v467_v42, 16  ;;  %v468_v51 = vand.u32 65535, %v467_v42 }
 0x528   :  { %vm461_vm1 = vcmp.le.f32.partialorder %v441_v63, %v1842_v15  ;;  %v482_v18 = vsel %vm214_vm9, %v464_v46, 2147483647 }
 0x529   :  { %v465_v20 = vsel %vm461_vm1, %v1596_v3, 32  ;;  %v471_v0 = vcvt.s32.f32 %v469_v17  ;;  %v484_v22 = vshra.s32 %v482_v18, 16  ;;  %v483_v58 = vand.u32 65535, %v482_v18  ;;  %v1420_v18 = vld [vmem:[%s1990_s3] sm:$0xff]  }
 0x52a   :  { %v497_v24 = vsel %vm214_vm9, %v465_v20, 2147483647  ;;  %v470_v61 = vcvt.s32.f32 %v468_v51  ;;  %1346 = vmatprep.subr.bf16.mxu1 %v1420_v18  ;;  %v1421_v20 = vld [vmem:[%s1990_s3 + $0x8] sm:$0xff]   ;;  %vm1997_vm1 = vcmp.lt.f32.partialorder %v1833_v8, 1e+30 }
 0x52b   :  { %v1848_v25 = vpop.xlane.xlu0 %453  ;;  %472 = vmin.xlane.f32.xlu1 %v471_v0  ;;  %v486_v26 = vcvt.s32.f32 %v484_v22  ;;  %v499_v28 = vshra.s32 %v497_v24, 16  ;;  %v498_v62 = vand.u32 65535, %v497_v24  ;;  %v485_v38 = vcvt.s32.f32 %v483_v58  ;;  %1347 = vmatpush3.bf16.msra.mxu1 %v1420_v18  ;;  %v1423_v22 = vld [vmem:[%s1990_s3 + $0x18] sm:$0xff]   ;;  %v1424_v24 = vld [vmem:[%s1990_s3 + $0x20] ss:$0 sps:$4 sm:$0x11]  }
 0x52c   :  { %vm462_vm2 = vcmp.le.f32.partialorder %v442_v2, %v1848_v25  ;;  %1348 = vmatprep.subr.bf16.mxu1 %v1421_v20 }
 0x52d   :  { %v466_v29 = vsel %vm462_vm2, %v1596_v3, 32  ;;  %487 = vmin.xlane.f32.xlu0 %v486_v26  ;;  %v501_v30 = vcvt.s32.f32 %v499_v28  ;;  %v500_v1 = vcvt.s32.f32 %v498_v62 }
 0x52e   :  { %v512_v32 = vsel %vm214_vm9, %v466_v29, 2147483647 }
 0x52f   :  { %502 = vmin.xlane.f32.xlu1 %v501_v30  ;;  %v514_v33 = vshra.s32 %v512_v32, 16  ;;  %v513_v5 = vand.u32 65535, %v512_v32  ;;  %1349 = vmatpush3.bf16.msra.mxu1 %v1421_v20 }
 0x531   :  { %v516_v34 = vcvt.s32.f32 %v514_v33  ;;  %v515_v42 = vcvt.s32.f32 %v513_v5 }
 0x533   :  { %517 = vmin.xlane.f32.xlu0 %v516_v34 }
 0x572   :  { %v1340_v35 = vpop.f32.mrb[4].mxu1 }
 0x573   :  { %v623_v36 = vpop.f32.mrb[5].mxu1  ;;  %v774_v40 = vsub.f32 %v1340_v35, %v1623_v11 }
 0x574   :  { %v1341_v37 = vpop.f32.mrb[6].mxu1  ;;  %v772_v47 = vsub.f32 %v623_v36, %v1617_v9 }
 0x575   :  { %v775_v44 = vsub.f32 %v1341_v37, %v1631_v13  ;;  %v626_v45 = vpop.f32.mrb[7].mxu1 }
 0x576   :  { %v773_v52 = vsub.f32 %v626_v45, %v1620_v10 }
 0x577   :  { %v783_v54 = vpack.c.bf16 %v775_v44, %v774_v40 }
 0x578   :  { %v782_v55 = vpack.c.bf16 %v773_v52, %v772_v47 }
 0x57a   :  { %1374 = vmatprep.mubr.msk.bf16.mxu0 %vm110_vm0, %v782_v55 }
 0x57b   :  { %1375 = vmatmul.mubr.msk.bf16.gmra.mrb[8].mxu0 %vm110_vm0, %v783_v54 }
 0x5b8   :  { %v473_v59 = vpop.xlane.xlu1 %472 }
 0x5b9   :  { %vm474_vm6 = vcmp.eq.f32.partialorder %v471_v0, %v473_v59  ;;  %v1422_v0 = vld [vmem:[%s1990_s3 + $0x10] sm:$0xff]   ;;  %v479_v28 = vcvt.f32.s32 %v473_v59 }
 0x5ba   :  { %v488_v63 = vpop.xlane.xlu0 %487  ;;  %v475_v43 = vsel %vm474_vm6, %v470_v61, inf  ;;  %1350 = vmatprep.subr.bf16.mxu1 %v1422_v0 }
 0x5bb   :  { %476 = vmin.xlane.f32.xlu1 %v475_v43  ;;  %vm489_vm7 = vcmp.eq.f32.partialorder %v486_v26, %v488_v63  ;;  %1351 = vmatpush3.bf16.msra.mxu1 %v1422_v0  ;;  %v717_v26 = vand.u32 %v1424_v24, %v1759_v16  ;;  %v494_v29 = vcvt.f32.s32 %v488_v63  ;;  %v480_v32 = vshll.u32 %v479_v28, 16 }
 0x5bc   :  { %v503_v2 = vpop.xlane.xlu1 %502  ;;  %v490_v4 = vsel %vm489_vm7, %v485_v38, inf  ;;  %1352 = vmatprep.subr.bf16.mxu1 %v1423_v22  ;;  %vm1998_vm7 = vcmp.lt.f32.partialorder %v1837_v14, 1e+30 }
 0x5bd   :  { %491 = vmin.xlane.f32.xlu0 %v490_v4  ;;  %vm504_vm11 = vcmp.eq.f32.partialorder %v501_v30, %v503_v2  ;;  %v509_v33 = vcvt.f32.s32 %v503_v2  ;;  %v495_v36 = vshll.u32 %v494_v29, 16  ;;  %v1242_v29 = vld [vmem:[#allocation4] ss:$0 sm:$0xff] }
 0x5be   :  { %v505_v12 = vsel %vm504_vm11, %v500_v1, inf }
 0x5bf   :  { %506 = vmin.xlane.f32.xlu1 %v505_v12  ;;  %1353 = vmatpush3.bf16.msra.mxu1 %v1423_v22  ;;  %v510_v47 = vshll.u32 %v509_v33, 16 }
 0x5c0   :  { %v518_v46 = vpop.xlane.xlu0 %517  ;;  %1354 = vmatprep.subr.bf16.mxu1 %v717_v26 }
 0x5c1   :  { %vm519_vm15 = vcmp.eq.f32.partialorder %v516_v34, %v518_v46  ;;  %v524_v44 = vcvt.f32.s32 %v518_v46  ;;  %v1428_v46 = vld [vmem:[%s1993_s6 + $0x8] sm:$0xff]  }
 0x5c2   :  { %v520_v17 = vsel %vm519_vm15, %v515_v42, inf }
 0x5c3   :  { %521 = vmin.xlane.f32.xlu0 %v520_v17  ;;  %1355 = vmatpush3.bf16.msra.mxu1 %v717_v26  ;;  %v525_v58 = vshll.u32 %v524_v44, 16 }
 0x648   :  { %v477_v30 = vpop.xlane.xlu1 %476 }
 0x649   :  { %v478_v34 = vcvt.f32.s32 %v477_v30 }
 0x64a   :  { %v492_v35 = vpop.xlane.xlu0 %491 }
 0x64b   :  { %v481_v37 = vadd.s32 %v480_v32, %v478_v34  ;;  %v493_v40 = vcvt.f32.s32 %v492_v35 }
 0x64c   :  { %v507_v45 = vpop.xlane.xlu1 %506 }
 0x64d   :  { %vm527_vm2 = vcmp.eq.s32.totalorder %v1596_v3, %v481_v37  ;;  %v496_v16 = vadd.s32 %v495_v36, %v493_v40  ;;  %v508_v52 = vcvt.f32.s32 %v507_v45 }
 0x64e   :  { %vm539_vm6 = vmand %vm527_vm2, %vm1997_vm1  ;;  %v1376_v54 = vpop.f32.mrb[8].mxu0  ;;  %vm457_vm2 = vcmp.lt.f32.partialorder %v1842_v15, 1e+30 }
 0x64f   :  { %vm528_vm11 = vcmp.eq.s32.totalorder %v1596_v3, %v496_v16  ;;  %v511_v55 = vadd.s32 %v510_v47, %v508_v52  ;;  %v893_v51 = vpop.f32.mrb[9].mxu0  ;;  %v1232_v62 = vsel %vm539_vm6, 1.0, %v1507_v56 }
 0x650   :  { %vm540_vm15 = vmand %vm528_vm11, %vm1998_vm7  ;;  %v522_v59 = vpop.xlane.xlu0 %521  ;;  %v1377_v61 = vpop.f32.mrb[10].mxu0  ;;  %vm458_vm11 = vcmp.lt.f32.partialorder %v1848_v25, 1e+30 }
 0x651   :  { %v1233_v63 = vsel %vm540_vm15, 1.0, %v1507_v56  ;;  %vm529_vm10 = vcmp.eq.s32.totalorder %v1596_v3, %v511_v55  ;;  %v523_v43 = vcvt.f32.s32 %v522_v59  ;;  %v896_v38 = vpop.f32.mrb[11].mxu0 }
 0x652   :  { %v551_v2 = vpack.c.bf16 %v1233_v63, %v1232_v62  ;;  %vm541_vm1 = vmand %vm529_vm10, %vm457_vm2 }
 0x653   :  { %v526_v4 = vadd.s32 %v525_v58, %v523_v43  ;;  %v1234_v1 = vsel %vm541_vm1, 1.0, %v1507_v56 }
 0x654   :  { %1342 = vmatprep.mubr.msk.bf16.mxu1 %vm214_vm9, %v551_v2 }
 0x655   :  { %vm530_vm7 = vcmp.eq.s32.totalorder %v1596_v3, %v526_v4  ;;  %v1427_v3 = vld [vmem:[%s1993_s6] sm:$0xff]  }
 0x656   :  { %vm542_vm6 = vmand %vm530_vm7, %vm458_vm11  ;;  %1382 = vmatprep.subr.bf16.mxu1 %v1427_v3 }
 0x657   :  { %v1235_v5 = vsel %vm542_vm6, 1.0, %v1507_v56  ;;  %v1429_v56 = vld [vmem:[%s1993_s6 + $0x10] sm:$0xff]  }
 0x658   :  { %v552_v12 = vpack.c.bf16 %v1235_v5, %v1234_v1 }
 0x65a   :  { %1343 = vmatmul.mubr.msk.bf16.gmra.mrb[8].mxu1 %vm214_vm9, %v552_v12  ;;  %vm1999_vm9 = vcmp.lt.f32.partialorder %v1770_v21, 1e+30 }
 0x65b   :  { %1356 = vmatprep.mubr.msk.bf16.mxu1 %vm110_vm0, %v1606_v6  ;;  %v1430_v6 = vld [vmem:[%s1993_s6 + $0x18] sm:$0xff]  }
 0x662   :  { %1357 = vmatmul.mubr.msk.bf16.vlgmr.msra.gmra.mrb[12].mxu1 %vm110_vm0, %v1611_v7 }
 0x663   :  { %1383 = vmatpush3.bf16.msra.mxu1 %v1427_v3 }
 0x664   :  { %1384 = vmatprep.subr.bf16.mxu1 %v1428_v46 }
 0x667   :  { %1385 = vmatpush3.bf16.msra.mxu1 %v1428_v46 }
 0x668   :  { %1386 = vmatprep.subr.bf16.mxu1 %v1429_v56 }
 0x66b   :  { %1387 = vmatpush3.bf16.msra.mxu1 %v1429_v56 }
 0x66c   :  { %1388 = vmatprep.subr.bf16.mxu1 %v1430_v6 }
 0x66f   :  { %1389 = vmatpush3.bf16.msra.mxu1 %v1430_v6 }
 0x72d   :  { %v1344_v7 = vpop.f32.mrb[8].mxu1 }
 0x72e   :  { %v639_v42 = vpop.f32.mrb[9].mxu1  ;;  %v778_v18 = vsub.f32 %v1344_v7, %v1623_v11 }
 0x72f   :  { %v1345_v17 = vpop.f32.mrb[10].mxu1  ;;  %v776_v22 = vsub.f32 %v639_v42, %v1617_v9 }
 0x730   :  { %v779_v20 = vsub.f32 %v1345_v17, %v1631_v13  ;;  %v642_v0 = vpop.f32.mrb[11].mxu1  ;;  %v1263_v17 = vld [vmem:[#allocation6] ss:$0 sm:$0xff] }
 0x731   :  { %v777_v24 = vsub.f32 %v642_v0, %v1620_v10 }
 0x732   :  { %v785_v26 = vpack.c.bf16 %v779_v20, %v778_v18 }
 0x733   :  { %v784_v28 = vpack.c.bf16 %v777_v24, %v776_v22 }
 0x735   :  { %v1358_v30 = vpop.f32.mrb[12].mxu1  ;;  %1378 = vmatprep.mubr.msk.bf16.mxu0 %vm110_vm0, %v784_v28 }
 0x736   :  { %v762_v32 = vadd.f32 %v1358_v30, %v1242_v29  ;;  %v753_v33 = vpop.f32.mrb[13].mxu1  ;;  %1379 = vmatmul.mubr.msk.bf16.gmra.mrb[12].mxu0 %vm110_vm0, %v785_v26  ;;  %vm993_vm0 = vcmask 523264  }
 0x737   :  { %v754_v34 = vadd.f32 %v1242_v29, %v753_v33  ;;  %v1359_v35 = vpop.f32.mrb[14].mxu1 }
 0x738   :  { %v926_v11 = vadd.f32 %v1797_v39, %v762_v32  ;;  %v930_v13 = vadd.f32 %v1376_v54, %v762_v32  ;;  %v765_v36 = vadd.f32 %v1359_v35, %v1242_v29  ;;  %v756_v37 = vpop.f32.mrb[15].mxu1 }
 0x739   :  { %v924_v9 = vadd.f32 %v1802_v41, %v754_v34  ;;  %v928_v10 = vadd.f32 %v893_v51, %v754_v34  ;;  %v757_v40 = vadd.f32 %v1242_v29, %v756_v37 }
 0x73a   :  { %v927_v44 = vadd.f32 %v1807_v49, %v765_v36  ;;  %v931_v45 = vadd.f32 %v1377_v61, %v765_v36  ;;  %v938_v52 = vmax.f32 %v926_v11, 0.0  ;;  %v942_v55 = vmax.f32 %v930_v13, 0.0 }
 0x73b   :  { %v925_v47 = vadd.f32 %v1813_v57, %v757_v40  ;;  %v929_v16 = vadd.f32 %v896_v38, %v757_v40  ;;  %v936_v62 = vmax.f32 %v924_v9, 0.0  ;;  %v940_v63 = vmax.f32 %v928_v10, 0.0 }
 0x73c   :  { %v939_v58 = vmax.f32 %v927_v44, 0.0  ;;  %v943_v59 = vmax.f32 %v931_v45, 0.0 }
 0x73d   :  { %v937_v39 = vmax.f32 %v925_v47, 0.0  ;;  %v941_v54 = vmax.f32 %v929_v16, 0.0 }
 0x73e   :  { %v949_v43 = vpack.c.bf16 %v939_v58, %v938_v52  ;;  %v951_v2 = vpack.c.bf16 %v943_v59, %v942_v55 }
 0x73f   :  { %v948_v41 = vpack.c.bf16 %v937_v39, %v936_v62  ;;  %v950_v51 = vpack.c.bf16 %v941_v54, %v940_v63 }
 0x741   :  { %1390 = vmatprep.mubr.msk.bf16.mxu1 %vm993_vm0, %v948_v41 }
 0x742   :  { %1391 = vmatmul.mubr.msk.bf16.vlgmr.msra.gmra.mrb[16].mxu1 %vm993_vm0, %v949_v43 }
 0x743   :  { %1394 = vmatprep.mubr.msk.bf16.mxu1 %vm993_vm0, %v950_v51 }
 0x74a   :  { %1395 = vmatmul.mubr.msk.bf16.gmra.mrb[20].mxu1 %vm993_vm0, %v951_v2 }
 0x809   :  { %v1380_v49 = vpop.f32.mrb[12].mxu0 }
 0x80a   :  { %v934_v57 = vadd.f32 %v1380_v49, %v762_v32  ;;  %v909_v61 = vpop.f32.mrb[13].mxu0 }
 0x80b   :  { %v932_v38 = vadd.f32 %v909_v61, %v754_v34  ;;  %v1381_v4 = vpop.f32.mrb[14].mxu0 }
 0x80c   :  { %v935_v1 = vadd.f32 %v1381_v4, %v765_v36  ;;  %v912_v5 = vpop.f32.mrb[15].mxu0  ;;  %v946_v3 = vmax.f32 %v934_v57, 0.0 }
 0x80d   :  { %v933_v12 = vadd.f32 %v912_v5, %v757_v40  ;;  %v944_v56 = vmax.f32 %v932_v38, 0.0 }
 0x80e   :  { %v947_v46 = vmax.f32 %v935_v1, 0.0 }
 0x80f   :  { %v945_v6 = vmax.f32 %v933_v12, 0.0 }
 0x810   :  { %v953_v7 = vpack.c.bf16 %v947_v46, %v946_v3 }
 0x811   :  { %v952_v42 = vpack.c.bf16 %v945_v6, %v944_v56 }
 0x813   :  { %1398 = vmatprep.mubr.msk.bf16.mxu1 %vm993_vm0, %v952_v42 }
 0x814   :  { %1399 = vmatmul.mubr.msk.bf16.gmra.mrb[24].mxu1 %vm993_vm0, %v953_v7 }
 0x815   :  { %v1392_v18 = vpop.f32.mrb[16].mxu1 }
 0x816   :  { %v1055_v20 = vadd.f32 %v1392_v18, %v1263_v17  ;;  %v1046_v0 = vpop.f32.mrb[17].mxu1 }
 0x817   :  { %v1047_v22 = vadd.f32 %v1263_v17, %v1046_v0  ;;  %v1393_v24 = vpop.f32.mrb[18].mxu1 }
 0x818   :  { %v1058_v26 = vadd.f32 %v1393_v24, %v1263_v17  ;;  %v1049_v28 = vpop.f32.mrb[19].mxu1  ;;  %v1095_v30 = vmax.f32 %v1055_v20, 0.0 }
 0x819   :  { %v1050_v29 = vadd.f32 %v1263_v17, %v1049_v28  ;;  %v1093_v32 = vmax.f32 %v1047_v22, 0.0 }
 0x81a   :  { %v1096_v33 = vmax.f32 %v1058_v26, 0.0  ;;  %v1107_v11 = vsel %vm229_vm14, %v1095_v30, 0.0  ;;  %vm1149_vm14 = vcmask 519168  }
 0x81b   :  { %v1094_v34 = vmax.f32 %v1050_v29, 0.0  ;;  %v1105_v37 = vsel %vm227_vm8, %v1093_v32, 0.0  ;;  %v1111_v16 = vmax.f32 %v1107_v11, 0.0  ;;  %vm2000_vm8 = vcmp.lt.f32.partialorder %v1833_v8, 1e+30 }
 0x81c   :  { %v1108_v40 = vsel %vm230_vm3, %v1096_v33, 0.0  ;;  %v1109_v58 = vmax.f32 %v1105_v37, 0.0  ;;  %v1508_v11 = vmov 839922192   ;;  %vm1206_vm3 = vcmask 527872  }
 0x81d   :  { %v1396_v35 = vpop.f32.mrb[20].mxu1  ;;  %v1106_v52 = vsel %vm228_vm12, %v1094_v34, 0.0  ;;  %v1112_v62 = vmax.f32 %v1108_v40, 0.0  ;;  %vm2001_vm12 = vcmp.lt.f32.partialorder %v1837_v14, 1e+30 }
 0x81e   :  { %v1071_v13 = vadd.f32 %v1396_v35, %v1263_v17  ;;  %v1062_v36 = vpop.f32.mrb[21].mxu1  ;;  %v1110_v54 = vmax.f32 %v1106_v52, 0.0 }
 0x81f   :  { %v1063_v9 = vadd.f32 %v1263_v17, %v1062_v36  ;;  %v1397_v10 = vpop.f32.mrb[22].mxu1  ;;  %v1509_v36 = vmov 1985246804  }
 0x820   :  { %v1099_v44 = vmax.f32 %v1071_v13, 0.0  ;;  %v1074_v45 = vadd.f32 %v1397_v10, %v1263_v17  ;;  %v1065_v47 = vpop.f32.mrb[23].mxu1  ;;  %v1175_v13 = vunpack.c.l.s4 %v1508_v11  ;;  %v1182_v37 = vunpack.c.l.s4 %v1509_v36 }
 0x821   :  { %v1097_v55 = vmax.f32 %v1063_v9, 0.0  ;;  %v1066_v53 = vadd.f32 %v1263_v17, %v1065_v47 }
 0x822   :  { %v1115_v59 = vsel %vm343_vm13, %v1099_v44, 0.0  ;;  %v1100_v48 = vmax.f32 %v1074_v45, 0.0  ;;  %v1176_v9 = vunpack.c.0.s8 %v1175_v13  ;;  %v1183_v10 = vunpack.c.0.s8 %v1182_v37 }
 0x823   :  { %v1119_v63 = vmax.f32 %v1111_v16, %v1115_v59  ;;  %v1113_v60 = vsel %vm341_vm5, %v1097_v55, 0.0  ;;  %v1098_v39 = vmax.f32 %v1066_v53, 0.0 }
 0x824   :  { %v1117_v43 = vmax.f32 %v1109_v58, %v1113_v60  ;;  %v1116_v2 = vsel %vm344_vm4, %v1100_v48, 0.0  ;;  %v1179_v44 = vsub.s32 %v1176_v9, %v1654_v27  ;;  %v1186_v45 = vsub.s32 %v1183_v10, %v1654_v27 }
 0x825   :  { %v1120_v50 = vmax.f32 %v1112_v62, %v1116_v2  ;;  %v1114_v41 = vsel %vm1999_vm9, %v1098_v39, 0.0 }
 0x826   :  { %v1118_v51 = vmax.f32 %v1110_v54, %v1114_v41 }
 0x8e7   :  { %v1400_v49 = vpop.f32.mrb[24].mxu1 }
 0x8e8   :  { %v1087_v23 = vadd.f32 %v1400_v49, %v1263_v17  ;;  %v1078_v57 = vpop.f32.mrb[25].mxu1 }
 0x8e9   :  { %v1079_v61 = vadd.f32 %v1263_v17, %v1078_v57  ;;  %v1401_v38 = vpop.f32.mrb[26].mxu1 }
 0x8ea   :  { %v1103_v4 = vmax.f32 %v1087_v23, 0.0  ;;  %v1090_v1 = vadd.f32 %v1401_v38, %v1263_v17  ;;  %v1081_v19 = vpop.f32.mrb[27].mxu1 }
 0x8eb   :  { %v1101_v5 = vmax.f32 %v1079_v61, 0.0  ;;  %v1082_v12 = vadd.f32 %v1263_v17, %v1081_v19 }
 0x8ec   :  { %v1123_v3 = vsel %vm457_vm2, %v1103_v4, 0.0  ;;  %v1104_v31 = vmax.f32 %v1090_v1, 0.0 }
 0x8ed   :  { %v1127_v46 = vmax.f32 %v1119_v63, %v1123_v3  ;;  %v1121_v21 = vsel %vm2000_vm8, %v1101_v5, 0.0  ;;  %v1102_v56 = vmax.f32 %v1082_v12, 0.0 }
 0x8ee   :  { %v1125_v6 = vmax.f32 %v1117_v43, %v1121_v21  ;;  %v1124_v7 = vsel %vm458_vm11, %v1104_v31, 0.0 }
 0x8ef   :  { %v1128_v42 = vmax.f32 %v1120_v50, %v1124_v7  ;;  %v1122_v18 = vsel %vm2001_vm12, %v1102_v56, 0.0  ;;  %v1131_v20 = vmul.f32 0.999995, %v1127_v46 }
 0x8f0   :  { %v1126_v0 = vmax.f32 %v1118_v51, %v1122_v18  ;;  %v1129_v17 = vmul.f32 0.999995, %v1125_v6 }
 0x8f1   :  { %v1280_v15 = vpack.c.bf16 %v1131_v20, %v1131_v20  ;;  %v1132_v22 = vmul.f32 0.999995, %v1128_v42  ;;  %v1156_v30 = vmul.f32 %v1131_v20, %v1131_v20 }
 0x8f2   :  { %v1154_v24 = vmul.f32 %v1129_v17, %v1129_v17  ;;  %v1278_v26 = vpack.c.bf16 %v1129_v17, %v1129_v17  ;;  %v1130_v28 = vmul.f32 0.999995, %v1126_v0 }
 0x8f3   :  { %1152 = vst.msk [vmem:[%s1995_s8 + $0x8] sm:$0xf] %vm1149_vm14, %v1280_v15  ;;  %v1281_v8 = vpack.c.bf16 %v1132_v22, %v1132_v22  ;;  %v1157_v33 = vmul.f32 %v1132_v22, %v1132_v22  ;;  %v1164_v34 = vsel %vm993_vm0, %v1156_v30, 0.0 }
 0x8f4   :  { %v1158_v25 = vsel %vm993_vm0, %v1154_v24, 0.0  ;;  %1150 = vst.msk [vmem:[%s1995_s8] sm:$0xf] %vm1149_vm14, %v1278_v26  ;;  %v1155_v14 = vmul.f32 %v1130_v28, %v1130_v28  ;;  %v1279_v29 = vpack.c.bf16 %v1130_v28, %v1130_v28 }
 0x8f5   :  { %1159 = vadd.xlane.f32.xlu1 %v1158_v25  ;;  %1153 = vst.msk [vmem:[%s1995_s8 + $0xc] sm:$0xf] %vm1149_vm14, %v1281_v8  ;;  %v1167_v35 = vsel %vm993_vm0, %v1157_v33, 0.0 }
 0x8f6   :  { %v1161_v32 = vsel %vm993_vm0, %v1155_v14, 0.0  ;;  %1151 = vst.msk [vmem:[%s1995_s8 + $0x4] sm:$0xf] %vm1149_vm14, %v1279_v29 }
 0x8f7   :  { %1162 = vadd.xlane.f32.xlu0 %v1161_v32 }
 0x8f9   :  { %1165 = vadd.xlane.f32.xlu1 %v1164_v34 }
 0x8fb   :  { %1168 = vadd.xlane.f32.xlu0 %v1167_v35 }
 0x982   :  { %v1160_v40 = vpop.xlane.xlu1 %1159 }
 0x984   :  { %v1163_v47 = vpop.xlane.xlu0 %1162 }
 0x985   :  { %v1170_v16 = vpack.c.bf16 %v1163_v47, %v1160_v40 }
 0x986   :  { %v1166_v53 = vpop.xlane.xlu1 %1165 }
 0x987   :  { %v1180_v52 = vrot.slane %v1170_v16, %v1179_v44  ;;  %v1187_v55 = vrot.slane %v1170_v16, %v1186_v45 }
 0x988   :  { %v1169_v58 = vpop.xlane.xlu0 %1168 }
 0x989   :  { %1207 = vst.msk [vmem:[%s1995_s8] sm:$0xf] %vm1206_vm3, %v1180_v52  ;;  %1208 = vst.msk [vmem:[%s1995_s8 + $0x4] sm:$0xf] %vm1206_vm3, %v1187_v55  ;;  %v1171_v59 = vpack.c.bf16 %v1169_v58, %v1166_v53 }
 0x98b   :  { %v1194_v48 = vrot.slane %v1171_v59, %v1179_v44  ;;  %v1201_v62 = vrot.slane %v1171_v59, %v1186_v45 }
 0x98d   :  { %1209 = vst.msk [vmem:[%s1995_s8 + $0x8] sm:$0xf] %vm1206_vm3, %v1194_v48  ;;  %1210 = vst.msk [vmem:[%s1995_s8 + $0xc] sm:$0xf] %vm1206_vm3, %v1201_v62 }
 0x98e   :  { %1215 = vsyncpa [#allocation3], 1 }
 0x98f   :  { %1216 = vsyncpa [#allocation5], 1 }

// kernel: net_forward.4
= control target key start
LH: loop header
LB: loop body
LE: loop exit
PB: predicated region body
PF: predicated region fallthrough
CT: control target
= control target key end

     0   :  { %13 = vsyncpa [#allocation3], 0  ;;  %s1889_s0 = inlined_call_operand.vmem [shape: s32[32,1], index: 0, kind: input, shape index: {}]   ;;  %s1890_s1 = inlined_call_operand.hbm [shape: s32[1,32], index: 1, kind: input, shape index: {}]   ;;  %s1891_s2 = inlined_call_operand.vmem [shape: bf16[32,7], index: 2, kind: input, shape index: {}]   ;;  %s1892_s3 = inlined_call_operand.vmem [shape: bf16[7,64], index: 3, kind: input, shape index: {}]   ;;  %s1893_s4 = inlined_call_operand.vmem [shape: bf16[7,64], index: 4, kind: input, shape index: {}]   ;;  %s1894_s5 = inlined_call_operand.hbm [shape: f32[1,64], index: 5, kind: input, shape index: {}]   ;;  %s1895_s6 = inlined_call_operand.vmem [shape: bf16[64,64], index: 6, kind: input, shape index: {}]   ;;  %s1896_s7 = inlined_call_operand.hbm [shape: f32[1,64], index: 7, kind: input, shape index: {}]   ;;  %s1897_s8 = inlined_call_operand.vmem [shape: bf16[32,65], index: 8, kind: output, shape index: {}]  }
   0x1   :  { %14 = vsyncpa [#allocation5], 0  ;;  %s1391_s27 = smov [#allocation4]   ;;  %s1392_s29 = smov [#allocation2]  }
   0x2   :  { %s39_s28 = sshll.u32 %s1391_s27, 4  ;;  %s23_s30 = sshll.u32 %s1392_s29, 4  ;;  %s40_s28 = int_to_ptr.vmem [resolvable:$true] %s39_s28  ;;  %s24_s30 = int_to_ptr.vmem [resolvable:$true] %s23_s30 }
   0x3   :  { %s1321_s11 = scalar_lea.hbm %s1894_s5, 16 }
   0x4   :  { %p1322_p0 = scmp.ne.s32.totalorder %s1894_s5, %s1321_s11  ;;  %p1325_p1 = scmp.lt.u32.totalorder %s1321_s11, %s1894_s5 }
   0x6   :  { %p1327_p2 = pnand %p1325_p1, %p1322_p0 }
   0x8   :  { %1330 = shalt.err (!%p1327_p2)
}
   0x9   :  { %s1331_s16 = scalar_lea.vmem %s40_s28, 16  ;;  %s1335_s17 = scalar_lea.vmem %s40_s28, 32 }
   0xa   :  { %p1332_p3 = scmp.ne.s32.totalorder %s40_s28, %s1331_s16  ;;  %p1336_p4 = scmp.lt.s32.totalorder %s40_s28, %s40_s28 }
   0xb   :  { %p1337_p5 = scmp.lt.s32.totalorder %s1335_s17, %s1331_s16 }
   0xd   :  { %p1338_p6 = por %p1337_p5, %p1336_p4 }
   0xf   :  { %p1339_p7 = pnand %p1338_p6, %p1332_p3 }
  0x11   :  { %1342 = shalt.err (!%p1339_p7)
}
  0x12   :  { %42 = dma.hbm_to_vmem [thread:$0]  %s1894_s5, 16, %s40_s28, [#allocation5]  }
  0x13   :  { %s1343_s22 = scalar_lea.hbm %s1890_s1, 16 }
  0x14   :  { %p1344_p8 = scmp.ne.s32.totalorder %s1890_s1, %s1343_s22  ;;  %p1347_p9 = scmp.lt.u32.totalorder %s1343_s22, %s1890_s1 }
  0x16   :  { %p1349_p10 = pnand %p1347_p9, %p1344_p8 }
  0x18   :  { %1352 = shalt.err (!%p1349_p10)
}
  0x19   :  { %s1353_s27 = scalar_lea.vmem %s24_s30, 16  ;;  %s1357_s29 = scalar_lea.vmem %s24_s30, 32 }
  0x1a   :  { %p1354_p11 = scmp.ne.s32.totalorder %s24_s30, %s1353_s27  ;;  %p1358_p12 = scmp.lt.s32.totalorder %s24_s30, %s24_s30 }
  0x1b   :  { %p1359_p13 = scmp.lt.s32.totalorder %s1357_s29, %s1353_s27 }
  0x1d   :  { %p1360_p0 = por %p1359_p13, %p1358_p12 }
  0x1f   :  { %p1361_p1 = pnand %p1360_p0, %p1354_p11 }
  0x21   :  { %1364 = shalt.err (!%p1361_p1)
}
  0x22   :  { %26 = dma.hbm_to_vmem [thread:$0]  %s1890_s1, 16, %s24_s30, [#allocation3]  }
  0x23   :  { %s1393_s9 = smov [#allocation6]   ;;  %s1365_s13 = scalar_lea.hbm %s1896_s7, 16 }
  0x24   :  { %s51_s10 = sshll.u32 %s1393_s9, 4  ;;  %p1366_p2 = scmp.ne.s32.totalorder %s1896_s7, %s1365_s13  ;;  %s52_s10 = int_to_ptr.vmem [resolvable:$true] %s51_s10 }
  0x25   :  { %p1369_p3 = scmp.lt.u32.totalorder %s1365_s13, %s1896_s7 }
  0x27   :  { %p1371_p4 = pnand %p1369_p3, %p1366_p2 }
  0x29   :  { %1374 = shalt.err (!%p1371_p4)
}
  0x2a   :  { %s1375_s18 = scalar_lea.vmem %s52_s10, 16  ;;  %s1379_s1 = scalar_lea.vmem %s52_s10, 32 }
  0x2b   :  { %p1376_p5 = scmp.ne.s32.totalorder %s52_s10, %s1375_s18  ;;  %p1380_p6 = scmp.lt.s32.totalorder %s52_s10, %s52_s10 }
  0x2c   :  { %p1381_p7 = scmp.lt.s32.totalorder %s1379_s1, %s1375_s18 }
  0x2e   :  { %p1382_p8 = por %p1381_p7, %p1380_p6 }
  0x30   :  { %p1383_p9 = pnand %p1382_p8, %p1376_p5 }
  0x32   :  { %1386 = shalt.err (!%p1383_p9)
}
  0x33   :  { %54 = dma.hbm_to_vmem [thread:$0]  %s1896_s7, 16, %s52_s10, [#allocation5]  }
  0x34   :  { %1387 = dma.done.wait [#allocation3], 16  }
  0x35   :  { %1388 = vsyncadd [#allocation3], 4294967280 }
  0x36   :  { %1389 = dma.done.wait [#allocation5], 32  }
  0x37   :  { %1390 = vsyncadd [#allocation5], 4294967264  ;;  %v1394_v0 = vmov 0   ;;  %v83_v1 = vlaneseq  ;;  %vm110_vm0 = vcmask 56320   ;;  %v1311_v2 = vld [vmem:[%s1891_s2] sm:$0xff]   ;;  %v1312_v4 = vld [vmem:[%s1891_s2 + $0x8] sm:$0xff]  }
  0x38   :  { %1309 = vset.pattern.permute.xlu0 %v1394_v0  ;;  %1310 = vset.pattern.permute.xlu1 %v1394_v0  ;;  %v118_v5 = vsel %vm110_vm0, %v1311_v2, 0  ;;  %v1493_v6 = vld [vmem:[%s1891_s2] sm:$0xff]   ;;  %v1498_v7 = vld [vmem:[%s1891_s2 + $0x8] sm:$0xff]   ;;  %v71_v12 = vld [vmem:[%s1889_s0 + $0x10] sm:$0xff]  ;;  %v121_v22 = vsel %vm110_vm0, %v1312_v4, 0  ;;  %vm214_vm9 = vcmask 261120  }
  0x39   :  { %v1483_v3 = vand.u32 127, %v83_v1  ;;  %1299 = vmatprep.subr.msk.bf16.mxu0 %vm110_vm0, %v1311_v2  ;;  %v69_v8 = vld [vmem:[%s1889_s0] sm:$0xff]  ;;  %1243 = vmatprep.subr.bf16.mxu1 %v1311_v2  ;;  %v1504_v9 = vunpack.c.l.bf16 %v1493_v6  ;;  %v1507_v10 = vunpack.c.h.bf16 %v1493_v6  ;;  %v1510_v11 = vunpack.c.l.bf16 %v1498_v7  ;;  %v70_v14 = vld [vmem:[%s1889_s0 + $0x8] sm:$0xff]  ;;  %v72_v17 = vld [vmem:[%s1889_s0 + $0x18] sm:$0xff] }
  0x3a   :  { %1236 = vmatpush3.bf16.xpose.msra.mxu0 %v118_v5  ;;  %183 = vperm.xlu0 %1309, %v69_v8   ;;  %v1518_v13 = vunpack.c.h.bf16 %v1498_v7  ;;  %v1541_v27 = vshrl.u32 %v83_v1, 7  ;;  %v1154_v29 = vld [vmem:[#allocation2] ss:$0 sm:$0xff] }
  0x3b   :  { %1300 = vmatprep.subr.msk.bf16.mxu0 %vm110_vm0, %v1312_v4  ;;  %vm85_vm1 = vcmp.eq.s32.totalorder %v1483_v3, 6  ;;  %189 = vperm.xlu1 %1310, %v71_v12   ;;  %v90_v15 = vmul.f32 -2.0, %v1504_v9  ;;  %v91_v16 = vmul.f32 -2.0, %v1507_v10  ;;  %v92_v20 = vmul.f32 -2.0, %v1510_v11 }
  0x3c   :  { %1244 = vmatpush3.bf16.msra.mxu1 %v1311_v2  ;;  %v93_v21 = vmul.f32 -2.0, %v1518_v13  ;;  %v175_v31 = vadd.s32 16, %v1541_v27  ;;  %vm202_vm3 = vcmp.ne.s32.totalorder %v1541_v27, %v1483_v3  ;;  %v174_v32 = vadd.s32 8, %v1541_v27 }
  0x3d   :  { %1245 = vmatprep.subr.bf16.mxu1 %v1312_v4  ;;  %v94_v18 = vsel %vm85_vm1, 1.0, %v90_v15  ;;  %v95_v19 = vsel %vm85_vm1, 1.0, %v91_v16  ;;  %v96_v24 = vsel %vm85_vm1, 1.0, %v92_v20  ;;  %v176_v34 = vadd.s32 24, %v1541_v27 }
  0x3e   :  { %186 = vperm.xlu0 %1309, %v70_v14   ;;  %v98_v23 = vpack.c.bf16 %v95_v19, %v94_v18  ;;  %v97_v25 = vsel %vm85_vm1, 1.0, %v93_v21  ;;  %vm204_vm5 = vcmp.ne.s32.totalorder %v175_v31, %v1483_v3  ;;  %vm203_vm8 = vcmp.ne.s32.totalorder %v174_v32, %v1483_v3 }
  0x3f   :  { %192 = vperm.xlu1 %1310, %v72_v17   ;;  %v99_v26 = vpack.c.bf16 %v97_v25, %v96_v24  ;;  %vm205_vm12 = vcmp.ne.s32.totalorder %v176_v34, %v1483_v3 }
  0x40   :  { %1246 = vmatpush3.bf16.msra.mxu1 %v1312_v4  ;;  %1239 = vmatprep.mubr.msk.bf16.mxu0 %vm110_vm0, %v98_v23 }
  0x42   :  { %1238 = vmatpush3.bf16.xpose.msra.mxu0 %v121_v22 }
  0x49   :  { %1240 = vmatmul.mubr.msk.bf16.vlgmr.msra.gmra.mrb[0].mxu0 %vm110_vm0, %v99_v26 }
  0x4a   :  { %1261 = vmatprep.mubr.msk.bf16.mxu0 %vm110_vm0, %v1493_v6 }
  0xb9   :  { %v184_v28 = vpop.permute.xlu0 %183 }
  0xba   :  { %v190_v30 = vpop.permute.xlu1 %189  ;;  %vm198_vm2 = vcmp.eq.s32.totalorder %v184_v28, %v1154_v29 }
  0xbb   :  { %vm200_vm4 = vcmp.eq.s32.totalorder %v190_v30, %v1154_v29  ;;  %vm206_vm6 = vmand %vm198_vm2, %vm202_vm3 }
  0xbc   :  { %vm208_vm10 = vmand %vm200_vm4, %vm204_vm5 }
  0xbd   :  { %v187_v33 = vpop.permute.xlu0 %186 }
  0xbe   :  { %v193_v35 = vpop.permute.xlu1 %192  ;;  %vm199_vm7 = vcmp.eq.s32.totalorder %v187_v33, %v1154_v29 }
  0xbf   :  { %vm201_vm11 = vcmp.eq.s32.totalorder %v193_v35, %v1154_v29  ;;  %vm207_vm13 = vmand %vm199_vm7, %vm203_vm8 }
  0xc0   :  { %vm209_vm14 = vmand %vm201_vm11, %vm205_vm12 }
 0x11c   :  { %v1241_v36 = vpop.f32.mrb[0].mxu0 }
 0x11d   :  { %v157_v37 = vpop.f32.mrb[1].mxu0  ;;  %v1555_v42 = vsel %vm208_vm10, %v1241_v36, 1e+30 }
 0x11e   :  { %v1550_v38 = vsel %vm206_vm6, %v157_v37, 1e+30  ;;  %v1242_v39 = vpop.f32.mrb[2].mxu0  ;;  %v221_v45 = vsel %vm214_vm9, %v1555_v42, inf }
 0x11f   :  { %v160_v40 = vpop.f32.mrb[3].mxu0  ;;  %v215_v41 = vsel %vm214_vm9, %v1550_v38, inf  ;;  %v1563_v46 = vsel %vm209_vm14, %v1242_v39, 1e+30 }
 0x120   :  { %v1557_v43 = vsel %vm207_vm13, %v160_v40, 1e+30  ;;  %216 = vmin.xlane.f32.xlu0 %v215_v41  ;;  %v224_v47 = vsel %vm214_vm9, %v1563_v46, inf }
 0x121   :  { %v218_v44 = vsel %vm214_vm9, %v1557_v43, inf }
 0x122   :  { %219 = vmin.xlane.f32.xlu1 %v218_v44 }
 0x124   :  { %222 = vmin.xlane.f32.xlu0 %v221_v45 }
 0x128   :  { %225 = vmin.xlane.f32.xlu0 %v224_v47 }
 0x1ad   :  { %v1567_v48 = vpop.xlane.xlu0 %216 }
 0x1ae   :  { %vm231_vm15 = vcmp.le.f32.partialorder %v1550_v38, %v1567_v48  ;;  %vm227_vm8 = vcmp.lt.f32.partialorder %v1567_v48, 1e+30 }
 0x1af   :  { %v235_v49 = vsel %vm231_vm15, %v1483_v3, 32  ;;  %v1572_v50 = vpop.xlane.xlu1 %219 }
 0x1b0   :  { %vm232_vm1 = vcmp.le.f32.partialorder %v1557_v43, %v1572_v50  ;;  %v239_v51 = vsel %vm214_vm9, %v235_v49, 2147483647  ;;  %vm228_vm12 = vcmp.lt.f32.partialorder %v1572_v50, 1e+30 }
 0x1b1   :  { %v236_v52 = vsel %vm232_vm1, %v1483_v3, 32  ;;  %v1578_v53 = vpop.xlane.xlu0 %222  ;;  %v241_v54 = vshra.s32 %v239_v51, 16  ;;  %v240_v5 = vand.u32 65535, %v239_v51 }
 0x1b2   :  { %vm233_vm2 = vcmp.le.f32.partialorder %v1555_v42, %v1578_v53  ;;  %v254_v55 = vsel %vm214_vm9, %v236_v52, 2147483647  ;;  %vm229_vm14 = vcmp.lt.f32.partialorder %v1578_v53, 1e+30 }
 0x1b3   :  { %v237_v56 = vsel %vm233_vm2, %v1483_v3, 32  ;;  %v243_v57 = vcvt.s32.f32 %v241_v54  ;;  %v256_v58 = vshra.s32 %v254_v55, 16  ;;  %v255_v8 = vand.u32 65535, %v254_v55 }
 0x1b4   :  { %v269_v59 = vsel %vm214_vm9, %v237_v56, 2147483647  ;;  %v242_v14 = vcvt.s32.f32 %v240_v5  ;;  %v1395_v55 = vmov 0.0   ;;  %v654_v5 = vld [vmem:[%s1892_s3] sm:$0xf] }
 0x1b5   :  { %v1585_v60 = vpop.xlane.xlu0 %225  ;;  %244 = vmin.xlane.f32.xlu1 %v243_v57  ;;  %v258_v61 = vcvt.s32.f32 %v256_v58  ;;  %v271_v62 = vshra.s32 %v269_v59, 16  ;;  %v270_v15 = vand.u32 65535, %v269_v59  ;;  %v257_v18 = vcvt.s32.f32 %v255_v8 }
 0x1b6   :  { %vm234_vm3 = vcmp.le.f32.partialorder %v1563_v46, %v1585_v60  ;;  %v1396_v8 = vmov 65535  }
 0x1b7   :  { %v238_v63 = vsel %vm234_vm3, %v1483_v3, 32  ;;  %259 = vmin.xlane.f32.xlu0 %v258_v61  ;;  %v273_v0 = vcvt.s32.f32 %v271_v62  ;;  %v272_v21 = vcvt.s32.f32 %v270_v15  ;;  %vm230_vm3 = vcmp.lt.f32.partialorder %v1585_v60, 1e+30 }
 0x1b8   :  { %v284_v1 = vsel %vm214_vm9, %v238_v63, 2147483647 }
 0x1b9   :  { %274 = vmin.xlane.f32.xlu1 %v273_v0  ;;  %v286_v2 = vshra.s32 %v284_v1, 16  ;;  %v285_v22 = vand.u32 65535, %v284_v1 }
 0x1bb   :  { %v288_v4 = vcvt.s32.f32 %v286_v2  ;;  %v287_v25 = vcvt.s32.f32 %v285_v22 }
 0x1bd   :  { %289 = vmin.xlane.f32.xlu0 %v288_v4 }
 0x242   :  { %v245_v12 = vpop.xlane.xlu1 %244 }
 0x243   :  { %vm246_vm4 = vcmp.eq.f32.partialorder %v243_v57, %v245_v12  ;;  %v251_v28 = vcvt.f32.s32 %v245_v12 }
 0x244   :  { %v260_v16 = vpop.xlane.xlu0 %259  ;;  %v247_v17 = vsel %vm246_vm4, %v242_v14, inf }
 0x245   :  { %248 = vmin.xlane.f32.xlu1 %v247_v17  ;;  %vm261_vm5 = vcmp.eq.f32.partialorder %v258_v61, %v260_v16  ;;  %v266_v29 = vcvt.f32.s32 %v260_v16  ;;  %v252_v32 = vshll.u32 %v251_v28, 16 }
 0x246   :  { %v275_v19 = vpop.xlane.xlu1 %274  ;;  %v262_v20 = vsel %vm261_vm5, %v257_v18, inf }
 0x247   :  { %263 = vmin.xlane.f32.xlu0 %v262_v20  ;;  %vm276_vm6 = vcmp.eq.f32.partialorder %v273_v0, %v275_v19  ;;  %v281_v30 = vcvt.f32.s32 %v275_v19  ;;  %v267_v35 = vshll.u32 %v266_v29, 16 }
 0x248   :  { %v277_v23 = vsel %vm276_vm6, %v272_v21, inf  ;;  %vm678_vm6 = vcmask 1042432  }
 0x249   :  { %278 = vmin.xlane.f32.xlu1 %v277_v23  ;;  %v282_v39 = vshll.u32 %v281_v30, 16  ;;  %v680_v12 = vsel %vm678_vm6, 4294967295, %v1396_v8 }
 0x24a   :  { %v290_v24 = vpop.xlane.xlu0 %289 }
 0x24b   :  { %vm291_vm7 = vcmp.eq.f32.partialorder %v288_v4, %v290_v24  ;;  %v296_v40 = vcvt.f32.s32 %v290_v24 }
 0x24c   :  { %v292_v26 = vsel %vm291_vm7, %v287_v25, inf  ;;  %vm679_vm7 = vcmask 1043456  }
 0x24d   :  { %293 = vmin.xlane.f32.xlu0 %v292_v26  ;;  %v297_v51 = vshll.u32 %v296_v40, 16  ;;  %v681_v14 = vsel %vm679_vm7, %v680_v12, 0 }
 0x24e   :  { %v683_v15 = vand.u32 %v681_v14, %v654_v5 }
 0x250   :  { %1259 = vmatprep.subr.bf16.mxu0 %v683_v15 }
 0x251   :  { %1260 = vmatpush3.bf16.msra.mxu0 %v683_v15 }
 0x254   :  { %1262 = vmatmul.mubr.msk.bf16.vlgmr.msra.gmra.mrb[4].mxu0 %vm110_vm0, %v1498_v7 }
 0x2d2   :  { %v249_v31 = vpop.xlane.xlu1 %248 }
 0x2d3   :  { %v250_v33 = vcvt.f32.s32 %v249_v31 }
 0x2d4   :  { %v264_v34 = vpop.xlane.xlu0 %263 }
 0x2d5   :  { %v253_v36 = vadd.s32 %v252_v32, %v250_v33  ;;  %v265_v37 = vcvt.f32.s32 %v264_v34 }
 0x2d6   :  { %v279_v41 = vpop.xlane.xlu1 %278 }
 0x2d7   :  { %vm299_vm10 = vcmp.eq.s32.totalorder %v1483_v3, %v253_v36  ;;  %v268_v44 = vadd.s32 %v267_v35, %v265_v37  ;;  %v280_v45 = vcvt.f32.s32 %v279_v41 }
 0x2d8   :  { %vm311_vm11 = vmand %vm299_vm10, %vm227_vm8 }
 0x2d9   :  { %vm300_vm13 = vcmp.eq.s32.totalorder %v1483_v3, %v268_v44  ;;  %v283_v47 = vadd.s32 %v282_v39, %v280_v45  ;;  %v1598_v49 = vsel %vm311_vm11, 1e+30, %v1550_v38  ;;  %v1155_v56 = vsel %vm311_vm11, 1.0, %v1395_v55 }
 0x2da   :  { %v294_v52 = vpop.xlane.xlu0 %293  ;;  %v329_v54 = vsel %vm214_vm9, %v1598_v49, inf  ;;  %vm312_vm15 = vmand %vm300_vm13, %vm228_vm12 }
 0x2db   :  { %vm301_vm1 = vcmp.eq.s32.totalorder %v1483_v3, %v283_v47  ;;  %v295_v57 = vcvt.f32.s32 %v294_v52  ;;  %330 = vmin.xlane.f32.xlu1 %v329_v54  ;;  %v1608_v38 = vsel %vm312_vm15, 1e+30, %v1557_v43  ;;  %v1156_v58 = vsel %vm312_vm15, 1.0, %v1395_v55 }
 0x2dc   :  { %v332_v59 = vsel %vm214_vm9, %v1608_v38, inf  ;;  %v323_v61 = vpack.c.bf16 %v1156_v58, %v1155_v56  ;;  %vm313_vm2 = vmand %vm301_vm1, %vm229_vm14 }
 0x2dd   :  { %v298_v62 = vadd.s32 %v297_v51, %v295_v57  ;;  %333 = vmin.xlane.f32.xlu0 %v332_v59  ;;  %v1616_v63 = vsel %vm313_vm2, 1e+30, %v1555_v42  ;;  %v1157_v0 = vsel %vm313_vm2, 1.0, %v1395_v55 }
 0x2de   :  { %1247 = vmatprep.mubr.msk.bf16.mxu1 %vm214_vm9, %v323_v61  ;;  %v335_v43 = vsel %vm214_vm9, %v1616_v63, inf }
 0x2df   :  { %vm302_vm4 = vcmp.eq.s32.totalorder %v1483_v3, %v298_v62  ;;  %336 = vmin.xlane.f32.xlu1 %v335_v43 }
 0x2e0   :  { %vm314_vm5 = vmand %vm302_vm4, %vm230_vm3 }
 0x2e1   :  { %v1158_v1 = vsel %vm314_vm5, 1.0, %v1395_v55  ;;  %v1628_v42 = vsel %vm314_vm5, 1e+30, %v1563_v46  ;;  %v752_v46 = vld [vmem:[%s1893_s4] sm:$0xf] }
 0x2e2   :  { %v338_v2 = vsel %vm214_vm9, %v1628_v42, inf  ;;  %v324_v4 = vpack.c.bf16 %v1158_v1, %v1157_v0  ;;  %v772_v16 = vand.u32 %v752_v46, %v681_v14 }
 0x2e3   :  { %339 = vmin.xlane.f32.xlu0 %v338_v2 }
 0x2e4   :  { %1248 = vmatmul.mubr.msk.bf16.vlgmr.msra.gmra.mrb[0].mxu1 %vm214_vm9, %v324_v4  ;;  %1265 = vmatprep.subr.bf16.mxu0 %v772_v16 }
 0x2e5   :  { %1266 = vmatpush3.bf16.msra.mxu0 %v772_v16 }
 0x327   :  { %v1263_v15 = vpop.f32.mrb[4].mxu0 }
 0x328   :  { %v719_v46 = vpop.f32.mrb[5].mxu0 }
 0x329   :  { %v1264_v16 = vpop.f32.mrb[6].mxu0 }
 0x368   :  { %v1643_v17 = vpop.xlane.xlu1 %330 }
 0x369   :  { %vm345_vm10 = vcmp.le.f32.partialorder %v1598_v49, %v1643_v17  ;;  %vm341_vm6 = vcmp.lt.f32.partialorder %v1643_v17, 1e+30 }
 0x36a   :  { %v349_v18 = vsel %vm345_vm10, %v1483_v3, 32  ;;  %v1648_v19 = vpop.xlane.xlu0 %333 }
 0x36b   :  { %vm346_vm11 = vcmp.le.f32.partialorder %v1608_v38, %v1648_v19  ;;  %v353_v6 = vsel %vm214_vm9, %v349_v18, 2147483647  ;;  %v722_v18 = vpop.f32.mrb[7].mxu0  ;;  %vm1898_vm10 = vcmp.lt.f32.partialorder %v1648_v19, 1e+30 }
 0x36c   :  { %v350_v7 = vsel %vm346_vm11, %v1483_v3, 32  ;;  %v1654_v20 = vpop.xlane.xlu1 %336  ;;  %v355_v21 = vshra.s32 %v353_v6, 16  ;;  %v354_v54 = vand.u32 65535, %v353_v6 }
 0x36d   :  { %vm347_vm13 = vcmp.le.f32.partialorder %v1616_v63, %v1654_v20  ;;  %v368_v22 = vsel %vm214_vm9, %v350_v7, 2147483647 }
 0x36e   :  { %v351_v23 = vsel %vm347_vm13, %v1483_v3, 32  ;;  %v357_v24 = vcvt.s32.f32 %v355_v21  ;;  %v370_v25 = vshra.s32 %v368_v22, 16  ;;  %v369_v56 = vand.u32 65535, %v368_v22 }
 0x36f   :  { %v383_v26 = vsel %vm214_vm9, %v351_v23, 2147483647  ;;  %v356_v58 = vcvt.s32.f32 %v354_v54  ;;  %v1173_v23 = vld [vmem:[#allocation4] ss:$0 sm:$0xff]  ;;  %vm343_vm13 = vcmp.lt.f32.partialorder %v1654_v20, 1e+30 }
 0x370   :  { %v1661_v28 = vpop.xlane.xlu0 %339  ;;  %358 = vmin.xlane.f32.xlu1 %v357_v24  ;;  %v372_v29 = vcvt.s32.f32 %v370_v25  ;;  %v385_v30 = vshra.s32 %v383_v26, 16  ;;  %v384_v59 = vand.u32 65535, %v383_v26  ;;  %v371_v43 = vcvt.s32.f32 %v369_v56 }
 0x371   :  { %vm348_vm15 = vcmp.le.f32.partialorder %v1628_v42, %v1661_v28 }
 0x372   :  { %v352_v31 = vsel %vm348_vm15, %v1483_v3, 32  ;;  %373 = vmin.xlane.f32.xlu0 %v372_v29  ;;  %v387_v32 = vcvt.s32.f32 %v385_v30  ;;  %v386_v2 = vcvt.s32.f32 %v384_v59 }
 0x373   :  { %v398_v33 = vsel %vm214_vm9, %v352_v31, 2147483647  ;;  %v1673_v31 = vadd.f32 %v1263_v15, %v1173_v23 }
 0x374   :  { %388 = vmin.xlane.f32.xlu1 %v387_v32  ;;  %v400_v34 = vshra.s32 %v398_v33, 16  ;;  %v399_v4 = vand.u32 65535, %v398_v33 }
 0x376   :  { %v402_v35 = vcvt.s32.f32 %v400_v34  ;;  %v401_v12 = vcvt.s32.f32 %v399_v4 }
 0x378   :  { %403 = vmin.xlane.f32.xlu0 %v402_v35 }
 0x3b7   :  { %v1249_v36 = vpop.f32.mrb[0].mxu1 }
 0x3b8   :  { %v607_v37 = vpop.f32.mrb[1].mxu1  ;;  %v736_v40 = vsub.f32 %v1249_v36, %v1510_v11 }
 0x3b9   :  { %v1250_v39 = vpop.f32.mrb[2].mxu1  ;;  %v734_v45 = vsub.f32 %v607_v37, %v1504_v9 }
 0x3ba   :  { %v737_v41 = vsub.f32 %v1250_v39, %v1518_v13  ;;  %v610_v44 = vpop.f32.mrb[3].mxu1  ;;  %v1678_v39 = vadd.f32 %v1264_v16, %v1173_v23 }
 0x3bb   :  { %v735_v47 = vsub.f32 %v610_v44, %v1507_v10 }
 0x3bc   :  { %v747_v51 = vpack.c.bf16 %v737_v41, %v736_v40  ;;  %v1682_v41 = vadd.f32 %v1173_v23, %v722_v18 }
 0x3bd   :  { %v746_v52 = vpack.c.bf16 %v735_v47, %v734_v45 }
 0x3bf   :  { %1267 = vmatprep.mubr.msk.bf16.mxu0 %vm110_vm0, %v746_v52 }
 0x3c0   :  { %1268 = vmatmul.mubr.msk.bf16.vlgmr.msra.gmra.mrb[8].mxu0 %vm110_vm0, %v747_v51 }
 0x3fd   :  { %v359_v57 = vpop.xlane.xlu1 %358 }
 0x3fe   :  { %vm360_vm1 = vcmp.eq.f32.partialorder %v357_v24, %v359_v57  ;;  %v365_v6 = vcvt.f32.s32 %v359_v57 }
 0x3ff   :  { %v374_v61 = vpop.xlane.xlu0 %373  ;;  %v361_v62 = vsel %vm360_vm1, %v356_v58, inf }
 0x400   :  { %362 = vmin.xlane.f32.xlu1 %v361_v62  ;;  %vm375_vm2 = vcmp.eq.f32.partialorder %v372_v29, %v374_v61  ;;  %v380_v7 = vcvt.f32.s32 %v374_v61  ;;  %v366_v24 = vshll.u32 %v365_v6, 16 }
 0x401   :  { %v389_v0 = vpop.xlane.xlu1 %388  ;;  %v376_v1 = vsel %vm375_vm2, %v371_v43, inf }
 0x402   :  { %377 = vmin.xlane.f32.xlu0 %v376_v1  ;;  %vm390_vm4 = vcmp.eq.f32.partialorder %v387_v32, %v389_v0  ;;  %v395_v21 = vcvt.f32.s32 %v389_v0  ;;  %v381_v29 = vshll.u32 %v380_v7, 16 }
 0x403   :  { %v391_v5 = vsel %vm390_vm4, %v386_v2, inf }
 0x404   :  { %392 = vmin.xlane.f32.xlu1 %v391_v5  ;;  %v396_v33 = vshll.u32 %v395_v21, 16 }
 0x405   :  { %v404_v8 = vpop.xlane.xlu0 %403 }
 0x406   :  { %vm405_vm5 = vcmp.eq.f32.partialorder %v402_v35, %v404_v8  ;;  %v410_v34 = vcvt.f32.s32 %v404_v8  ;;  %v1676_v35 = vadd.f32 %v1173_v23, %v719_v46 }
 0x407   :  { %v406_v14 = vsel %vm405_vm5, %v401_v12, inf  ;;  %vm344_vm5 = vcmp.lt.f32.partialorder %v1661_v28, 1e+30 }
 0x408   :  { %407 = vmin.xlane.f32.xlu0 %v406_v14  ;;  %v411_v56 = vshll.u32 %v410_v34, 16 }
 0x48d   :  { %v363_v22 = vpop.xlane.xlu1 %362 }
 0x48e   :  { %v364_v25 = vcvt.f32.s32 %v363_v22 }
 0x48f   :  { %v378_v26 = vpop.xlane.xlu0 %377 }
 0x490   :  { %v367_v30 = vadd.s32 %v366_v24, %v364_v25  ;;  %v379_v32 = vcvt.f32.s32 %v378_v26 }
 0x491   :  { %v393_v36 = vpop.xlane.xlu1 %392 }
 0x492   :  { %v382_v37 = vadd.s32 %v381_v29, %v379_v32  ;;  %v394_v40 = vcvt.f32.s32 %v393_v36  ;;  %vm413_vm7 = vcmp.eq.s32.totalorder %v1483_v3, %v367_v30 }
 0x493   :  { %v1269_v44 = vpop.f32.mrb[8].mxu0  ;;  %vm1686_vm11 = vmand %vm413_vm7, %vm341_vm6 }
 0x494   :  { %v397_v47 = vadd.s32 %v396_v33, %v394_v40  ;;  %v857_v51 = vadd.f32 %v1269_v44, %v1673_v31  ;;  %v808_v52 = vpop.f32.mrb[9].mxu0  ;;  %v439_v54 = vsel %vm1686_vm11, 1e+30, %v1598_v49  ;;  %vm414_vm15 = vcmp.eq.s32.totalorder %v1483_v3, %v382_v37 }
 0x495   :  { %v855_v57 = vadd.f32 %v808_v52, %v1676_v35  ;;  %v408_v58 = vpop.xlane.xlu0 %407  ;;  %v1270_v59 = vpop.f32.mrb[10].mxu0  ;;  %v443_v61 = vsel %vm214_vm9, %v439_v54, inf  ;;  %v1159_v1 = vsel %vm1686_vm11, 1.0, %v1395_v55  ;;  %vm426_vm1 = vmand %vm414_vm15, %vm1898_vm10 }
 0x496   :  { %v409_v62 = vcvt.f32.s32 %v408_v58  ;;  %v858_v43 = vadd.f32 %v1270_v59, %v1678_v39  ;;  %v811_v0 = vpop.f32.mrb[11].mxu0  ;;  %444 = vmin.xlane.f32.xlu1 %v443_v61  ;;  %vm415_vm2 = vcmp.eq.s32.totalorder %v1483_v3, %v397_v47  ;;  %v869_v49 = vmax.f32 %v857_v51, 0.0 }
 0x497   :  { %v856_v2 = vadd.f32 %v811_v0, %v1682_v41  ;;  %v440_v4 = vsel %vm426_vm1, 1e+30, %v1608_v38  ;;  %v1160_v5 = vsel %vm426_vm1, 1.0, %v1395_v55  ;;  %vm1710_vm4 = vmand %vm415_vm2, %vm343_vm13  ;;  %v867_v16 = vmax.f32 %v855_v57, 0.0 }
 0x498   :  { %v412_v12 = vadd.s32 %v411_v56, %v409_v62  ;;  %v870_v14 = vmax.f32 %v858_v43, 0.0  ;;  %v446_v15 = vsel %vm214_vm9, %v440_v4, inf  ;;  %v437_v46 = vpack.c.bf16 %v1160_v5, %v1159_v1 }
 0x499   :  { %v868_v18 = vmax.f32 %v856_v2, 0.0  ;;  %447 = vmin.xlane.f32.xlu0 %v446_v15  ;;  %v441_v38 = vsel %vm1710_vm4, 1e+30, %v1616_v63  ;;  %v1161_v63 = vsel %vm1710_vm4, 1.0, %v1395_v55 }
 0x49a   :  { %v1719_v6 = vpack.c.bf16 %v870_v14, %v869_v49  ;;  %1251 = vmatprep.mubr.msk.bf16.mxu1 %vm214_vm9, %v437_v46  ;;  %v449_v7 = vsel %vm214_vm9, %v441_v38, inf  ;;  %vm416_vm7 = vcmp.eq.s32.totalorder %v1483_v3, %v412_v12 }
 0x49b   :  { %v1724_v21 = vpack.c.bf16 %v868_v18, %v867_v16  ;;  %450 = vmin.xlane.f32.xlu1 %v449_v7  ;;  %vm428_vm11 = vmand %vm416_vm7, %vm344_vm5 }
 0x49c   :  { %v442_v22 = vsel %vm428_vm11, 1e+30, %v1628_v42  ;;  %v1162_v23 = vsel %vm428_vm11, 1.0, %v1395_v55 }
 0x49d   :  { %v452_v24 = vsel %vm214_vm9, %v442_v22, inf  ;;  %v438_v25 = vpack.c.bf16 %v1162_v23, %v1161_v63 }
 0x49e   :  { %453 = vmin.xlane.f32.xlu0 %v452_v24 }
 0x49f   :  { %1252 = vmatmul.mubr.msk.bf16.gmra.mrb[4].mxu1 %vm214_vm9, %v438_v25 }
 0x523   :  { %v1735_v26 = vpop.xlane.xlu1 %444 }
 0x524   :  { %vm459_vm15 = vcmp.le.f32.partialorder %v439_v54, %v1735_v26 }
 0x525   :  { %v463_v29 = vsel %vm459_vm15, %v1483_v3, 32 }
 0x526   :  { %v1739_v30 = vpop.xlane.xlu0 %447  ;;  %v467_v32 = vsel %vm214_vm9, %v463_v29, 2147483647 }
 0x527   :  { %vm460_vm1 = vcmp.le.f32.partialorder %v440_v4, %v1739_v30  ;;  %v469_v42 = vshra.s32 %v467_v32, 16  ;;  %v468_v12 = vand.u32 65535, %v467_v32 }
 0x528   :  { %v464_v33 = vsel %vm460_vm1, %v1483_v3, 32  ;;  %v1744_v34 = vpop.xlane.xlu1 %450 }
 0x529   :  { %vm461_vm2 = vcmp.le.f32.partialorder %v441_v38, %v1744_v34  ;;  %v471_v36 = vcvt.s32.f32 %v469_v42  ;;  %v482_v37 = vsel %vm214_vm9, %v464_v33, 2147483647  ;;  %v470_v46 = vcvt.s32.f32 %v468_v12  ;;  %v1315_v33 = vld [vmem:[%s1895_s6] sm:$0xff]  }
 0x52a   :  { %v465_v40 = vsel %vm461_vm2, %v1483_v3, 32  ;;  %v484_v44 = vshra.s32 %v482_v37, 16  ;;  %v483_v14 = vand.u32 65535, %v482_v37  ;;  %1279 = vmatprep.subr.bf16.mxu1 %v1315_v33  ;;  %v1317_v37 = vld [vmem:[%s1895_s6 + $0x10] sm:$0xff]  }
 0x52b   :  { %v1749_v45 = vpop.xlane.xlu0 %453  ;;  %472 = vmin.xlane.f32.xlu1 %v471_v36  ;;  %v497_v47 = vsel %vm214_vm9, %v465_v40, 2147483647  ;;  %1280 = vmatpush3.bf16.msra.mxu1 %v1315_v33  ;;  %v1318_v40 = vld [vmem:[%s1895_s6 + $0x18] sm:$0xff]  }
 0x52c   :  { %vm462_vm4 = vcmp.le.f32.partialorder %v442_v22, %v1749_v45  ;;  %v486_v51 = vcvt.s32.f32 %v484_v44  ;;  %v499_v52 = vshra.s32 %v497_v47, 16  ;;  %v498_v16 = vand.u32 65535, %v497_v47 }
 0x52d   :  { %v466_v54 = vsel %vm462_vm4, %v1483_v3, 32  ;;  %v485_v7 = vcvt.s32.f32 %v483_v14  ;;  %vm1899_vm4 = vcmp.lt.f32.partialorder %v1735_v26, 1e+30 }
 0x52e   :  { %487 = vmin.xlane.f32.xlu0 %v486_v51  ;;  %v501_v56 = vcvt.s32.f32 %v499_v52  ;;  %v512_v57 = vsel %vm214_vm9, %v466_v54, 2147483647  ;;  %v500_v24 = vcvt.s32.f32 %v498_v16 }
 0x52f   :  { %v514_v58 = vshra.s32 %v512_v57, 16  ;;  %v513_v63 = vand.u32 65535, %v512_v57 }
 0x530   :  { %502 = vmin.xlane.f32.xlu1 %v501_v56 }
 0x531   :  { %v516_v59 = vcvt.s32.f32 %v514_v58  ;;  %v515_v32 = vcvt.s32.f32 %v513_v63 }
 0x533   :  { %517 = vmin.xlane.f32.xlu0 %v516_v59 }
 0x572   :  { %v1253_v61 = vpop.f32.mrb[4].mxu1 }
 0x573   :  { %v623_v62 = vpop.f32.mrb[5].mxu1  ;;  %v740_v0 = vsub.f32 %v1253_v61, %v1510_v11 }
 0x574   :  { %v1254_v43 = vpop.f32.mrb[6].mxu1  ;;  %v738_v2 = vsub.f32 %v623_v62, %v1504_v9 }
 0x575   :  { %v741_v1 = vsub.f32 %v1254_v43, %v1518_v13  ;;  %v626_v49 = vpop.f32.mrb[7].mxu1 }
 0x576   :  { %v739_v4 = vsub.f32 %v626_v49, %v1507_v10 }
 0x577   :  { %v749_v5 = vpack.c.bf16 %v741_v1, %v740_v0 }
 0x578   :  { %v748_v8 = vpack.c.bf16 %v739_v4, %v738_v2 }
 0x57a   :  { %1271 = vmatprep.mubr.msk.bf16.mxu0 %vm110_vm0, %v748_v8 }
 0x57b   :  { %1272 = vmatmul.mubr.msk.bf16.gmra.mrb[12].mxu0 %vm110_vm0, %v749_v5 }
 0x5b8   :  { %v473_v15 = vpop.xlane.xlu1 %472 }
 0x5b9   :  { %vm474_vm7 = vcmp.eq.f32.partialorder %v471_v36, %v473_v15  ;;  %v1316_v36 = vld [vmem:[%s1895_s6 + $0x8] sm:$0xff]   ;;  %v479_v44 = vcvt.f32.s32 %v473_v15 }
 0x5ba   :  { %v475_v18 = vsel %vm474_vm7, %v470_v46, inf  ;;  %1281 = vmatprep.subr.bf16.mxu1 %v1316_v36 }
 0x5bb   :  { %v488_v38 = vpop.xlane.xlu0 %487  ;;  %476 = vmin.xlane.f32.xlu1 %v475_v18  ;;  %1282 = vmatpush3.bf16.msra.mxu1 %v1316_v36  ;;  %v480_v52 = vshll.u32 %v479_v44, 16 }
 0x5bc   :  { %vm489_vm11 = vcmp.eq.f32.partialorder %v486_v51, %v488_v38  ;;  %1283 = vmatprep.subr.bf16.mxu1 %v1317_v37  ;;  %v494_v47 = vcvt.f32.s32 %v488_v38 }
 0x5bd   :  { %v503_v22 = vpop.xlane.xlu1 %502  ;;  %v490_v23 = vsel %vm489_vm11, %v485_v7, inf  ;;  %vm1900_vm11 = vcmp.lt.f32.partialorder %v1739_v30, 1e+30 }
 0x5be   :  { %491 = vmin.xlane.f32.xlu0 %v490_v23  ;;  %vm504_vm15 = vcmp.eq.f32.partialorder %v501_v56, %v503_v22  ;;  %v509_v56 = vcvt.f32.s32 %v503_v22 }
 0x5bf   :  { %v505_v25 = vsel %vm504_vm15, %v500_v24, inf  ;;  %1284 = vmatpush3.bf16.msra.mxu1 %v1317_v37 }
 0x5c0   :  { %506 = vmin.xlane.f32.xlu1 %v505_v25  ;;  %v518_v29 = vpop.xlane.xlu0 %517  ;;  %1285 = vmatprep.subr.bf16.mxu1 %v1318_v40  ;;  %v510_v0 = vshll.u32 %v509_v56, 16 }
 0x5c1   :  { %vm519_vm1 = vcmp.eq.f32.partialorder %v516_v59, %v518_v29  ;;  %v495_v59 = vshll.u32 %v494_v47, 16  ;;  %v524_v62 = vcvt.f32.s32 %v518_v29 }
 0x5c2   :  { %v520_v42 = vsel %vm519_vm1, %v515_v32, inf  ;;  %vm457_vm1 = vcmp.lt.f32.partialorder %v1744_v34, 1e+30 }
 0x5c3   :  { %521 = vmin.xlane.f32.xlu0 %v520_v42  ;;  %1286 = vmatpush3.bf16.msra.mxu1 %v1318_v40  ;;  %v525_v46 = vshll.u32 %v524_v62, 16 }
 0x648   :  { %v477_v51 = vpop.xlane.xlu1 %476 }
 0x649   :  { %v478_v54 = vcvt.f32.s32 %v477_v51 }
 0x64b   :  { %v481_v57 = vadd.s32 %v480_v52, %v478_v54  ;;  %v492_v58 = vpop.xlane.xlu0 %491 }
 0x64c   :  { %v493_v61 = vcvt.f32.s32 %v492_v58 }
 0x64d   :  { %vm527_vm2 = vcmp.eq.s32.totalorder %v1483_v3, %v481_v57  ;;  %v507_v43 = vpop.xlane.xlu1 %506 }
 0x64e   :  { %v496_v1 = vadd.s32 %v495_v59, %v493_v61  ;;  %v508_v49 = vcvt.f32.s32 %v507_v43  ;;  %v1273_v2 = vpop.f32.mrb[12].mxu0  ;;  %vm539_vm7 = vmand %vm527_vm2, %vm1899_vm4  ;;  %v1809_v59 = vld [vmem:[#allocation6] ss:$0 sm:$0xff] }
 0x64f   :  { %v861_v4 = vadd.f32 %v1273_v2, %v1673_v31  ;;  %v824_v5 = vpop.f32.mrb[13].mxu0  ;;  %v1163_v7 = vsel %vm539_vm7, 1.0, %v1395_v55  ;;  %vm924_vm7 = vcmask 523264  }
 0x650   :  { %vm528_vm15 = vcmp.eq.s32.totalorder %v1483_v3, %v496_v1  ;;  %v511_v8 = vadd.s32 %v510_v0, %v508_v49  ;;  %v859_v12 = vadd.f32 %v824_v5, %v1676_v35  ;;  %v522_v14 = vpop.xlane.xlu0 %521  ;;  %v1274_v15 = vpop.f32.mrb[14].mxu0 }
 0x651   :  { %vm540_vm10 = vmand %vm528_vm15, %vm1900_vm11  ;;  %v523_v16 = vcvt.f32.s32 %v522_v14  ;;  %v862_v18 = vadd.f32 %v1274_v15, %v1678_v39  ;;  %v827_v38 = vpop.f32.mrb[15].mxu0  ;;  %v873_v23 = vmax.f32 %v861_v4, 0.0  ;;  %vm458_vm15 = vcmp.lt.f32.partialorder %v1749_v45, 1e+30 }
 0x652   :  { %v1164_v63 = vsel %vm540_vm10, 1.0, %v1395_v55  ;;  %vm529_vm2 = vcmp.eq.s32.totalorder %v1483_v3, %v511_v8  ;;  %v860_v22 = vadd.f32 %v827_v38, %v1682_v41  ;;  %v871_v32 = vmax.f32 %v859_v12, 0.0 }
 0x653   :  { %v526_v24 = vadd.s32 %v525_v46, %v523_v16  ;;  %v874_v25 = vmax.f32 %v862_v18, 0.0  ;;  %v551_v29 = vpack.c.bf16 %v1164_v63, %v1163_v7  ;;  %vm541_vm4 = vmand %vm529_vm2, %vm457_vm1 }
 0x654   :  { %v872_v42 = vmax.f32 %v860_v22, 0.0  ;;  %v1165_v37 = vsel %vm541_vm4, 1.0, %v1395_v55 }
 0x655   :  { %vm530_vm11 = vcmp.eq.s32.totalorder %v1483_v3, %v526_v24  ;;  %v882_v33 = vpack.c.bf16 %v874_v25, %v873_v23  ;;  %1255 = vmatprep.mubr.msk.bf16.mxu1 %vm214_vm9, %v551_v29 }
 0x656   :  { %vm542_vm10 = vmand %vm530_vm11, %vm458_vm15  ;;  %v881_v36 = vpack.c.bf16 %v872_v42, %v871_v32 }
 0x657   :  { %v1166_v40 = vsel %vm542_vm10, 1.0, %v1395_v55 }
 0x658   :  { %v552_v44 = vpack.c.bf16 %v1166_v40, %v1165_v37 }
 0x65a   :  { %1256 = vmatmul.mubr.msk.bf16.gmra.mrb[8].mxu1 %vm214_vm9, %v552_v44  ;;  %vm1906_vm9 = vcmp.lt.f32.partialorder %v1735_v26, 1e+30 }
 0x65b   :  { %1287 = vmatprep.mubr.msk.bf16.mxu1 %vm924_vm7, %v1724_v21 }
 0x662   :  { %1288 = vmatmul.mubr.msk.bf16.vlgmr.msra.gmra.mrb[12].mxu1 %vm924_vm7, %v1719_v6 }
 0x663   :  { %1291 = vmatprep.mubr.msk.bf16.mxu1 %vm924_vm7, %v881_v36 }
 0x66a   :  { %1292 = vmatmul.mubr.msk.bf16.gmra.mrb[16].mxu1 %vm924_vm7, %v882_v33 }
 0x72d   :  { %v1257_v3 = vpop.f32.mrb[8].mxu1 }
 0x72e   :  { %v639_v47 = vpop.f32.mrb[9].mxu1  ;;  %v744_v52 = vsub.f32 %v1257_v3, %v1510_v11 }
 0x72f   :  { %v1258_v51 = vpop.f32.mrb[10].mxu1  ;;  %v742_v56 = vsub.f32 %v639_v47, %v1504_v9 }
 0x730   :  { %v745_v55 = vsub.f32 %v1258_v51, %v1518_v13  ;;  %v642_v54 = vpop.f32.mrb[11].mxu1 }
 0x731   :  { %v743_v57 = vsub.f32 %v642_v54, %v1507_v10 }
 0x732   :  { %v751_v21 = vpack.c.bf16 %v745_v55, %v744_v52 }
 0x733   :  { %v750_v58 = vpack.c.bf16 %v743_v57, %v742_v56 }
 0x735   :  { %1275 = vmatprep.mubr.msk.bf16.mxu0 %vm110_vm0, %v750_v58  ;;  %v1289_v6 = vpop.f32.mrb[12].mxu1 }
 0x736   :  { %v986_v61 = vadd.f32 %v1289_v6, %v1809_v59  ;;  %1276 = vmatmul.mubr.msk.bf16.gmra.mrb[16].mxu0 %vm110_vm0, %v751_v21  ;;  %v977_v62 = vpop.f32.mrb[13].mxu1  ;;  %vm1905_vm0 = vcmp.lt.f32.partialorder %v1648_v19, 1e+30 }
 0x737   :  { %v978_v11 = vadd.f32 %v1809_v59, %v977_v62  ;;  %v1290_v13 = vpop.f32.mrb[14].mxu1 }
 0x738   :  { %v989_v43 = vadd.f32 %v1290_v13, %v1809_v59  ;;  %v980_v9 = vpop.f32.mrb[15].mxu1  ;;  %v1026_v0 = vmax.f32 %v986_v61, 0.0 }
 0x739   :  { %v981_v10 = vadd.f32 %v1809_v59, %v980_v9  ;;  %v1024_v1 = vmax.f32 %v978_v11, 0.0 }
 0x73a   :  { %v1027_v49 = vmax.f32 %v989_v43, 0.0  ;;  %v1038_v5 = vsel %vm229_vm14, %v1026_v0, 0.0  ;;  %vm1137_vm14 = vcmask 527872  }
 0x73b   :  { %v1025_v2 = vmax.f32 %v981_v10, 0.0  ;;  %v1036_v14 = vsel %vm227_vm8, %v1024_v1, 0.0  ;;  %v1042_v63 = vmax.f32 %v1038_v5, 0.0  ;;  %vm1907_vm8 = vcmp.lt.f32.partialorder %v1739_v30, 1e+30 }
 0x73c   :  { %v1039_v16 = vsel %vm230_vm3, %v1027_v49, 0.0  ;;  %v1040_v24 = vmax.f32 %v1036_v14, 0.0 }
 0x73d   :  { %v1293_v4 = vpop.f32.mrb[16].mxu1  ;;  %v1037_v53 = vsel %vm228_vm12, %v1025_v2, 0.0  ;;  %v1043_v29 = vmax.f32 %v1039_v16, 0.0  ;;  %vm1080_vm12 = vcmask 519168  }
 0x73e   :  { %v1002_v8 = vadd.f32 %v1293_v4, %v1809_v59  ;;  %v993_v12 = vpop.f32.mrb[17].mxu1  ;;  %v1041_v33 = vmax.f32 %v1037_v53, 0.0 }
 0x73f   :  { %v994_v15 = vadd.f32 %v1809_v59, %v993_v12  ;;  %v1294_v46 = vpop.f32.mrb[18].mxu1 }
 0x740   :  { %v1030_v18 = vmax.f32 %v1002_v8, 0.0  ;;  %v1005_v38 = vadd.f32 %v1294_v46, %v1809_v59  ;;  %v996_v7 = vpop.f32.mrb[19].mxu1 }
 0x741   :  { %v1028_v22 = vmax.f32 %v994_v15, 0.0  ;;  %v997_v23 = vadd.f32 %v1809_v59, %v996_v7 }
 0x742   :  { %v1046_v48 = vsel %vm343_vm13, %v1030_v18, 0.0  ;;  %v1031_v25 = vmax.f32 %v1005_v38, 0.0 }
 0x743   :  { %v1050_v32 = vmax.f32 %v1042_v63, %v1046_v48  ;;  %v1044_v60 = vsel %vm341_vm6, %v1028_v22, 0.0  ;;  %v1029_v42 = vmax.f32 %v997_v23, 0.0 }
 0x744   :  { %v1048_v36 = vmax.f32 %v1040_v24, %v1044_v60  ;;  %v1047_v50 = vsel %vm344_vm5, %v1031_v25, 0.0  ;;  %v1397_v24 = vmov 839922192   ;;  %v1398_v25 = vmov 1985246804  }
 0x745   :  { %v1051_v37 = vmax.f32 %v1043_v29, %v1047_v50  ;;  %v1045_v40 = vsel %vm1905_vm0, %v1029_v42, 0.0  ;;  %v1106_v48 = vunpack.c.l.s4 %v1397_v24  ;;  %v1113_v29 = vunpack.c.l.s4 %v1398_v25 }
 0x746   :  { %v1049_v44 = vmax.f32 %v1041_v33, %v1045_v40 }
 0x747   :  { %v1114_v60 = vunpack.c.0.s8 %v1113_v29 }
 0x809   :  { %v1277_v3 = vpop.f32.mrb[16].mxu0 }
 0x80a   :  { %v865_v20 = vadd.f32 %v1277_v3, %v1673_v31  ;;  %v840_v47 = vpop.f32.mrb[17].mxu0 }
 0x80b   :  { %v863_v51 = vadd.f32 %v840_v47, %v1676_v35  ;;  %v1278_v52 = vpop.f32.mrb[18].mxu0 }
 0x80c   :  { %v866_v17 = vadd.f32 %v1278_v52, %v1678_v39  ;;  %v843_v55 = vpop.f32.mrb[19].mxu0  ;;  %v877_v56 = vmax.f32 %v865_v20, 0.0 }
 0x80d   :  { %v864_v54 = vadd.f32 %v843_v55, %v1682_v41  ;;  %v875_v57 = vmax.f32 %v863_v51, 0.0 }
 0x80e   :  { %v878_v28 = vmax.f32 %v866_v17, 0.0 }
 0x80f   :  { %v876_v21 = vmax.f32 %v864_v54, 0.0 }
 0x810   :  { %v884_v58 = vpack.c.bf16 %v878_v28, %v877_v56 }
 0x811   :  { %v883_v19 = vpack.c.bf16 %v876_v21, %v875_v57 }
 0x813   :  { %1295 = vmatprep.mubr.msk.bf16.mxu1 %vm924_vm7, %v883_v19 }
 0x814   :  { %1296 = vmatmul.mubr.msk.bf16.gmra.mrb[20].mxu1 %vm924_vm7, %v884_v58 }
 0x8e7   :  { %v1297_v31 = vpop.f32.mrb[20].mxu1 }
 0x8e8   :  { %v1018_v6 = vadd.f32 %v1297_v31, %v1809_v59  ;;  %v1009_v35 = vpop.f32.mrb[21].mxu1 }
 0x8e9   :  { %v1010_v61 = vadd.f32 %v1809_v59, %v1009_v35  ;;  %v1298_v39 = vpop.f32.mrb[22].mxu1 }
 0x8ea   :  { %v1034_v62 = vmax.f32 %v1018_v6, 0.0  ;;  %v1021_v41 = vadd.f32 %v1298_v39, %v1809_v59  ;;  %v1012_v11 = vpop.f32.mrb[23].mxu1 }
 0x8eb   :  { %v1032_v13 = vmax.f32 %v1010_v61, 0.0  ;;  %v1013_v43 = vadd.f32 %v1809_v59, %v1012_v11 }
 0x8ec   :  { %v1054_v9 = vsel %vm457_vm1, %v1034_v62, 0.0  ;;  %v1035_v10 = vmax.f32 %v1021_v41, 0.0 }
 0x8ed   :  { %v1058_v0 = vmax.f32 %v1050_v32, %v1054_v9  ;;  %v1052_v1 = vsel %vm1906_vm9, %v1032_v13, 0.0  ;;  %v1033_v49 = vmax.f32 %v1013_v43, 0.0  ;;  %v1107_v32 = vunpack.c.0.s8 %v1106_v48 }
 0x8ee   :  { %v1056_v2 = vmax.f32 %v1048_v36, %v1052_v1  ;;  %v1055_v4 = vsel %vm458_vm15, %v1035_v10, 0.0  ;;  %v1117_v36 = vsub.s32 %v1114_v60, %v1541_v27 }
 0x8ef   :  { %v1059_v5 = vmax.f32 %v1051_v37, %v1055_v4  ;;  %v1053_v8 = vsel %vm1907_vm8, %v1033_v49, 0.0  ;;  %v1062_v12 = vmul.f32 0.999995, %v1058_v0  ;;  %v1110_v33 = vsub.s32 %v1107_v32, %v1541_v27 }
 0x8f0   :  { %v1057_v14 = vmax.f32 %v1049_v44, %v1053_v8  ;;  %v1060_v59 = vmul.f32 0.999995, %v1056_v2 }
 0x8f1   :  { %v1201_v34 = vpack.c.bf16 %v1062_v12, %v1062_v12  ;;  %v1063_v15 = vmul.f32 0.999995, %v1059_v5  ;;  %v1087_v7 = vmul.f32 %v1062_v12, %v1062_v12 }
 0x8f2   :  { %v1085_v46 = vmul.f32 %v1060_v59, %v1060_v59  ;;  %v1199_v16 = vpack.c.bf16 %v1060_v59, %v1060_v59  ;;  %v1061_v18 = vmul.f32 0.999995, %v1057_v14 }
 0x8f3   :  { %1083 = vst.msk [vmem:[%s1897_s8 + $0x8] sm:$0xf] %vm1080_vm12, %v1201_v34  ;;  %v1202_v26 = vpack.c.bf16 %v1063_v15, %v1063_v15  ;;  %v1088_v53 = vmul.f32 %v1063_v15, %v1063_v15  ;;  %v1095_v22 = vsel %vm924_vm7, %v1087_v7, 0.0 }
 0x8f4   :  { %v1089_v45 = vsel %vm924_vm7, %v1085_v46, 0.0  ;;  %1081 = vst.msk [vmem:[%s1897_s8] sm:$0xf] %vm1080_vm12, %v1199_v16  ;;  %v1086_v30 = vmul.f32 %v1061_v18, %v1061_v18  ;;  %v1200_v38 = vpack.c.bf16 %v1061_v18, %v1061_v18 }
 0x8f5   :  { %1090 = vadd.xlane.f32.xlu1 %v1089_v45  ;;  %1084 = vst.msk [vmem:[%s1897_s8 + $0xc] sm:$0xf] %vm1080_vm12, %v1202_v26  ;;  %v1098_v23 = vsel %vm924_vm7, %v1088_v53, 0.0 }
 0x8f6   :  { %v1092_v63 = vsel %vm924_vm7, %v1086_v30, 0.0  ;;  %1082 = vst.msk [vmem:[%s1897_s8 + $0x4] sm:$0xf] %vm1080_vm12, %v1200_v38 }
 0x8f7   :  { %1093 = vadd.xlane.f32.xlu0 %v1092_v63 }
 0x8f9   :  { %1096 = vadd.xlane.f32.xlu1 %v1095_v22 }
 0x8fb   :  { %1099 = vadd.xlane.f32.xlu0 %v1098_v23 }
 0x982   :  { %v1091_v42 = vpop.xlane.xlu1 %1090 }
 0x984   :  { %v1094_v50 = vpop.xlane.xlu0 %1093 }
 0x985   :  { %v1101_v37 = vpack.c.bf16 %v1094_v50, %v1091_v42 }
 0x986   :  { %v1097_v3 = vpop.xlane.xlu1 %1096 }
 0x987   :  { %v1111_v40 = vrot.slane %v1101_v37, %v1110_v33  ;;  %v1118_v44 = vrot.slane %v1101_v37, %v1117_v36 }
 0x988   :  { %v1100_v20 = vpop.xlane.xlu0 %1099 }
 0x989   :  { %1138 = vst.msk [vmem:[%s1897_s8] sm:$0xf] %vm1137_vm14, %v1111_v40  ;;  %1139 = vst.msk [vmem:[%s1897_s8 + $0x4] sm:$0xf] %vm1137_vm14, %v1118_v44  ;;  %v1102_v47 = vpack.c.bf16 %v1100_v20, %v1097_v3 }
 0x98b   :  { %v1125_v51 = vrot.slane %v1102_v47, %v1110_v33  ;;  %v1132_v52 = vrot.slane %v1102_v47, %v1117_v36 }
 0x98d   :  { %1140 = vst.msk [vmem:[%s1897_s8 + $0x8] sm:$0xf] %vm1137_vm14, %v1125_v51  ;;  %1141 = vst.msk [vmem:[%s1897_s8 + $0xc] sm:$0xf] %vm1137_vm14, %v1132_v52 }
 0x98e   :  { %1146 = vsyncpa [#allocation3], 1 }
 0x98f   :  { %1147 = vsyncpa [#allocation5], 1 }

// kernel: net_forward.6
= control target key start
LH: loop header
LB: loop body
LE: loop exit
PB: predicated region body
PF: predicated region fallthrough
CT: control target
= control target key end

     0   :  { %vm75_vm0 = vcmask 531456   ;;  %v48_v0 = vlaneseq  ;;  %v1393_v2 = vmov 0   ;;  %vm179_vm9 = vcmask 261120   ;;  %s1847_s2 = inlined_call_operand.vmem [shape: bf16[32,65], index: 2, kind: input, shape index: {}]   ;;  %s1848_s0 = inlined_call_operand.vmem [shape: s32[32,1], index: 0, kind: input, shape index: {}]   ;;  %s1849_s1 = inlined_call_operand.vmem [shape: s32[1,32], index: 1, kind: input, shape index: {}]   ;;  %s1850_s4 = inlined_call_operand.vmem [shape: bf16[65,64], index: 4, kind: input, shape index: {}]   ;;  %s1851_s3 = inlined_call_operand.vmem [shape: bf16[65,64], index: 3, kind: input, shape index: {}]   ;;  %s1852_s6 = inlined_call_operand.vmem [shape: bf16[64,64], index: 6, kind: input, shape index: {}]   ;;  %s1853_s5 = inlined_call_operand.vmem [shape: f32[1,64], index: 5, kind: input, shape index: {}]   ;;  %s1854_s7 = inlined_call_operand.vmem [shape: f32[1,64], index: 7, kind: input, shape index: {}]   ;;  %s1855_s8 = inlined_call_operand.vmem [shape: bf16[32,65], index: 8, kind: output, shape index: {}]  }
   0x1   :  { %v1373_v1 = vld [vmem:[%s1847_s2] sm:$0xff]   ;;  %1371 = vset.pattern.permute.xlu0 %v1393_v2  ;;  %1372 = vset.pattern.permute.xlu1 %v1393_v2  ;;  %v1374_v3 = vld [vmem:[%s1847_s2 + $0x8] sm:$0xff]   ;;  %v36_v11 = vld [vmem:[%s1848_s0 + $0x10] sm:$0xff] }
   0x2   :  { %v1450_v4 = vand.u32 127, %v48_v0  ;;  %1365 = vmatprep.subr.msk.bf16.mxu0 %vm75_vm0, %v1373_v1  ;;  %v83_v5 = vsel %vm75_vm0, %v1373_v1, 0  ;;  %v1457_v6 = vld [vmem:[%s1847_s2] sm:$0xff]   ;;  %v1462_v7 = vld [vmem:[%s1847_s2 + $0x8] sm:$0xff]   ;;  %1293 = vmatprep.subr.bf16.mxu1 %v1373_v1  ;;  %v37_v17 = vld [vmem:[%s1848_s0 + $0x18] sm:$0xff]  ;;  %v86_v22 = vsel %vm75_vm0, %v1374_v3, 0 }
   0x3   :  { %v34_v8 = vld [vmem:[%s1848_s0] sm:$0xff]  ;;  %1286 = vmatpush3.bf16.xpose.msra.mxu0 %v83_v5  ;;  %v1468_v9 = vunpack.c.l.bf16 %v1457_v6  ;;  %v1471_v10 = vunpack.c.h.bf16 %v1457_v6  ;;  %v1479_v12 = vunpack.c.l.bf16 %v1462_v7  ;;  %v1482_v13 = vunpack.c.h.bf16 %v1462_v7  ;;  %154 = vperm.xlu1 %1372, %v36_v11   ;;  %v35_v14 = vld [vmem:[%s1848_s0 + $0x8] sm:$0xff] }
   0x4   :  { %148 = vperm.xlu0 %1371, %v34_v8   ;;  %1366 = vmatprep.subr.msk.bf16.mxu0 %vm75_vm0, %v1374_v3  ;;  %vm50_vm1 = vcmp.eq.s32.totalorder %v1450_v4, 64  ;;  %v1505_v27 = vshrl.u32 %v48_v0, 7  ;;  %v1186_v29 = vld [vmem:[%s1849_s1] ss:$0 sm:$0xff] }
   0x5   :  { %v55_v15 = vmul.f32 -2.0, %v1468_v9  ;;  %v56_v16 = vmul.f32 -2.0, %v1471_v10  ;;  %1294 = vmatpush3.bf16.msra.mxu1 %v1373_v1  ;;  %v57_v20 = vmul.f32 -2.0, %v1479_v12  ;;  %v58_v21 = vmul.f32 -2.0, %v1482_v13 }
   0x6   :  { %1295 = vmatprep.subr.bf16.mxu1 %v1374_v3  ;;  %v140_v31 = vadd.s32 16, %v1505_v27  ;;  %vm167_vm3 = vcmp.ne.s32.totalorder %v1505_v27, %v1450_v4  ;;  %v139_v32 = vadd.s32 8, %v1505_v27  ;;  %v141_v34 = vadd.s32 24, %v1505_v27 }
   0x7   :  { %v59_v18 = vsel %vm50_vm1, 1.0, %v55_v15  ;;  %v60_v19 = vsel %vm50_vm1, 1.0, %v56_v16  ;;  %157 = vperm.xlu1 %1372, %v37_v17   ;;  %v61_v24 = vsel %vm50_vm1, 1.0, %v57_v20  ;;  %v62_v25 = vsel %vm50_vm1, 1.0, %v58_v21 }
   0x8   :  { %151 = vperm.xlu0 %1371, %v35_v14   ;;  %v63_v23 = vpack.c.bf16 %v60_v19, %v59_v18  ;;  %v64_v26 = vpack.c.bf16 %v62_v25, %v61_v24  ;;  %vm169_vm5 = vcmp.ne.s32.totalorder %v140_v31, %v1450_v4  ;;  %vm168_vm8 = vcmp.ne.s32.totalorder %v139_v32, %v1450_v4 }
   0x9   :  { %1296 = vmatpush3.bf16.msra.mxu1 %v1374_v3  ;;  %vm170_vm12 = vcmp.ne.s32.totalorder %v141_v34, %v1450_v4 }
   0xa   :  { %1289 = vmatprep.mubr.msk.bf16.mxu0 %vm75_vm0, %v63_v23 }
   0xb   :  { %1288 = vmatpush3.bf16.xpose.msra.mxu0 %v86_v22 }
  0x12   :  { %1290 = vmatmul.mubr.msk.bf16.vlgmr.msra.gmra.mrb[0].mxu0 %vm75_vm0, %v64_v26 }
  0x82   :  { %v155_v30 = vpop.permute.xlu1 %154 }
  0x83   :  { %v149_v28 = vpop.permute.xlu0 %148  ;;  %vm165_vm4 = vcmp.eq.s32.totalorder %v155_v30, %v1186_v29 }
  0x84   :  { %vm163_vm2 = vcmp.eq.s32.totalorder %v149_v28, %v1186_v29  ;;  %vm173_vm10 = vmand %vm165_vm4, %vm169_vm5 }
  0x85   :  { %vm171_vm6 = vmand %vm163_vm2, %vm167_vm3 }
  0x86   :  { %v158_v35 = vpop.permute.xlu1 %157 }
  0x87   :  { %v152_v33 = vpop.permute.xlu0 %151  ;;  %vm166_vm11 = vcmp.eq.s32.totalorder %v158_v35, %v1186_v29 }
  0x88   :  { %vm164_vm7 = vcmp.eq.s32.totalorder %v152_v33, %v1186_v29  ;;  %vm174_vm14 = vmand %vm166_vm11, %vm170_vm12 }
  0x89   :  { %vm172_vm13 = vmand %vm164_vm7, %vm168_vm8 }
  0xe5   :  { %v1291_v36 = vpop.f32.mrb[0].mxu0 }
  0xe6   :  { %v122_v37 = vpop.f32.mrb[1].mxu0  ;;  %v1522_v42 = vsel %vm173_vm10, %v1291_v36, 1e+30 }
  0xe7   :  { %v1517_v38 = vsel %vm171_vm6, %v122_v37, 1e+30  ;;  %v1292_v39 = vpop.f32.mrb[2].mxu0  ;;  %v186_v45 = vsel %vm179_vm9, %v1522_v42, inf }
  0xe8   :  { %v125_v40 = vpop.f32.mrb[3].mxu0  ;;  %v180_v41 = vsel %vm179_vm9, %v1517_v38, inf  ;;  %v1530_v46 = vsel %vm174_vm14, %v1292_v39, 1e+30 }
  0xe9   :  { %v1524_v43 = vsel %vm172_vm13, %v125_v40, 1e+30  ;;  %181 = vmin.xlane.f32.xlu0 %v180_v41  ;;  %v189_v47 = vsel %vm179_vm9, %v1530_v46, inf }
  0xea   :  { %v183_v44 = vsel %vm179_vm9, %v1524_v43, inf }
  0xeb   :  { %184 = vmin.xlane.f32.xlu1 %v183_v44 }
  0xed   :  { %187 = vmin.xlane.f32.xlu0 %v186_v45 }
  0xf1   :  { %190 = vmin.xlane.f32.xlu0 %v189_v47 }
 0x176   :  { %v1534_v48 = vpop.xlane.xlu0 %181 }
 0x177   :  { %vm196_vm15 = vcmp.le.f32.partialorder %v1517_v38, %v1534_v48  ;;  %vm192_vm8 = vcmp.lt.f32.partialorder %v1534_v48, 1e+30 }
 0x178   :  { %v200_v49 = vsel %vm196_vm15, %v1450_v4, 32  ;;  %v1539_v50 = vpop.xlane.xlu1 %184 }
 0x179   :  { %vm197_vm1 = vcmp.le.f32.partialorder %v1524_v43, %v1539_v50  ;;  %v204_v51 = vsel %vm179_vm9, %v200_v49, 2147483647  ;;  %vm193_vm12 = vcmp.lt.f32.partialorder %v1539_v50, 1e+30 }
 0x17a   :  { %v201_v52 = vsel %vm197_vm1, %v1450_v4, 32  ;;  %v1545_v53 = vpop.xlane.xlu0 %187  ;;  %v206_v54 = vshra.s32 %v204_v51, 16  ;;  %v205_v8 = vand.u32 65535, %v204_v51 }
 0x17b   :  { %vm198_vm2 = vcmp.le.f32.partialorder %v1522_v42, %v1545_v53  ;;  %v219_v55 = vsel %vm179_vm9, %v201_v52, 2147483647  ;;  %vm194_vm14 = vcmp.lt.f32.partialorder %v1545_v53, 1e+30 }
 0x17c   :  { %v202_v56 = vsel %vm198_vm2, %v1450_v4, 32  ;;  %v208_v57 = vcvt.s32.f32 %v206_v54  ;;  %v221_v58 = vshra.s32 %v219_v55, 16  ;;  %v220_v11 = vand.u32 65535, %v219_v55 }
 0x17d   :  { %v234_v59 = vsel %vm179_vm9, %v202_v56, 2147483647  ;;  %v207_v15 = vcvt.s32.f32 %v205_v8  ;;  %v1394_v56 = vmov 0.0  }
 0x17e   :  { %209 = vmin.xlane.f32.xlu1 %v208_v57  ;;  %v1552_v60 = vpop.xlane.xlu0 %190  ;;  %v223_v61 = vcvt.s32.f32 %v221_v58  ;;  %v236_v62 = vshra.s32 %v234_v59, 16  ;;  %v235_v16 = vand.u32 65535, %v234_v59  ;;  %v222_v19 = vcvt.s32.f32 %v220_v11  ;;  %v1375_v11 = vld [vmem:[%s1850_s4] sm:$0xff]  }
 0x17f   :  { %vm199_vm3 = vcmp.le.f32.partialorder %v1530_v46, %v1552_v60  ;;  %1323 = vmatprep.subr.bf16.mxu0 %v1375_v11 }
 0x180   :  { %v203_v63 = vsel %vm199_vm3, %v1450_v4, 32  ;;  %224 = vmin.xlane.f32.xlu0 %v223_v61  ;;  %v238_v0 = vcvt.s32.f32 %v236_v62  ;;  %v237_v22 = vcvt.s32.f32 %v235_v16  ;;  %vm195_vm3 = vcmp.lt.f32.partialorder %v1552_v60, 1e+30  ;;  %1324 = vmatpush3.bf16.msra.mxu0 %v1375_v11 }
 0x181   :  { %v249_v1 = vsel %vm179_vm9, %v203_v63, 2147483647 }
 0x182   :  { %239 = vmin.xlane.f32.xlu1 %v238_v0  ;;  %v251_v3 = vshra.s32 %v249_v1, 16  ;;  %v250_v23 = vand.u32 65535, %v249_v1 }
 0x184   :  { %v253_v5 = vcvt.s32.f32 %v251_v3  ;;  %v252_v26 = vcvt.s32.f32 %v250_v23 }
 0x186   :  { %254 = vmin.xlane.f32.xlu0 %v253_v5 }
 0x20b   :  { %v210_v14 = vpop.xlane.xlu1 %209 }
 0x20c   :  { %vm211_vm4 = vcmp.eq.f32.partialorder %v208_v57, %v210_v14  ;;  %v216_v29 = vcvt.f32.s32 %v210_v14  ;;  %v1376_v14 = vld [vmem:[%s1850_s4 + $0x8] sm:$0xff]  }
 0x20d   :  { %v225_v17 = vpop.xlane.xlu0 %224  ;;  %v212_v18 = vsel %vm211_vm4, %v207_v15, inf  ;;  %1325 = vmatprep.subr.bf16.mxu0 %v1376_v14  ;;  %v1378_v15 = vld [vmem:[%s1850_s4 + $0x18] sm:$0xff]  }
 0x20e   :  { %213 = vmin.xlane.f32.xlu1 %v212_v18  ;;  %vm226_vm5 = vcmp.eq.f32.partialorder %v223_v61, %v225_v17  ;;  %v231_v30 = vcvt.f32.s32 %v225_v17  ;;  %v217_v33 = vshll.u32 %v216_v29, 16  ;;  %1326 = vmatpush3.bf16.msra.mxu0 %v1376_v14  ;;  %v1379_v17 = vld [vmem:[%s1850_s4 + $0x20] ss:$0 sps:$4 sm:$0x11]  }
 0x20f   :  { %v240_v20 = vpop.xlane.xlu1 %239  ;;  %v227_v21 = vsel %vm226_vm5, %v222_v19, inf }
 0x210   :  { %228 = vmin.xlane.f32.xlu0 %v227_v21  ;;  %vm241_vm6 = vcmp.eq.f32.partialorder %v238_v0, %v240_v20  ;;  %v246_v31 = vcvt.f32.s32 %v240_v20  ;;  %v232_v36 = vshll.u32 %v231_v30, 16 }
 0x211   :  { %v242_v24 = vsel %vm241_vm6, %v237_v22, inf  ;;  %vm678_vm6 = vcmask 1040384  }
 0x212   :  { %243 = vmin.xlane.f32.xlu1 %v242_v24  ;;  %v247_v40 = vshll.u32 %v246_v31, 16  ;;  %v1613_v16 = vsel %vm678_vm6, 65535, %v1393_v2 }
 0x213   :  { %v255_v25 = vpop.xlane.xlu0 %254  ;;  %v806_v18 = vand.u32 %v1379_v17, %v1613_v16 }
 0x214   :  { %vm256_vm7 = vcmp.eq.f32.partialorder %v253_v5, %v255_v25  ;;  %v261_v41 = vcvt.f32.s32 %v255_v25 }
 0x215   :  { %v257_v28 = vsel %vm256_vm7, %v252_v26, inf }
 0x216   :  { %258 = vmin.xlane.f32.xlu0 %v257_v28  ;;  %v262_v52 = vshll.u32 %v261_v41, 16 }
 0x29b   :  { %v214_v32 = vpop.xlane.xlu1 %213 }
 0x29c   :  { %v215_v34 = vcvt.f32.s32 %v214_v32 }
 0x29d   :  { %v229_v35 = vpop.xlane.xlu0 %228 }
 0x29e   :  { %v218_v37 = vadd.s32 %v217_v33, %v215_v34  ;;  %v230_v39 = vcvt.f32.s32 %v229_v35 }
 0x29f   :  { %v244_v44 = vpop.xlane.xlu1 %243 }
 0x2a0   :  { %vm264_vm10 = vcmp.eq.s32.totalorder %v1450_v4, %v218_v37  ;;  %v233_v45 = vadd.s32 %v232_v36, %v230_v39  ;;  %v245_v47 = vcvt.f32.s32 %v244_v44 }
 0x2a1   :  { %vm276_vm11 = vmand %vm264_vm10, %vm192_vm8 }
 0x2a2   :  { %vm265_vm13 = vcmp.eq.s32.totalorder %v1450_v4, %v233_v45  ;;  %v248_v49 = vadd.s32 %v247_v40, %v245_v47  ;;  %v1565_v51 = vsel %vm276_vm11, 1e+30, %v1517_v38  ;;  %v1187_v57 = vsel %vm276_vm11, 1.0, %v1394_v56 }
 0x2a3   :  { %v259_v54 = vpop.xlane.xlu0 %258  ;;  %v294_v55 = vsel %vm179_vm9, %v1565_v51, inf  ;;  %vm277_vm15 = vmand %vm265_vm13, %vm193_vm12 }
 0x2a4   :  { %vm266_vm1 = vcmp.eq.s32.totalorder %v1450_v4, %v248_v49  ;;  %v260_v58 = vcvt.f32.s32 %v259_v54  ;;  %295 = vmin.xlane.f32.xlu1 %v294_v55  ;;  %v1575_v38 = vsel %vm277_vm15, 1e+30, %v1524_v43  ;;  %v1188_v59 = vsel %vm277_vm15, 1.0, %v1394_v56 }
 0x2a5   :  { %v297_v61 = vsel %vm179_vm9, %v1575_v38, inf  ;;  %v288_v62 = vpack.c.bf16 %v1188_v59, %v1187_v57  ;;  %vm278_vm2 = vmand %vm266_vm1, %vm194_vm14 }
 0x2a6   :  { %v263_v63 = vadd.s32 %v262_v52, %v260_v58  ;;  %298 = vmin.xlane.f32.xlu0 %v297_v61  ;;  %v1583_v0 = vsel %vm278_vm2, 1e+30, %v1522_v42  ;;  %v1189_v1 = vsel %vm278_vm2, 1.0, %v1394_v56 }
 0x2a7   :  { %1297 = vmatprep.mubr.msk.bf16.mxu1 %vm179_vm9, %v288_v62  ;;  %v300_v43 = vsel %vm179_vm9, %v1583_v0, inf }
 0x2a8   :  { %vm267_vm4 = vcmp.eq.s32.totalorder %v1450_v4, %v263_v63  ;;  %301 = vmin.xlane.f32.xlu1 %v300_v43 }
 0x2a9   :  { %vm279_vm5 = vmand %vm267_vm4, %vm195_vm3 }
 0x2aa   :  { %v1594_v3 = vsel %vm279_vm5, 1e+30, %v1530_v46  ;;  %v1190_v42 = vsel %vm279_vm5, 1.0, %v1394_v56  ;;  %v1377_v46 = vld [vmem:[%s1850_s4 + $0x10] sm:$0xff]  }
 0x2ab   :  { %v303_v5 = vsel %vm179_vm9, %v1594_v3, inf  ;;  %v289_v8 = vpack.c.bf16 %v1190_v42, %v1189_v1  ;;  %1327 = vmatprep.subr.bf16.mxu0 %v1377_v46 }
 0x2ac   :  { %304 = vmin.xlane.f32.xlu0 %v303_v5  ;;  %1328 = vmatpush3.bf16.msra.mxu0 %v1377_v46 }
 0x2ad   :  { %1298 = vmatmul.mubr.msk.bf16.vlgmr.msra.gmra.mrb[0].mxu1 %vm179_vm9, %v289_v8  ;;  %1329 = vmatprep.subr.bf16.mxu0 %v1378_v15 }
 0x2b0   :  { %1330 = vmatpush3.bf16.msra.mxu0 %v1378_v15 }
 0x2b1   :  { %1331 = vmatprep.subr.bf16.mxu0 %v806_v18 }
 0x2b4   :  { %1332 = vmatpush3.bf16.msra.mxu0 %v806_v18 }
 0x331   :  { %v1619_v19 = vpop.xlane.xlu1 %295 }
 0x332   :  { %vm310_vm7 = vcmp.le.f32.partialorder %v1565_v51, %v1619_v19  ;;  %vm306_vm5 = vcmp.lt.f32.partialorder %v1619_v19, 1e+30 }
 0x333   :  { %v314_v20 = vsel %vm310_vm7, %v1450_v4, 32  ;;  %v1624_v21 = vpop.xlane.xlu0 %298 }
 0x334   :  { %vm311_vm10 = vcmp.le.f32.partialorder %v1575_v38, %v1624_v21  ;;  %v318_v2 = vsel %vm179_vm9, %v314_v20, 2147483647 }
 0x335   :  { %v315_v22 = vsel %vm311_vm10, %v1450_v4, 32  ;;  %v1630_v23 = vpop.xlane.xlu1 %301  ;;  %v320_v24 = vshra.s32 %v318_v2, 16  ;;  %v319_v58 = vand.u32 65535, %v318_v2  ;;  %vm1856_vm10 = vcmp.lt.f32.partialorder %v1624_v21, 1e+30 }
 0x336   :  { %vm312_vm11 = vcmp.le.f32.partialorder %v1583_v0, %v1630_v23  ;;  %v333_v25 = vsel %vm179_vm9, %v315_v22, 2147483647 }
 0x337   :  { %v316_v26 = vsel %vm312_vm11, %v1450_v4, 32  ;;  %v322_v28 = vcvt.s32.f32 %v320_v24  ;;  %v335_v29 = vshra.s32 %v333_v25, 16  ;;  %v334_v59 = vand.u32 65535, %v333_v25 }
 0x338   :  { %v348_v30 = vsel %vm179_vm9, %v316_v26, 2147483647  ;;  %v321_v62 = vcvt.s32.f32 %v319_v58 }
 0x339   :  { %323 = vmin.xlane.f32.xlu1 %v322_v28  ;;  %v1637_v31 = vpop.xlane.xlu0 %304  ;;  %v337_v32 = vcvt.s32.f32 %v335_v29  ;;  %v350_v33 = vshra.s32 %v348_v30, 16  ;;  %v349_v63 = vand.u32 65535, %v348_v30  ;;  %v336_v42 = vcvt.s32.f32 %v334_v59 }
 0x33a   :  { %vm313_vm13 = vcmp.le.f32.partialorder %v1594_v3, %v1637_v31 }
 0x33b   :  { %v317_v34 = vsel %vm313_vm13, %v1450_v4, 32  ;;  %338 = vmin.xlane.f32.xlu0 %v337_v32  ;;  %v352_v35 = vcvt.s32.f32 %v350_v33  ;;  %v351_v11 = vcvt.s32.f32 %v349_v63  ;;  %vm308_vm13 = vcmp.lt.f32.partialorder %v1630_v23, 1e+30 }
 0x33c   :  { %v363_v36 = vsel %vm179_vm9, %v317_v34, 2147483647 }
 0x33d   :  { %353 = vmin.xlane.f32.xlu1 %v352_v35  ;;  %v365_v37 = vshra.s32 %v363_v36, 16  ;;  %v364_v14 = vand.u32 65535, %v363_v36 }
 0x33f   :  { %v367_v39 = vcvt.s32.f32 %v365_v37  ;;  %v366_v17 = vcvt.s32.f32 %v364_v14 }
 0x341   :  { %368 = vmin.xlane.f32.xlu0 %v367_v39 }
 0x380   :  { %v1299_v40 = vpop.f32.mrb[0].mxu1 }
 0x381   :  { %v572_v41 = vpop.f32.mrb[1].mxu1  ;;  %v735_v45 = vsub.f32 %v1299_v40, %v1479_v12 }
 0x382   :  { %v1300_v44 = vpop.f32.mrb[2].mxu1  ;;  %v733_v52 = vsub.f32 %v572_v41, %v1468_v9 }
 0x383   :  { %v736_v47 = vsub.f32 %v1300_v44, %v1482_v13  ;;  %v575_v49 = vpop.f32.mrb[3].mxu1 }
 0x384   :  { %v734_v54 = vsub.f32 %v575_v49, %v1471_v10 }
 0x385   :  { %v746_v55 = vpack.c.bf16 %v736_v47, %v735_v45 }
 0x386   :  { %v745_v57 = vpack.c.bf16 %v734_v54, %v733_v52 }
 0x388   :  { %1333 = vmatprep.mubr.msk.bf16.mxu0 %vm75_vm0, %v745_v57 }
 0x389   :  { %1334 = vmatmul.mubr.msk.bf16.vlgmr.msra.gmra.mrb[4].mxu0 %vm75_vm0, %v746_v55 }
 0x3c6   :  { %v324_v61 = vpop.xlane.xlu1 %323 }
 0x3c7   :  { %vm325_vm15 = vcmp.eq.f32.partialorder %v322_v28, %v324_v61  ;;  %v330_v20 = vcvt.f32.s32 %v324_v61 }
 0x3c8   :  { %v339_v43 = vpop.xlane.xlu0 %338  ;;  %v326_v1 = vsel %vm325_vm15, %v321_v62, inf }
 0x3c9   :  { %327 = vmin.xlane.f32.xlu1 %v326_v1  ;;  %vm340_vm1 = vcmp.eq.f32.partialorder %v337_v32, %v339_v43  ;;  %v345_v2 = vcvt.f32.s32 %v339_v43  ;;  %v331_v24 = vshll.u32 %v330_v20, 16 }
 0x3ca   :  { %v354_v5 = vpop.xlane.xlu1 %353  ;;  %v341_v8 = vsel %vm340_vm1, %v336_v42, inf }
 0x3cb   :  { %342 = vmin.xlane.f32.xlu0 %v341_v8  ;;  %vm355_vm2 = vcmp.eq.f32.partialorder %v352_v35, %v354_v5  ;;  %v360_v25 = vcvt.f32.s32 %v354_v5  ;;  %v346_v29 = vshll.u32 %v345_v2, 16 }
 0x3cc   :  { %v356_v46 = vsel %vm355_vm2, %v351_v11, inf }
 0x3cd   :  { %357 = vmin.xlane.f32.xlu1 %v356_v46  ;;  %v361_v35 = vshll.u32 %v360_v25, 16 }
 0x3ce   :  { %v369_v15 = vpop.xlane.xlu0 %368 }
 0x3cf   :  { %vm370_vm4 = vcmp.eq.f32.partialorder %v367_v39, %v369_v15  ;;  %v375_v33 = vcvt.f32.s32 %v369_v15 }
 0x3d0   :  { %v371_v18 = vsel %vm370_vm4, %v366_v17, inf  ;;  %vm309_vm4 = vcmp.lt.f32.partialorder %v1637_v31, 1e+30 }
 0x3d1   :  { %372 = vmin.xlane.f32.xlu0 %v371_v18  ;;  %v376_v45 = vshll.u32 %v375_v33, 16 }
 0x456   :  { %v328_v22 = vpop.xlane.xlu1 %327 }
 0x457   :  { %v329_v26 = vcvt.f32.s32 %v328_v22 }
 0x458   :  { %v343_v28 = vpop.xlane.xlu0 %342 }
 0x459   :  { %v332_v30 = vadd.s32 %v331_v24, %v329_v26  ;;  %v344_v32 = vcvt.f32.s32 %v343_v28 }
 0x45a   :  { %v358_v34 = vpop.xlane.xlu1 %357 }
 0x45b   :  { %v347_v36 = vadd.s32 %v346_v29, %v344_v32  ;;  %v359_v37 = vcvt.f32.s32 %v358_v34  ;;  %vm378_vm6 = vcmp.eq.s32.totalorder %v1450_v4, %v332_v30 }
 0x45c   :  { %v1651_v39 = vpop.f32.mrb[4].mxu0  ;;  %vm390_vm7 = vmand %vm378_vm6, %vm306_vm5 }
 0x45d   :  { %v362_v40 = vadd.s32 %v361_v35, %v359_v37  ;;  %v1656_v41 = vpop.f32.mrb[5].mxu0  ;;  %v404_v44 = vsel %vm390_vm7, 1e+30, %v1565_v51  ;;  %vm379_vm11 = vcmp.eq.s32.totalorder %v1450_v4, %v347_v36  ;;  %v1191_v54 = vsel %vm390_vm7, 1.0, %v1394_v56 }
 0x45e   :  { %v1661_v47 = vpop.f32.mrb[6].mxu0  ;;  %v373_v49 = vpop.xlane.xlu0 %372  ;;  %v408_v52 = vsel %vm179_vm9, %v404_v44, inf  ;;  %vm391_vm15 = vmand %vm379_vm11, %vm1856_vm10 }
 0x45f   :  { %v374_v55 = vcvt.f32.s32 %v373_v49  ;;  %409 = vmin.xlane.f32.xlu1 %v408_v52  ;;  %v1667_v57 = vpop.f32.mrb[7].mxu0  ;;  %v405_v51 = vsel %vm391_vm15, 1e+30, %v1575_v38  ;;  %v1192_v58 = vsel %vm391_vm15, 1.0, %v1394_v56  ;;  %vm380_vm1 = vcmp.eq.s32.totalorder %v1450_v4, %v362_v40 }
 0x460   :  { %v411_v59 = vsel %vm179_vm9, %v405_v51, inf  ;;  %v402_v61 = vpack.c.bf16 %v1192_v58, %v1191_v54  ;;  %vm392_vm2 = vmand %vm380_vm1, %vm308_vm13 }
 0x461   :  { %v377_v62 = vadd.s32 %v376_v45, %v374_v55  ;;  %412 = vmin.xlane.f32.xlu0 %v411_v59  ;;  %v406_v63 = vsel %vm392_vm2, 1e+30, %v1583_v0  ;;  %v1193_v38 = vsel %vm392_vm2, 1.0, %v1394_v56 }
 0x462   :  { %1301 = vmatprep.mubr.msk.bf16.mxu1 %vm179_vm9, %v402_v61  ;;  %v414_v43 = vsel %vm179_vm9, %v406_v63, inf }
 0x463   :  { %415 = vmin.xlane.f32.xlu1 %v414_v43  ;;  %vm381_vm6 = vcmp.eq.s32.totalorder %v1450_v4, %v377_v62 }
 0x464   :  { %vm393_vm7 = vmand %vm381_vm6, %vm309_vm4 }
 0x465   :  { %v407_v1 = vsel %vm393_vm7, 1e+30, %v1594_v3  ;;  %v1194_v42 = vsel %vm393_vm7, 1.0, %v1394_v56 }
 0x466   :  { %v417_v0 = vsel %vm179_vm9, %v407_v1, inf  ;;  %v403_v5 = vpack.c.bf16 %v1194_v42, %v1193_v38 }
 0x467   :  { %418 = vmin.xlane.f32.xlu0 %v417_v0 }
 0x468   :  { %1302 = vmatmul.mubr.msk.bf16.gmra.mrb[4].mxu1 %vm179_vm9, %v403_v5 }
 0x4ec   :  { %v1687_v8 = vpop.xlane.xlu1 %409 }
 0x4ed   :  { %vm424_vm11 = vcmp.le.f32.partialorder %v404_v44, %v1687_v8 }
 0x4ee   :  { %v428_v11 = vsel %vm424_vm11, %v1450_v4, 32  ;;  %v1691_v14 = vpop.xlane.xlu0 %412 }
 0x4ef   :  { %vm425_vm15 = vcmp.le.f32.partialorder %v405_v51, %v1691_v14  ;;  %v432_v3 = vsel %vm179_vm9, %v428_v11, 2147483647 }
 0x4f0   :  { %v429_v46 = vsel %vm425_vm15, %v1450_v4, 32  ;;  %v1696_v15 = vpop.xlane.xlu1 %415  ;;  %v434_v17 = vshra.s32 %v432_v3, 16  ;;  %v433_v51 = vand.u32 65535, %v432_v3 }
 0x4f1   :  { %vm426_vm1 = vcmp.le.f32.partialorder %v406_v63, %v1696_v15  ;;  %v447_v18 = vsel %vm179_vm9, %v429_v46, 2147483647 }
 0x4f2   :  { %v430_v20 = vsel %vm426_vm1, %v1450_v4, 32  ;;  %v436_v2 = vcvt.s32.f32 %v434_v17  ;;  %v449_v22 = vshra.s32 %v447_v18, 16  ;;  %v448_v58 = vand.u32 65535, %v447_v18  ;;  %v1380_v18 = vld [vmem:[%s1851_s3] sm:$0xff]  }
 0x4f3   :  { %v462_v24 = vsel %vm179_vm9, %v430_v20, 2147483647  ;;  %v435_v61 = vcvt.s32.f32 %v433_v51  ;;  %1309 = vmatprep.subr.bf16.mxu1 %v1380_v18  ;;  %v1381_v20 = vld [vmem:[%s1851_s3 + $0x8] sm:$0xff]   ;;  %vm1857_vm1 = vcmp.lt.f32.partialorder %v1687_v8, 1e+30 }
 0x4f4   :  { %437 = vmin.xlane.f32.xlu1 %v436_v2  ;;  %v1702_v25 = vpop.xlane.xlu0 %418  ;;  %v451_v26 = vcvt.s32.f32 %v449_v22  ;;  %v464_v28 = vshra.s32 %v462_v24, 16  ;;  %v463_v62 = vand.u32 65535, %v462_v24  ;;  %v450_v38 = vcvt.s32.f32 %v448_v58  ;;  %1310 = vmatpush3.bf16.msra.mxu1 %v1380_v18  ;;  %v1383_v22 = vld [vmem:[%s1851_s3 + $0x18] sm:$0xff]   ;;  %v1384_v24 = vld [vmem:[%s1851_s3 + $0x20] ss:$0 sps:$4 sm:$0x11]  }
 0x4f5   :  { %vm427_vm2 = vcmp.le.f32.partialorder %v407_v1, %v1702_v25  ;;  %1311 = vmatprep.subr.bf16.mxu1 %v1381_v20 }
 0x4f6   :  { %v431_v29 = vsel %vm427_vm2, %v1450_v4, 32  ;;  %452 = vmin.xlane.f32.xlu0 %v451_v26  ;;  %v466_v30 = vcvt.s32.f32 %v464_v28  ;;  %v465_v0 = vcvt.s32.f32 %v463_v62 }
 0x4f7   :  { %v477_v32 = vsel %vm179_vm9, %v431_v29, 2147483647 }
 0x4f8   :  { %467 = vmin.xlane.f32.xlu1 %v466_v30  ;;  %v479_v33 = vshra.s32 %v477_v32, 16  ;;  %v478_v5 = vand.u32 65535, %v477_v32  ;;  %1312 = vmatpush3.bf16.msra.mxu1 %v1381_v20 }
 0x4fa   :  { %v481_v34 = vcvt.s32.f32 %v479_v33  ;;  %v480_v3 = vcvt.s32.f32 %v478_v5 }
 0x4fc   :  { %482 = vmin.xlane.f32.xlu0 %v481_v34 }
 0x53b   :  { %v1303_v35 = vpop.f32.mrb[4].mxu1 }
 0x53c   :  { %v588_v36 = vpop.f32.mrb[5].mxu1  ;;  %v739_v40 = vsub.f32 %v1303_v35, %v1479_v12 }
 0x53d   :  { %v1304_v37 = vpop.f32.mrb[6].mxu1  ;;  %v737_v49 = vsub.f32 %v588_v36, %v1468_v9 }
 0x53e   :  { %v740_v44 = vsub.f32 %v1304_v37, %v1482_v13  ;;  %v591_v45 = vpop.f32.mrb[7].mxu1 }
 0x53f   :  { %v738_v52 = vsub.f32 %v591_v45, %v1471_v10 }
 0x540   :  { %v748_v54 = vpack.c.bf16 %v740_v44, %v739_v40 }
 0x541   :  { %v747_v55 = vpack.c.bf16 %v738_v52, %v737_v49 }
 0x543   :  { %1337 = vmatprep.mubr.msk.bf16.mxu0 %vm75_vm0, %v747_v55 }
 0x544   :  { %1338 = vmatmul.mubr.msk.bf16.gmra.mrb[8].mxu0 %vm75_vm0, %v748_v54 }
 0x581   :  { %v438_v59 = vpop.xlane.xlu1 %437 }
 0x582   :  { %vm439_vm6 = vcmp.eq.f32.partialorder %v436_v2, %v438_v59  ;;  %v1382_v2 = vld [vmem:[%s1851_s3 + $0x10] sm:$0xff]   ;;  %v444_v28 = vcvt.f32.s32 %v438_v59 }
 0x583   :  { %v453_v63 = vpop.xlane.xlu0 %452  ;;  %v440_v43 = vsel %vm439_vm6, %v435_v61, inf  ;;  %1313 = vmatprep.subr.bf16.mxu1 %v1382_v2 }
 0x584   :  { %441 = vmin.xlane.f32.xlu1 %v440_v43  ;;  %vm454_vm7 = vcmp.eq.f32.partialorder %v451_v26, %v453_v63  ;;  %1314 = vmatpush3.bf16.msra.mxu1 %v1382_v2  ;;  %v682_v26 = vand.u32 %v1384_v24, %v1613_v16  ;;  %v459_v29 = vcvt.f32.s32 %v453_v63  ;;  %v445_v32 = vshll.u32 %v444_v28, 16 }
 0x585   :  { %v468_v1 = vpop.xlane.xlu1 %467  ;;  %v455_v42 = vsel %vm454_vm7, %v450_v38, inf  ;;  %1315 = vmatprep.subr.bf16.mxu1 %v1383_v22  ;;  %vm1858_vm7 = vcmp.lt.f32.partialorder %v1691_v14, 1e+30 }
 0x586   :  { %456 = vmin.xlane.f32.xlu0 %v455_v42  ;;  %vm469_vm11 = vcmp.eq.f32.partialorder %v466_v30, %v468_v1  ;;  %v474_v33 = vcvt.f32.s32 %v468_v1  ;;  %v460_v36 = vshll.u32 %v459_v29, 16  ;;  %v1205_v29 = vld [vmem:[%s1853_s5] ss:$0 sm:$0xff] }
 0x587   :  { %v470_v11 = vsel %vm469_vm11, %v465_v0, inf }
 0x588   :  { %471 = vmin.xlane.f32.xlu1 %v470_v11  ;;  %1316 = vmatpush3.bf16.msra.mxu1 %v1383_v22  ;;  %v475_v49 = vshll.u32 %v474_v33, 16 }
 0x589   :  { %v483_v46 = vpop.xlane.xlu0 %482  ;;  %1317 = vmatprep.subr.bf16.mxu1 %v682_v26 }
 0x58a   :  { %vm484_vm15 = vcmp.eq.f32.partialorder %v481_v34, %v483_v46  ;;  %v489_v44 = vcvt.f32.s32 %v483_v46  ;;  %v1388_v46 = vld [vmem:[%s1852_s6 + $0x8] sm:$0xff]  }
 0x58b   :  { %v485_v17 = vsel %vm484_vm15, %v480_v3, inf }
 0x58c   :  { %486 = vmin.xlane.f32.xlu0 %v485_v17  ;;  %1318 = vmatpush3.bf16.msra.mxu1 %v682_v26  ;;  %v490_v58 = vshll.u32 %v489_v44, 16 }
 0x611   :  { %v442_v30 = vpop.xlane.xlu1 %441 }
 0x612   :  { %v443_v34 = vcvt.f32.s32 %v442_v30 }
 0x613   :  { %v457_v35 = vpop.xlane.xlu0 %456 }
 0x614   :  { %v446_v37 = vadd.s32 %v445_v32, %v443_v34  ;;  %v458_v40 = vcvt.f32.s32 %v457_v35 }
 0x615   :  { %v472_v45 = vpop.xlane.xlu1 %471 }
 0x616   :  { %vm492_vm2 = vcmp.eq.s32.totalorder %v1450_v4, %v446_v37  ;;  %v461_v16 = vadd.s32 %v460_v36, %v458_v40  ;;  %v473_v52 = vcvt.f32.s32 %v472_v45 }
 0x617   :  { %vm504_vm6 = vmand %vm492_vm2, %vm1857_vm1  ;;  %v1339_v54 = vpop.f32.mrb[8].mxu0  ;;  %vm422_vm2 = vcmp.lt.f32.partialorder %v1696_v15, 1e+30 }
 0x618   :  { %vm493_vm11 = vcmp.eq.s32.totalorder %v1450_v4, %v461_v16  ;;  %v476_v55 = vadd.s32 %v475_v49, %v473_v52  ;;  %v858_v51 = vpop.f32.mrb[9].mxu0  ;;  %v1195_v62 = vsel %vm504_vm6, 1.0, %v1394_v56 }
 0x619   :  { %vm505_vm15 = vmand %vm493_vm11, %vm1858_vm7  ;;  %v1340_v59 = vpop.f32.mrb[10].mxu0  ;;  %v487_v61 = vpop.xlane.xlu0 %486  ;;  %vm423_vm11 = vcmp.lt.f32.partialorder %v1702_v25, 1e+30 }
 0x61a   :  { %v1196_v63 = vsel %vm505_vm15, 1.0, %v1394_v56  ;;  %vm494_vm10 = vcmp.eq.s32.totalorder %v1450_v4, %v476_v55  ;;  %v488_v43 = vcvt.f32.s32 %v487_v61  ;;  %v861_v38 = vpop.f32.mrb[11].mxu0 }
 0x61b   :  { %v516_v1 = vpack.c.bf16 %v1196_v63, %v1195_v62  ;;  %vm506_vm1 = vmand %vm494_vm10, %vm422_vm2 }
 0x61c   :  { %v491_v42 = vadd.s32 %v490_v58, %v488_v43  ;;  %v1197_v0 = vsel %vm506_vm1, 1.0, %v1394_v56 }
 0x61d   :  { %1305 = vmatprep.mubr.msk.bf16.mxu1 %vm179_vm9, %v516_v1 }
 0x61e   :  { %vm495_vm7 = vcmp.eq.s32.totalorder %v1450_v4, %v491_v42  ;;  %v1387_v4 = vld [vmem:[%s1852_s6] sm:$0xff]  }
 0x61f   :  { %vm507_vm6 = vmand %vm495_vm7, %vm423_vm11  ;;  %1345 = vmatprep.subr.bf16.mxu1 %v1387_v4 }
 0x620   :  { %v1198_v5 = vsel %vm507_vm6, 1.0, %v1394_v56  ;;  %v1389_v56 = vld [vmem:[%s1852_s6 + $0x10] sm:$0xff]  }
 0x621   :  { %v517_v11 = vpack.c.bf16 %v1198_v5, %v1197_v0 }
 0x623   :  { %1306 = vmatmul.mubr.msk.bf16.gmra.mrb[8].mxu1 %vm179_vm9, %v517_v11  ;;  %vm1859_vm9 = vcmp.lt.f32.partialorder %v1624_v21, 1e+30 }
 0x624   :  { %1319 = vmatprep.mubr.msk.bf16.mxu1 %vm75_vm0, %v1457_v6  ;;  %v1390_v6 = vld [vmem:[%s1852_s6 + $0x18] sm:$0xff]  }
 0x62b   :  { %1320 = vmatmul.mubr.msk.bf16.vlgmr.msra.gmra.mrb[12].mxu1 %vm75_vm0, %v1462_v7 }
 0x62c   :  { %1346 = vmatpush3.bf16.msra.mxu1 %v1387_v4 }
 0x62d   :  { %1347 = vmatprep.subr.bf16.mxu1 %v1388_v46 }
 0x630   :  { %1348 = vmatpush3.bf16.msra.mxu1 %v1388_v46 }
 0x631   :  { %1349 = vmatprep.subr.bf16.mxu1 %v1389_v56 }
 0x634   :  { %1350 = vmatpush3.bf16.msra.mxu1 %v1389_v56 }
 0x635   :  { %1351 = vmatprep.subr.bf16.mxu1 %v1390_v6 }
 0x638   :  { %1352 = vmatpush3.bf16.msra.mxu1 %v1390_v6 }
 0x6f6   :  { %v1307_v7 = vpop.f32.mrb[8].mxu1 }
 0x6f7   :  { %v604_v3 = vpop.f32.mrb[9].mxu1  ;;  %v743_v18 = vsub.f32 %v1307_v7, %v1479_v12 }
 0x6f8   :  { %v1308_v17 = vpop.f32.mrb[10].mxu1  ;;  %v741_v22 = vsub.f32 %v604_v3, %v1468_v9 }
 0x6f9   :  { %v744_v20 = vsub.f32 %v1308_v17, %v1482_v13  ;;  %v607_v2 = vpop.f32.mrb[11].mxu1  ;;  %v1226_v17 = vld [vmem:[%s1854_s7] ss:$0 sm:$0xff] }
 0x6fa   :  { %v742_v24 = vsub.f32 %v607_v2, %v1471_v10 }
 0x6fb   :  { %v750_v26 = vpack.c.bf16 %v744_v20, %v743_v18 }
 0x6fc   :  { %v749_v28 = vpack.c.bf16 %v742_v24, %v741_v22 }
 0x6fe   :  { %v1321_v30 = vpop.f32.mrb[12].mxu1  ;;  %1341 = vmatprep.mubr.msk.bf16.mxu0 %vm75_vm0, %v749_v28 }
 0x6ff   :  { %v727_v32 = vadd.f32 %v1321_v30, %v1205_v29  ;;  %v718_v33 = vpop.f32.mrb[13].mxu1  ;;  %1342 = vmatmul.mubr.msk.bf16.gmra.mrb[12].mxu0 %vm75_vm0, %v750_v26  ;;  %vm958_vm0 = vcmask 523264  }
 0x700   :  { %v719_v12 = vadd.f32 %v1205_v29, %v718_v33  ;;  %v1322_v13 = vpop.f32.mrb[14].mxu1 }
 0x701   :  { %v891_v34 = vadd.f32 %v1651_v39, %v727_v32  ;;  %v895_v9 = vadd.f32 %v1339_v54, %v727_v32  ;;  %v730_v35 = vadd.f32 %v1322_v13, %v1205_v29  ;;  %v721_v10 = vpop.f32.mrb[15].mxu1 }
 0x702   :  { %v889_v36 = vadd.f32 %v1656_v41, %v719_v12  ;;  %v893_v37 = vadd.f32 %v858_v51, %v719_v12  ;;  %v722_v40 = vadd.f32 %v1205_v29, %v721_v10 }
 0x703   :  { %v892_v44 = vadd.f32 %v1661_v47, %v730_v35  ;;  %v896_v45 = vadd.f32 %v1340_v59, %v730_v35  ;;  %v903_v52 = vmax.f32 %v891_v34, 0.0  ;;  %v907_v55 = vmax.f32 %v895_v9, 0.0 }
 0x704   :  { %v890_v49 = vadd.f32 %v1667_v57, %v722_v40  ;;  %v894_v16 = vadd.f32 %v861_v38, %v722_v40  ;;  %v901_v62 = vmax.f32 %v889_v36, 0.0  ;;  %v905_v63 = vmax.f32 %v893_v37, 0.0 }
 0x705   :  { %v904_v58 = vmax.f32 %v892_v44, 0.0  ;;  %v908_v61 = vmax.f32 %v896_v45, 0.0 }
 0x706   :  { %v902_v39 = vmax.f32 %v890_v49, 0.0  ;;  %v906_v54 = vmax.f32 %v894_v16, 0.0 }
 0x707   :  { %v914_v43 = vpack.c.bf16 %v904_v58, %v903_v52  ;;  %v916_v1 = vpack.c.bf16 %v908_v61, %v907_v55 }
 0x708   :  { %v913_v41 = vpack.c.bf16 %v902_v39, %v901_v62  ;;  %v915_v51 = vpack.c.bf16 %v906_v54, %v905_v63 }
 0x70a   :  { %1353 = vmatprep.mubr.msk.bf16.mxu1 %vm958_vm0, %v913_v41 }
 0x70b   :  { %1354 = vmatmul.mubr.msk.bf16.vlgmr.msra.gmra.mrb[16].mxu1 %vm958_vm0, %v914_v43 }
 0x70c   :  { %1357 = vmatprep.mubr.msk.bf16.mxu1 %vm958_vm0, %v915_v51 }
 0x713   :  { %1358 = vmatmul.mubr.msk.bf16.gmra.mrb[20].mxu1 %vm958_vm0, %v916_v1 }
 0x7d2   :  { %v1343_v47 = vpop.f32.mrb[12].mxu0 }
 0x7d3   :  { %v899_v57 = vadd.f32 %v1343_v47, %v727_v32  ;;  %v874_v59 = vpop.f32.mrb[13].mxu0 }
 0x7d4   :  { %v897_v38 = vadd.f32 %v874_v59, %v719_v12  ;;  %v1344_v42 = vpop.f32.mrb[14].mxu0 }
 0x7d5   :  { %v900_v0 = vadd.f32 %v1344_v42, %v730_v35  ;;  %v877_v5 = vpop.f32.mrb[15].mxu0  ;;  %v911_v4 = vmax.f32 %v899_v57, 0.0 }
 0x7d6   :  { %v898_v11 = vadd.f32 %v877_v5, %v722_v40  ;;  %v909_v56 = vmax.f32 %v897_v38, 0.0 }
 0x7d7   :  { %v912_v46 = vmax.f32 %v900_v0, 0.0 }
 0x7d8   :  { %v910_v6 = vmax.f32 %v898_v11, 0.0 }
 0x7d9   :  { %v918_v7 = vpack.c.bf16 %v912_v46, %v911_v4 }
 0x7da   :  { %v917_v3 = vpack.c.bf16 %v910_v6, %v909_v56 }
 0x7dc   :  { %1361 = vmatprep.mubr.msk.bf16.mxu1 %vm958_vm0, %v917_v3 }
 0x7dd   :  { %1362 = vmatmul.mubr.msk.bf16.gmra.mrb[24].mxu1 %vm958_vm0, %v918_v7 }
 0x7de   :  { %v1355_v18 = vpop.f32.mrb[16].mxu1 }
 0x7df   :  { %v1020_v20 = vadd.f32 %v1355_v18, %v1226_v17  ;;  %v1011_v2 = vpop.f32.mrb[17].mxu1 }
 0x7e0   :  { %v1012_v22 = vadd.f32 %v1226_v17, %v1011_v2  ;;  %v1356_v24 = vpop.f32.mrb[18].mxu1 }
 0x7e1   :  { %v1023_v26 = vadd.f32 %v1356_v24, %v1226_v17  ;;  %v1014_v28 = vpop.f32.mrb[19].mxu1  ;;  %v1060_v30 = vmax.f32 %v1020_v20, 0.0 }
 0x7e2   :  { %v1015_v29 = vadd.f32 %v1226_v17, %v1014_v28  ;;  %v1058_v32 = vmax.f32 %v1012_v22, 0.0 }
 0x7e3   :  { %v1061_v33 = vmax.f32 %v1023_v26, 0.0  ;;  %v1072_v34 = vsel %vm194_vm14, %v1060_v30, 0.0  ;;  %vm1114_vm14 = vcmask 519168  }
 0x7e4   :  { %v1059_v12 = vmax.f32 %v1015_v29, 0.0  ;;  %v1070_v10 = vsel %vm192_vm8, %v1058_v32, 0.0  ;;  %v1076_v16 = vmax.f32 %v1072_v34, 0.0  ;;  %vm1860_vm8 = vcmp.lt.f32.partialorder %v1687_v8, 1e+30 }
 0x7e5   :  { %v1073_v40 = vsel %vm195_vm3, %v1061_v33, 0.0  ;;  %v1074_v58 = vmax.f32 %v1070_v10, 0.0  ;;  %v1395_v34 = vmov 839922192   ;;  %vm1171_vm3 = vcmask 527872  }
 0x7e6   :  { %v1359_v13 = vpop.f32.mrb[20].mxu1  ;;  %v1071_v52 = vsel %vm193_vm12, %v1059_v12, 0.0  ;;  %v1077_v62 = vmax.f32 %v1073_v40, 0.0  ;;  %vm1861_vm12 = vcmp.lt.f32.partialorder %v1691_v14, 1e+30 }
 0x7e7   :  { %v1036_v9 = vadd.f32 %v1359_v13, %v1226_v17  ;;  %v1027_v35 = vpop.f32.mrb[21].mxu1  ;;  %v1075_v54 = vmax.f32 %v1071_v52, 0.0 }
 0x7e8   :  { %v1028_v36 = vadd.f32 %v1226_v17, %v1027_v35  ;;  %v1360_v37 = vpop.f32.mrb[22].mxu1  ;;  %v1396_v35 = vmov 1985246804  }
 0x7e9   :  { %v1064_v44 = vmax.f32 %v1036_v9, 0.0  ;;  %v1039_v45 = vadd.f32 %v1360_v37, %v1226_v17  ;;  %v1030_v49 = vpop.f32.mrb[23].mxu1  ;;  %v1140_v9 = vunpack.c.l.s4 %v1395_v34  ;;  %v1147_v10 = vunpack.c.l.s4 %v1396_v35 }
 0x7ea   :  { %v1062_v55 = vmax.f32 %v1028_v36, 0.0  ;;  %v1031_v53 = vadd.f32 %v1226_v17, %v1030_v49 }
 0x7eb   :  { %v1080_v61 = vsel %vm308_vm13, %v1064_v44, 0.0  ;;  %v1065_v48 = vmax.f32 %v1039_v45, 0.0  ;;  %v1141_v36 = vunpack.c.0.s8 %v1140_v9  ;;  %v1148_v37 = vunpack.c.0.s8 %v1147_v10 }
 0x7ec   :  { %v1084_v63 = vmax.f32 %v1076_v16, %v1080_v61  ;;  %v1078_v60 = vsel %vm306_vm5, %v1062_v55, 0.0  ;;  %v1063_v39 = vmax.f32 %v1031_v53, 0.0 }
 0x7ed   :  { %v1082_v43 = vmax.f32 %v1074_v58, %v1078_v60  ;;  %v1081_v1 = vsel %vm309_vm4, %v1065_v48, 0.0  ;;  %v1144_v44 = vsub.s32 %v1141_v36, %v1505_v27  ;;  %v1151_v45 = vsub.s32 %v1148_v37, %v1505_v27 }
 0x7ee   :  { %v1085_v50 = vmax.f32 %v1077_v62, %v1081_v1  ;;  %v1079_v41 = vsel %vm1859_vm9, %v1063_v39, 0.0 }
 0x7ef   :  { %v1083_v51 = vmax.f32 %v1075_v54, %v1079_v41 }
 0x8b0   :  { %v1363_v47 = vpop.f32.mrb[24].mxu1 }
 0x8b1   :  { %v1052_v23 = vadd.f32 %v1363_v47, %v1226_v17  ;;  %v1043_v57 = vpop.f32.mrb[25].mxu1 }
 0x8b2   :  { %v1044_v59 = vadd.f32 %v1226_v17, %v1043_v57  ;;  %v1364_v38 = vpop.f32.mrb[26].mxu1 }
 0x8b3   :  { %v1068_v42 = vmax.f32 %v1052_v23, 0.0  ;;  %v1055_v0 = vadd.f32 %v1364_v38, %v1226_v17  ;;  %v1046_v19 = vpop.f32.mrb[27].mxu1 }
 0x8b4   :  { %v1066_v5 = vmax.f32 %v1044_v59, 0.0  ;;  %v1047_v11 = vadd.f32 %v1226_v17, %v1046_v19 }
 0x8b5   :  { %v1088_v4 = vsel %vm422_vm2, %v1068_v42, 0.0  ;;  %v1069_v31 = vmax.f32 %v1055_v0, 0.0 }
 0x8b6   :  { %v1092_v46 = vmax.f32 %v1084_v63, %v1088_v4  ;;  %v1086_v21 = vsel %vm1860_vm8, %v1066_v5, 0.0  ;;  %v1067_v56 = vmax.f32 %v1047_v11, 0.0 }
 0x8b7   :  { %v1090_v6 = vmax.f32 %v1082_v43, %v1086_v21  ;;  %v1089_v7 = vsel %vm423_vm11, %v1069_v31, 0.0 }
 0x8b8   :  { %v1093_v3 = vmax.f32 %v1085_v50, %v1089_v7  ;;  %v1087_v18 = vsel %vm1861_vm12, %v1067_v56, 0.0  ;;  %v1096_v20 = vmul.f32 0.999995, %v1092_v46 }
 0x8b9   :  { %v1091_v2 = vmax.f32 %v1083_v51, %v1087_v18  ;;  %v1094_v17 = vmul.f32 0.999995, %v1090_v6 }
 0x8ba   :  { %v1243_v15 = vpack.c.bf16 %v1096_v20, %v1096_v20  ;;  %v1097_v22 = vmul.f32 0.999995, %v1093_v3  ;;  %v1121_v30 = vmul.f32 %v1096_v20, %v1096_v20 }
 0x8bb   :  { %v1119_v24 = vmul.f32 %v1094_v17, %v1094_v17  ;;  %v1241_v26 = vpack.c.bf16 %v1094_v17, %v1094_v17  ;;  %v1095_v28 = vmul.f32 0.999995, %v1091_v2 }
 0x8bc   :  { %1117 = vst.msk [vmem:[%s1855_s8 + $0x8] sm:$0xf] %vm1114_vm14, %v1243_v15  ;;  %v1244_v8 = vpack.c.bf16 %v1097_v22, %v1097_v22  ;;  %v1122_v33 = vmul.f32 %v1097_v22, %v1097_v22  ;;  %v1129_v12 = vsel %vm958_vm0, %v1121_v30, 0.0 }
 0x8bd   :  { %v1123_v25 = vsel %vm958_vm0, %v1119_v24, 0.0  ;;  %1115 = vst.msk [vmem:[%s1855_s8] sm:$0xf] %vm1114_vm14, %v1241_v26  ;;  %v1120_v14 = vmul.f32 %v1095_v28, %v1095_v28  ;;  %v1242_v29 = vpack.c.bf16 %v1095_v28, %v1095_v28 }
 0x8be   :  { %1124 = vadd.xlane.f32.xlu1 %v1123_v25  ;;  %1118 = vst.msk [vmem:[%s1855_s8 + $0xc] sm:$0xf] %vm1114_vm14, %v1244_v8  ;;  %v1132_v13 = vsel %vm958_vm0, %v1122_v33, 0.0 }
 0x8bf   :  { %v1126_v32 = vsel %vm958_vm0, %v1120_v14, 0.0  ;;  %1116 = vst.msk [vmem:[%s1855_s8 + $0x4] sm:$0xf] %vm1114_vm14, %v1242_v29 }
 0x8c0   :  { %1127 = vadd.xlane.f32.xlu0 %v1126_v32 }
 0x8c2   :  { %1130 = vadd.xlane.f32.xlu1 %v1129_v12 }
 0x8c4   :  { %1133 = vadd.xlane.f32.xlu0 %v1132_v13 }
 0x94b   :  { %v1125_v40 = vpop.xlane.xlu1 %1124 }
 0x94d   :  { %v1128_v49 = vpop.xlane.xlu0 %1127 }
 0x94e   :  { %v1135_v16 = vpack.c.bf16 %v1128_v49, %v1125_v40 }
 0x94f   :  { %v1131_v53 = vpop.xlane.xlu1 %1130 }
 0x950   :  { %v1145_v52 = vrot.slane %v1135_v16, %v1144_v44  ;;  %v1152_v55 = vrot.slane %v1135_v16, %v1151_v45 }
 0x951   :  { %v1134_v58 = vpop.xlane.xlu0 %1133 }
 0x952   :  { %1172 = vst.msk [vmem:[%s1855_s8] sm:$0xf] %vm1171_vm3, %v1145_v52  ;;  %1173 = vst.msk [vmem:[%s1855_s8 + $0x4] sm:$0xf] %vm1171_vm3, %v1152_v55  ;;  %v1136_v61 = vpack.c.bf16 %v1134_v58, %v1131_v53 }
 0x954   :  { %v1159_v48 = vrot.slane %v1136_v61, %v1144_v44  ;;  %v1166_v62 = vrot.slane %v1136_v61, %v1151_v45 }
 0x956   :  { %1174 = vst.msk [vmem:[%s1855_s8 + $0x8] sm:$0xf] %vm1171_vm3, %v1159_v48  ;;  %1175 = vst.msk [vmem:[%s1855_s8 + $0xc] sm:$0xf] %vm1171_vm3, %v1166_v62 }

// kernel: net_forward.7
= control target key start
LH: loop header
LB: loop body
LE: loop exit
PB: predicated region body
PF: predicated region fallthrough
CT: control target
= control target key end

     0   :  { %v3715_v3 = vmov 0   ;;  %vm322_vm0 = vcmask 1040384   ;;  %vm315_vm1 = vcmask 531456   ;;  %vm2933_vm2 = vcmask 64512   ;;  %s4817_s4 = inlined_call_operand.vmem [shape: bf16[65,1024], index: 4, kind: input, shape index: {}]   ;;  %s4818_s3 = inlined_call_operand.vmem [shape: bf16[65,1024], index: 3, kind: input, shape index: {}]   ;;  %s4819_s1 = inlined_call_operand.vmem [shape: bf16[32,65], index: 1, kind: input, shape index: {}]   ;;  %s4820_s0 = inlined_call_operand.vmem [shape: bf16[32,65], index: 0, kind: input, shape index: {}]   ;;  %s4821_s2 = inlined_call_operand.vmem [shape: bf16[32,65], index: 2, kind: input, shape index: {}]   ;;  %s4822_s5 = inlined_call_operand.vmem [shape: bf16[65,1024], index: 5, kind: input, shape index: {}]   ;;  %s4823_s7 = inlined_call_operand.vmem [shape: bf16[1024,256], index: 7, kind: input, shape index: {}]   ;;  %s4824_s6 = inlined_call_operand.vmem [shape: f32[1,1024], index: 6, kind: input, shape index: {}]   ;;  %s4825_s9 = inlined_call_operand.vmem [shape: bf16[256,128], index: 9, kind: input, shape index: {}]   ;;  %s4826_s11 = inlined_call_operand.vmem [shape: bf16[128,8], index: 11, kind: input, shape index: {}]   ;;  %s4827_s8 = inlined_call_operand.vmem [shape: f32[1,256], index: 8, kind: input, shape index: {}]   ;;  %s4828_s10 = inlined_call_operand.vmem [shape: f32[1,128], index: 10, kind: input, shape index: {}]   ;;  %s4829_s12 = inlined_call_operand.vmem [shape: f32[1,8], index: 12, kind: input, shape index: {}]   ;;  %s4830_s13 = inlined_call_operand.vmem [shape: f32[32,8], index: 13, kind: output, shape index: {}]  }
   0x1   :  { %v89_v0 = vld [vmem:[%s4817_s4] sm:$0xff]  ;;  %381 = vmatprep.mubr.bf16.mxu1 %v3715_v3  ;;  %813 = vmatprep.mubr.bf16.mxu0 %v3715_v3  ;;  %v3843_v34 = vsel %vm322_vm0, 65535, %v3715_v3  ;;  %v90_v41 = vld [vmem:[%s4817_s4 + $0x8] sm:$0xff]  ;;  %v51_v44 = vld [vmem:[%s4818_s3 + $0x10] sm:$0xff] }
   0x2   :  { %v93_v1 = vld [vmem:[%s4817_s4 + $0x20] sm:$0xff]  ;;  %v94_v43 = vld [vmem:[%s4817_s4 + $0x28] sm:$0xff]  ;;  %v55_v45 = vld [vmem:[%s4818_s3 + $0x30] sm:$0xff] }
   0x3   :  { %v49_v2 = vld [vmem:[%s4818_s3] sm:$0xff]  ;;  %v2997_v4 = vcombine.high %v89_v0, %v93_v1  ;;  %v2996_v6 = vcombine.low %v89_v0, %v93_v1  ;;  %v2999_v48 = vcombine.high %v90_v41, %v94_v43  ;;  %v3051_v49 = vcombine.high %v51_v44, %v55_v45  ;;  %v98_v50 = vld [vmem:[%s4817_s4 + $0x48] sm:$0xff]  ;;  %v59_v53 = vld [vmem:[%s4818_s3 + $0x50] sm:$0xff] }
   0x4   :  { %v53_v5 = vld [vmem:[%s4818_s3 + $0x20] sm:$0xff]  ;;  %v102_v51 = vld [vmem:[%s4817_s4 + $0x68] sm:$0xff]  ;;  %v63_v54 = vld [vmem:[%s4818_s3 + $0x70] sm:$0xff]  ;;  %v2998_v55 = vcombine.low %v90_v41, %v94_v43  ;;  %v3050_v57 = vcombine.low %v51_v44, %v55_v45 }
   0x5   :  { %v97_v7 = vld [vmem:[%s4817_s4 + $0x40] sm:$0xff]  ;;  %v3047_v9 = vcombine.high %v49_v2, %v53_v5  ;;  %v3046_v10 = vcombine.low %v49_v2, %v53_v5  ;;  %349 = vmatprep.subr.bf16.mxu1 %v2997_v4  ;;  %v3007_v58 = vcombine.high %v98_v50, %v102_v51  ;;  %v3059_v59 = vcombine.high %v59_v53, %v63_v54  ;;  %v106_v60 = vld [vmem:[%s4817_s4 + $0x88] sm:$0xff]  ;;  %v67_v62 = vld [vmem:[%s4818_s3 + $0x90] sm:$0xff] }
   0x6   :  { %v101_v8 = vld [vmem:[%s4817_s4 + $0x60] sm:$0xff]  ;;  %350 = vmatpush1.bf16.msra.mxu1 %v2996_v6  ;;  %v110_v61 = vld [vmem:[%s4817_s4 + $0xa8] sm:$0xff]  ;;  %v71_v63 = vld [vmem:[%s4818_s3 + $0xb0] sm:$0xff]  ;;  %v3006_v0 = vcombine.low %v98_v50, %v102_v51  ;;  %v3058_v1 = vcombine.low %v59_v53, %v63_v54 }
   0x7   :  { %v3005_v11 = vcombine.high %v97_v7, %v101_v8  ;;  %v57_v12 = vld [vmem:[%s4818_s3 + $0x40] sm:$0xff]  ;;  %781 = vmatprep.subr.bf16.mxu0 %v3047_v9  ;;  %v3004_v19 = vcombine.low %v97_v7, %v101_v8  ;;  %v3015_v2 = vcombine.high %v106_v60, %v110_v61  ;;  %v3902_v4 = vld [vmem:[%s4819_s1 + $0x8] sm:$0xff]   ;;  %v3067_v7 = vcombine.high %v67_v62, %v71_v63  ;;  %v75_v9 = vld [vmem:[%s4818_s3 + $0xd0] sm:$0xff] }
   0x8   :  { %v61_v13 = vld [vmem:[%s4818_s3 + $0x60] sm:$0xff]  ;;  %782 = vmatpush1.bf16.msra.mxu0 %v3046_v10  ;;  %v114_v5 = vld [vmem:[%s4817_s4 + $0xc8] sm:$0xff]  ;;  %v79_v10 = vld [vmem:[%s4818_s3 + $0xf0] sm:$0xff] }
   0x9   :  { %v105_v14 = vld [vmem:[%s4817_s4 + $0x80] sm:$0xff]  ;;  %v3055_v15 = vcombine.high %v57_v12, %v61_v13  ;;  %351 = vmatprep.subr.bf16.mxu1 %v3005_v11  ;;  %v3054_v20 = vcombine.low %v57_v12, %v61_v13  ;;  %v118_v6 = vld [vmem:[%s4817_s4 + $0xe8] sm:$0xff]  ;;  %v83_v11 = vld [vmem:[%s4818_s3 + $0x110] sm:$0x11]  ;;  %v3014_v12 = vcombine.low %v106_v60, %v110_v61 }
   0xa   :  { %v109_v16 = vld [vmem:[%s4817_s4 + $0xa0] sm:$0xff]  ;;  %352 = vmatpush1.bf16.msra.mxu1 %v3004_v19  ;;  %v122_v8 = vld [vmem:[%s4817_s4 + $0x108] sm:$0x11]  ;;  %v3022_v19 = vcombine.low %v114_v5, %v118_v6  ;;  %v103_v41 = vld [vmem:[%s4817_s4 + $0x70] sm:$0xff] }
   0xb   :  { %v65_v17 = vld [vmem:[%s4818_s3 + $0x80] sm:$0xff]  ;;  %v3013_v21 = vcombine.high %v105_v14, %v109_v16  ;;  %783 = vmatprep.subr.bf16.mxu0 %v3055_v15  ;;  %v3012_v29 = vcombine.low %v105_v14, %v109_v16  ;;  %v3927_v13 = vld [vmem:[%s4820_s0 + $0x8] sm:$0xff]   ;;  %v3066_v14 = vcombine.low %v67_v62, %v71_v63  ;;  %v3023_v15 = vcombine.high %v114_v5, %v118_v6  ;;  %v119_v6 = vld [vmem:[%s4817_s4 + $0xf0] sm:$0xff] }
   0xc   :  { %v69_v18 = vld [vmem:[%s4818_s3 + $0xa0] sm:$0xff]  ;;  %784 = vmatpush1.bf16.msra.mxu0 %v3054_v20  ;;  %v3031_v16 = vcombine.high %v122_v8, %v122_v8  ;;  %v3030_v20 = vcombine.low %v122_v8, %v122_v8  ;;  %v1030_v44 = vld [vmem:[%s4822_s5 + $0x108] sm:$0x11] }
   0xd   :  { %v113_v22 = vld [vmem:[%s4817_s4 + $0xc0] sm:$0xff]  ;;  %v3063_v24 = vcombine.high %v65_v17, %v69_v18  ;;  %353 = vmatprep.subr.bf16.mxu1 %v3013_v21  ;;  %v3062_v30 = vcombine.low %v65_v17, %v69_v18  ;;  %v3075_v17 = vcombine.high %v75_v9, %v79_v10  ;;  %v3083_v18 = vcombine.high %v83_v11, %v83_v11  ;;  %v82_v21 = vld [vmem:[%s4818_s3 + $0x108] sm:$0x11] }
   0xe   :  { %v117_v23 = vld [vmem:[%s4817_s4 + $0xe0] sm:$0xff]  ;;  %354 = vmatpush1.bf16.msra.mxu1 %v3012_v29  ;;  %v3130_v53 = vcombine.low %v1030_v44, %v1030_v44 }
   0xf   :  { %v121_v25 = vld [vmem:[%s4817_s4 + $0x100] sm:$0x11]  ;;  %v3021_v31 = vcombine.high %v113_v22, %v117_v23  ;;  %785 = vmatprep.subr.bf16.mxu0 %v3063_v24  ;;  %v3020_v36 = vcombine.low %v113_v22, %v117_v23  ;;  %v3074_v22 = vcombine.low %v75_v9, %v79_v10  ;;  %v335_v23 = vand.u32 %v3031_v16, %v3843_v34 }
  0x10   :  { %v73_v26 = vld [vmem:[%s4818_s3 + $0xc0] sm:$0xff]  ;;  %v3029_v32 = vcombine.high %v121_v25, %v121_v25  ;;  %v3028_v37 = vcombine.low %v121_v25, %v121_v25  ;;  %786 = vmatpush1.bf16.msra.mxu0 %v3062_v30  ;;  %v3082_v24 = vcombine.low %v83_v11, %v83_v11  ;;  %v91_v25 = vld [vmem:[%s4817_s4 + $0x10] sm:$0xff]  ;;  %v3080_v30 = vcombine.low %v82_v21, %v82_v21 }
  0x11   :  { %v77_v27 = vld [vmem:[%s4818_s3 + $0xe0] sm:$0xff]  ;;  %355 = vmatprep.subr.bf16.mxu1 %v3021_v31  ;;  %v3081_v31 = vcombine.high %v82_v21, %v82_v21  ;;  %v4002_v62 = vand.u32 %v3130_v53, %v3843_v34  ;;  %v123_v11 = vld [vmem:[%s4817_s4 + $0x110] sm:$0x11] }
  0x12   :  { %v81_v28 = vld [vmem:[%s4818_s3 + $0x100] sm:$0x11]  ;;  %v3071_v33 = vcombine.high %v73_v26, %v77_v27  ;;  %v3070_v38 = vcombine.low %v73_v26, %v77_v27  ;;  %v329_v39 = vand.u32 %v3029_v32, %v3843_v34  ;;  %356 = vmatpush1.bf16.msra.mxu1 %v3020_v36  ;;  %v326_v46 = vand.u32 %v3028_v37, %v3843_v34  ;;  %v95_v26 = vld [vmem:[%s4817_s4 + $0x30] sm:$0xff]  ;;  %v84_v32 = vld [vmem:[%s4818_s3 + $0x118] sm:$0x11] }
  0x13   :  { %v3079_v35 = vcombine.high %v81_v28, %v81_v28  ;;  %v3078_v40 = vcombine.low %v81_v28, %v81_v28  ;;  %v3870_v52 = vld [vmem:[%s4819_s1] sm:$0xff]   ;;  %v773_v27 = vand.u32 %v3083_v18, %v3843_v34  ;;  %v770_v36 = vand.u32 %v3082_v24, %v3843_v34  ;;  %v1015_v53 = vld [vmem:[%s4822_s5 + $0x90] sm:$0xff] }
  0x14   :  { %787 = vmatprep.subr.bf16.mxu0 %v3071_v33  ;;  %357 = vmatprep.subr.bf16.mxu1 %v329_v39  ;;  %v3881_v56 = vld [vmem:[%s4820_s0] sm:$0xff]   ;;  %v332_v33 = vand.u32 %v3030_v20, %v3843_v34  ;;  %v3958_v37 = vand.u32 %v3081_v31, %v3843_v34  ;;  %v3085_v43 = vcombine.high %v84_v32, %v84_v32  ;;  %v1003_v31 = vld [vmem:[%s4822_s5 + $0x30] sm:$0xff] }
  0x15   :  { %v761_v42 = vand.u32 %v3079_v35, %v3843_v34  ;;  %788 = vmatpush1.bf16.msra.mxu0 %v3070_v38  ;;  %v758_v47 = vand.u32 %v3078_v40, %v3843_v34  ;;  %v997_v28 = vld [vmem:[%s4822_s5] sm:$0xff]  ;;  %v3001_v35 = vcombine.high %v91_v25, %v95_v26  ;;  %v3961_v38 = vand.u32 %v3080_v30, %v3843_v34  ;;  %v99_v40 = vld [vmem:[%s4817_s4 + $0x50] sm:$0xff] }
  0x16   :  { %358 = vmatpush1.bf16.msra.mxu1 %v326_v46  ;;  %v1001_v29 = vld [vmem:[%s4822_s5 + $0x20] sm:$0xff]  ;;  %v3009_v51 = vcombine.high %v99_v40, %v103_v41  ;;  %v3008_v63 = vcombine.low %v99_v40, %v103_v41  ;;  %v3033_v20 = vcombine.high %v123_v11, %v123_v11  ;;  %v3032_v24 = vcombine.low %v123_v11, %v123_v11  ;;  %v999_v30 = vld [vmem:[%s4822_s5 + $0x10] sm:$0xff] }
  0x17   :  { %789 = vmatprep.subr.bf16.mxu0 %v761_v42  ;;  %402 = vmatprep.subr.bf16.mxu1 %v2999_v48  ;;  %v3097_v39 = vcombine.high %v997_v28, %v1001_v29  ;;  %v3084_v42 = vcombine.low %v84_v32, %v84_v32  ;;  %v1005_v45 = vld [vmem:[%s4822_s5 + $0x40] sm:$0xff]  ;;  %v3979_v48 = vand.u32 %v3085_v43, %v3843_v34  ;;  %v1007_v41 = vld [vmem:[%s4822_s5 + $0x50] sm:$0xff] }
  0x18   :  { %v1009_v46 = vld [vmem:[%s4822_s5 + $0x60] sm:$0xff]  ;;  %v3096_v50 = vcombine.low %v997_v28, %v1001_v29  ;;  %v341_v28 = vand.u32 %v3033_v20, %v3843_v34  ;;  %v54_v20 = vld [vmem:[%s4818_s3 + $0x28] sm:$0xff] }
  0x19   :  { %790 = vmatpush1.bf16.msra.mxu0 %v758_v47  ;;  %3036 = vmatmul.mubr.msk.bf16.vlgmr.msra.gmra.mrb[0].mxu1 %vm315_vm1, %v3870_v52  ;;  %v3000_v47 = vcombine.low %v91_v25, %v95_v26  ;;  %v3105_v54 = vcombine.high %v1005_v45, %v1009_v46  ;;  %v1013_v60 = vld [vmem:[%s4822_s5 + $0x80] sm:$0xff]  ;;  %v92_v25 = vld [vmem:[%s4817_s4 + $0x18] sm:$0xff] }
  0x1a   :  { %887 = vmatprep.subr.bf16.mxu0 %v3051_v49  ;;  %403 = vmatpush1.bf16.msra.mxu1 %v2998_v55  ;;  %v3982_v49 = vand.u32 %v3084_v42, %v3843_v34  ;;  %v107_v55 = vld [vmem:[%s4817_s4 + $0x90] sm:$0xff]  ;;  %v1017_v61 = vld [vmem:[%s4822_s5 + $0xa0] sm:$0xff]  ;;  %v96_v26 = vld [vmem:[%s4817_s4 + $0x38] sm:$0xff] }
  0x1b   :  { %404 = vmatprep.subr.bf16.mxu1 %v3007_v58  ;;  %391 = vmatprep.mubr.bf16.mxu1 %v3715_v3  ;;  %v3131_v58 = vcombine.high %v1030_v44, %v1030_v44  ;;  %v3113_v9 = vcombine.high %v1013_v60, %v1017_v61  ;;  %v1021_v10 = vld [vmem:[%s4822_s5 + $0xc0] sm:$0xff]  ;;  %v3112_v18 = vcombine.low %v1013_v60, %v1017_v61  ;;  %v1011_v42 = vld [vmem:[%s4822_s5 + $0x70] sm:$0xff]  ;;  %v124_v60 = vld [vmem:[%s4817_s4 + $0x118] sm:$0x11] }
  0x1c   :  { %3086 = vmatmul.mubr.msk.bf16.vlgmr.msra.gmra.mrb[0].mxu0 %vm315_vm1, %v3881_v56  ;;  %v3003_v40 = vcombine.high %v92_v25, %v96_v26  ;;  %v4072_v43 = vld [vmem:[%s4821_s2] sm:$0xff]   ;;  %v3101_v44 = vcombine.high %v999_v30, %v1003_v31  ;;  %v3108_v61 = vcombine.low %v1007_v41, %v1011_v42  ;;  %v3035_v11 = vcombine.high %v124_v60, %v124_v60 }
  0x1d   :  { %888 = vmatpush1.bf16.msra.mxu0 %v3050_v57  ;;  %823 = vmatprep.mubr.bf16.mxu0 %v3715_v3  ;;  %v111_v57 = vld [vmem:[%s4817_s4 + $0xb0] sm:$0xff] }
  0x1e   :  { %889 = vmatprep.subr.bf16.mxu0 %v3059_v59  ;;  %405 = vmatpush1.bf16.msra.mxu1 %v3006_v0  ;;  %v1032_v59 = vld [vmem:[%s4822_s5 + $0x118] sm:$0x11]  ;;  %v3104_v0 = vcombine.low %v1005_v45, %v1009_v46  ;;  %v3017_v5 = vcombine.high %v107_v55, %v111_v57  ;;  %v3002_v45 = vcombine.low %v92_v25, %v96_v26  ;;  %v58_v26 = vld [vmem:[%s4818_s3 + $0x48] sm:$0xff] }
  0x1f   :  { %406 = vmatprep.subr.bf16.mxu1 %v3015_v2  ;;  %v4010_v2 = vand.u32 %v3131_v58, %v3843_v34  ;;  %v3135_v8 = vcombine.high %v1032_v59, %v1032_v59  ;;  %v108_v46 = vld [vmem:[%s4817_s4 + $0x98] sm:$0xff] }
  0x20   :  { %v116_v58 = vld [vmem:[%s4817_s4 + $0xd8] sm:$0xff] }
  0x21   :  { %890 = vmatpush1.bf16.msra.mxu0 %v3058_v1  ;;  %3037 = vmatmul.mubr.msk.bf16.gmra.mrb[4].mxu1 %vm315_vm1, %v3902_v4  ;;  %v115_v1 = vld [vmem:[%s4817_s4 + $0xd0] sm:$0xff] }
  0x22   :  { %891 = vmatprep.subr.bf16.mxu0 %v3067_v7  ;;  %407 = vmatpush1.bf16.msra.mxu1 %v3014_v12  ;;  %v3134_v7 = vcombine.low %v1032_v59, %v1032_v59  ;;  %v1025_v12 = vld [vmem:[%s4822_s5 + $0xe0] sm:$0xff]  ;;  %v120_v59 = vld [vmem:[%s4817_s4 + $0xf8] sm:$0xff] }
  0x23   :  { %408 = vmatprep.subr.bf16.mxu1 %v3023_v15  ;;  %434 = vmatprep.mubr.bf16.mxu1 %v3715_v3  ;;  %v4030_v15 = vand.u32 %v3135_v8, %v3843_v34  ;;  %v3121_v21 = vcombine.high %v1021_v10, %v1025_v12 }
  0x24   :  { %3087 = vmatmul.mubr.msk.bf16.gmra.mrb[4].mxu0 %vm315_vm1, %v3927_v13  ;;  %v4033_v16 = vand.u32 %v3134_v7, %v3843_v34 }
  0x25   :  { %892 = vmatpush1.bf16.msra.mxu0 %v3066_v14  ;;  %919 = vmatprep.mubr.bf16.mxu0 %v3715_v3  ;;  %v1029_v14 = vld [vmem:[%s4822_s5 + $0x100] sm:$0x11] }
  0x26   :  { %893 = vmatprep.subr.bf16.mxu0 %v3075_v17  ;;  %409 = vmatpush1.bf16.msra.mxu1 %v3022_v19  ;;  %v3016_v17 = vcombine.low %v107_v55, %v111_v57  ;;  %v3025_v19 = vcombine.high %v115_v1, %v119_v6  ;;  %v3128_v29 = vcombine.low %v1029_v14, %v1029_v14 }
  0x27   :  { %410 = vmatprep.subr.bf16.mxu1 %v335_v23  ;;  %v3024_v23 = vcombine.low %v115_v1, %v119_v6  ;;  %v3109_v55 = vcombine.high %v1007_v41, %v1011_v42  ;;  %v1027_v1 = vld [vmem:[%s4822_s5 + $0xf0] sm:$0xff]  ;;  %v4112_v6 = vld [vmem:[%s4821_s2 + $0x8] sm:$0xff]   ;;  %v52_v42 = vld [vmem:[%s4818_s3 + $0x18] sm:$0xff] }
  0x29   :  { %894 = vmatpush1.bf16.msra.mxu0 %v3074_v22  ;;  %v3129_v22 = vcombine.high %v1029_v14, %v1029_v14 }
  0x2a   :  { %895 = vmatprep.subr.bf16.mxu0 %v773_v27  ;;  %411 = vmatpush1.bf16.msra.mxu1 %v332_v33  ;;  %v3120_v27 = vcombine.low %v1021_v10, %v1025_v12  ;;  %v338_v33 = vand.u32 %v3032_v24, %v3843_v34  ;;  %v3027_v10 = vcombine.high %v116_v58, %v120_v59 }
  0x2b   :  { %455 = vmatprep.subr.bf16.mxu1 %v3001_v35  ;;  %v1233_v32 = vand.u32 %v3129_v22, %v3843_v34  ;;  %v100_v35 = vld [vmem:[%s4817_s4 + $0x58] sm:$0xff]  ;;  %v347_v22 = vand.u32 %v3035_v11, %v3843_v34  ;;  %v1026_v11 = vld [vmem:[%s4822_s5 + $0xe8] sm:$0xff] }
  0x2d   :  { %896 = vmatpush1.bf16.msra.mxu0 %v770_v36  ;;  %3038 = vmatmul.mubr.msk.bf16.vlgmr.msra.gmra.mrb[8].mxu1 %vm315_vm1, %v3870_v52  ;;  %v104_v36 = vld [vmem:[%s4817_s4 + $0x78] sm:$0xff] }
  0x2e   :  { %1253 = vmatprep.subr.bf16.mxu0 %v3097_v39  ;;  %456 = vmatpush1.bf16.msra.mxu1 %v3000_v47  ;;  %v1230_v39 = vand.u32 %v3128_v29, %v3843_v34  ;;  %v112_v47 = vld [vmem:[%s4817_s4 + $0xb8] sm:$0xff]  ;;  %v3010_v57 = vcombine.low %v100_v35, %v104_v36 }
  0x2f   :  { %457 = vmatprep.subr.bf16.mxu1 %v3009_v51  ;;  %444 = vmatprep.mubr.bf16.mxu1 %v3715_v3  ;;  %v3011_v51 = vcombine.high %v100_v35, %v104_v36  ;;  %v3018_v8 = vcombine.low %v108_v46, %v112_v47  ;;  %v74_v35 = vld [vmem:[%s4818_s3 + $0xc8] sm:$0xff] }
  0x30   :  { %3090 = vmatmul.mubr.msk.bf16.vlgmr.msra.gmra.mrb[8].mxu0 %vm315_vm1, %v3881_v56  ;;  %v78_v36 = vld [vmem:[%s4818_s3 + $0xe8] sm:$0xff] }
  0x31   :  { %1254 = vmatpush1.bf16.msra.mxu0 %v3096_v50  ;;  %929 = vmatprep.mubr.bf16.mxu0 %v3715_v3  ;;  %v3100_v50 = vcombine.low %v999_v30, %v1003_v31  ;;  %v66_v31 = vld [vmem:[%s4818_s3 + $0x88] sm:$0xff]  ;;  %v3072_v41 = vcombine.low %v74_v35, %v78_v36 }
  0x32   :  { %1255 = vmatprep.subr.bf16.mxu0 %v3105_v54  ;;  %458 = vmatpush1.bf16.msra.mxu1 %v3008_v63  ;;  %v1019_v54 = vld [vmem:[%s4822_s5 + $0xb0] sm:$0xff]  ;;  %v3019_v63 = vcombine.high %v108_v46, %v112_v47  ;;  %v64_v46 = vld [vmem:[%s4818_s3 + $0x78] sm:$0xff] }
  0x33   :  { %459 = vmatprep.subr.bf16.mxu1 %v3017_v5  ;;  %v1031_v5 = vld [vmem:[%s4822_s5 + $0x110] sm:$0x11]  ;;  %v3117_v7 = vcombine.high %v1015_v53, %v1019_v54 }
  0x34   :  { %v3133_v14 = vcombine.high %v1031_v5, %v1031_v5 }
  0x35   :  { %1256 = vmatpush1.bf16.msra.mxu0 %v3104_v0  ;;  %3039 = vmatmul.mubr.msk.bf16.gmra.mrb[12].mxu1 %vm315_vm1, %v3902_v4  ;;  %v1023_v0 = vld [vmem:[%s4822_s5 + $0xd0] sm:$0xff] }
  0x36   :  { %1257 = vmatprep.subr.bf16.mxu0 %v3113_v9  ;;  %460 = vmatpush1.bf16.msra.mxu1 %v3016_v17  ;;  %v3116_v9 = vcombine.low %v1015_v53, %v1019_v54  ;;  %v3125_v12 = vcombine.high %v1023_v0, %v1027_v1  ;;  %v3026_v17 = vcombine.low %v116_v58, %v120_v59  ;;  %v76_v54 = vld [vmem:[%s4818_s3 + $0xd8] sm:$0xff] }
  0x37   :  { %461 = vmatprep.subr.bf16.mxu1 %v3025_v19  ;;  %487 = vmatprep.mubr.bf16.mxu1 %v3715_v3  ;;  %v50_v19 = vld [vmem:[%s4818_s3 + $0x8] sm:$0xff]  ;;  %v1245_v24 = vand.u32 %v3133_v14, %v3843_v34 }
  0x38   :  { %3091 = vmatmul.mubr.msk.bf16.gmra.mrb[12].mxu0 %vm315_vm1, %v3927_v13  ;;  %v3049_v29 = vcombine.high %v50_v19, %v54_v20  ;;  %v3048_v30 = vcombine.low %v50_v19, %v54_v20  ;;  %v1012_v20 = vld [vmem:[%s4822_s5 + $0x78] sm:$0xff] }
  0x39   :  { %1258 = vmatpush1.bf16.msra.mxu0 %v3112_v18  ;;  %1285 = vmatprep.mubr.bf16.mxu0 %v3715_v3  ;;  %v3034_v18 = vcombine.low %v124_v60, %v124_v60  ;;  %v998_v60 = vld [vmem:[%s4822_s5 + $0x8] sm:$0xff] }
  0x3a   :  { %1259 = vmatprep.subr.bf16.mxu0 %v3121_v21  ;;  %462 = vmatpush1.bf16.msra.mxu1 %v3024_v23  ;;  %v3124_v21 = vcombine.low %v1023_v0, %v1027_v1  ;;  %v3132_v23 = vcombine.low %v1031_v5, %v1031_v5  ;;  %v1006_v0 = vld [vmem:[%s4822_s5 + $0x48] sm:$0xff] }
  0x3b   :  { %463 = vmatprep.subr.bf16.mxu1 %v341_v28  ;;  %v344_v25 = vand.u32 %v3034_v18, %v3843_v34  ;;  %v1010_v1 = vld [vmem:[%s4822_s5 + $0x68] sm:$0xff]  ;;  %v1004_v18 = vld [vmem:[%s4822_s5 + $0x38] sm:$0xff] }
  0x3c   :  { %v1242_v28 = vand.u32 %v3132_v23, %v3843_v34  ;;  %v1016_v23 = vld [vmem:[%s4822_s5 + $0x98] sm:$0xff] }
  0x3d   :  { %1260 = vmatpush1.bf16.msra.mxu0 %v3120_v27  ;;  %v62_v27 = vld [vmem:[%s4818_s3 + $0x68] sm:$0xff] }
  0x3e   :  { %1261 = vmatprep.subr.bf16.mxu0 %v1233_v32  ;;  %464 = vmatpush1.bf16.msra.mxu1 %v338_v33  ;;  %v70_v32 = vld [vmem:[%s4818_s3 + $0xa8] sm:$0xff]  ;;  %v3057_v33 = vcombine.high %v58_v26, %v62_v27  ;;  %v3056_v34 = vcombine.low %v58_v26, %v62_v27  ;;  %v1028_v26 = vld [vmem:[%s4822_s5 + $0xf8] sm:$0xff] }
  0x3f   :  { %508 = vmatprep.subr.bf16.mxu1 %v3003_v40  ;;  %v3073_v40 = vcombine.high %v74_v35, %v78_v36  ;;  %v3531_v35 = vld [vmem:[%s4823_s7 + $0x100] ss:$8 sps:$4 sm:$0xff]   ;;  %v3497_v36 = vld [vmem:[%s4823_s7 + $0x44] ss:$8 sps:$4 sm:$0xff]  }
  0x41   :  { %1262 = vmatpush1.bf16.msra.mxu0 %v1230_v39  ;;  %3040 = vmatmul.mubr.msk.bf16.vlgmr.msra.gmra.mrb[16].mxu1 %vm315_vm1, %v3870_v52  ;;  %v3065_v39 = vcombine.high %v66_v31, %v70_v32 }
  0x42   :  { %1359 = vmatprep.subr.bf16.mxu0 %v3101_v44  ;;  %509 = vmatpush1.bf16.msra.mxu1 %v3002_v45  ;;  %v56_v44 = vld [vmem:[%s4818_s3 + $0x38] sm:$0xff] }
  0x43   :  { %510 = vmatprep.subr.bf16.mxu1 %v3011_v51  ;;  %497 = vmatprep.mubr.bf16.mxu1 %v3715_v3  ;;  %v60_v45 = vld [vmem:[%s4818_s3 + $0x58] sm:$0xff]  ;;  %v3052_v47 = vcombine.low %v52_v42, %v56_v44 }
  0x44   :  { %3136 = vmatmul.mubr.msk.bf16.vlgmr.msra.gmra.mrb[0].mxu0 %vm315_vm1, %v4072_v43  ;;  %v68_v51 = vld [vmem:[%s4818_s3 + $0x98] sm:$0xff]  ;;  %v3060_v53 = vcombine.low %v60_v45, %v64_v46 }
  0x45   :  { %1360 = vmatpush1.bf16.msra.mxu0 %v3100_v50  ;;  %1295 = vmatprep.mubr.bf16.mxu0 %v3715_v3  ;;  %v3061_v50 = vcombine.high %v60_v45, %v64_v46  ;;  %v3540_v45 = vld [vmem:[%s4823_s7 + $0x130] ss:$8 sps:$4 sm:$0xff]   ;;  %v3542_v46 = vld [vmem:[%s4823_s7 + $0x134] ss:$8 sps:$4 sm:$0xff]  }
  0x46   :  { %1361 = vmatprep.subr.bf16.mxu0 %v3109_v55  ;;  %511 = vmatpush1.bf16.msra.mxu1 %v3010_v57  ;;  %v80_v55 = vld [vmem:[%s4818_s3 + $0xf8] sm:$0xff] }
  0x47   :  { %512 = vmatprep.subr.bf16.mxu1 %v3019_v63  ;;  %v3077_v58 = vcombine.high %v76_v54, %v80_v55  ;;  %v3076_v59 = vcombine.low %v76_v54, %v80_v55  ;;  %v3509_v54 = vld [vmem:[%s4823_s7 + $0x84] ss:$8 sps:$4 sm:$0xff]   ;;  %v3546_v55 = vld [vmem:[%s4823_s7 + $0x150] ss:$8 sps:$4 sm:$0xff]  }
  0x49   :  { %1362 = vmatpush1.bf16.msra.mxu0 %v3108_v61  ;;  %3041 = vmatmul.mubr.msk.bf16.gmra.mrb[20].mxu1 %vm315_vm1, %v3902_v4  ;;  %v1002_v61 = vld [vmem:[%s4822_s5 + $0x28] sm:$0xff] }
  0x4a   :  { %1363 = vmatprep.subr.bf16.mxu0 %v3117_v7  ;;  %513 = vmatpush1.bf16.msra.mxu1 %v3018_v8  ;;  %v3099_v63 = vcombine.high %v998_v60, %v1002_v61  ;;  %v3098_v5 = vcombine.low %v998_v60, %v1002_v61  ;;  %v3107_v7 = vcombine.high %v1006_v0, %v1010_v1  ;;  %v1014_v8 = vld [vmem:[%s4822_s5 + $0x88] sm:$0xff]  ;;  %v3554_v61 = vld [vmem:[%s4823_s7 + $0x174] ss:$8 sps:$4 sm:$0xff]  }
  0x4b   :  { %514 = vmatprep.subr.bf16.mxu1 %v3027_v10  ;;  %540 = vmatprep.mubr.bf16.mxu1 %v3715_v3  ;;  %v1022_v10 = vld [vmem:[%s4822_s5 + $0xc8] sm:$0xff] }
  0x4c   :  { %3137 = vmatmul.mubr.msk.bf16.gmra.mrb[4].mxu0 %vm315_vm1, %v4112_v6  ;;  %v3123_v14 = vcombine.high %v1022_v10, %v1026_v11  ;;  %v3549_v60 = vld [vmem:[%s4823_s7 + $0x160] ss:$8 sps:$4 sm:$0xff]  }
  0x4d   :  { %1364 = vmatpush1.bf16.msra.mxu0 %v3116_v9  ;;  %1391 = vmatprep.mubr.bf16.mxu0 %v3715_v3  ;;  %v3106_v9 = vcombine.low %v1006_v0, %v1010_v1  ;;  %v3515_v0 = vld [vmem:[%s4823_s7 + $0xa4] ss:$8 sps:$4 sm:$0xff]   ;;  %v3552_v1 = vld [vmem:[%s4823_s7 + $0x170] ss:$8 sps:$4 sm:$0xff]  }
  0x4e   :  { %1365 = vmatprep.subr.bf16.mxu0 %v3125_v12  ;;  %515 = vmatpush1.bf16.msra.mxu1 %v3026_v17  ;;  %v1000_v17 = vld [vmem:[%s4822_s5 + $0x18] sm:$0xff] }
  0x4f   :  { %516 = vmatprep.subr.bf16.mxu1 %v347_v22  ;;  %v3103_v19 = vcombine.high %v1000_v17, %v1004_v18 }
  0x51   :  { %1366 = vmatpush1.bf16.msra.mxu0 %v3124_v21  ;;  %v3102_v21 = vcombine.low %v1000_v17, %v1004_v18  ;;  %v3561_v17 = vld [vmem:[%s4823_s7 + $0x1a0] ss:$8 sps:$4 sm:$0xff]   ;;  %v3566_v18 = vld [vmem:[%s4823_s7 + $0x1b4] ss:$8 sps:$4 sm:$0xff]  }
  0x52   :  { %1367 = vmatprep.subr.bf16.mxu0 %v1245_v24  ;;  %517 = vmatpush1.bf16.msra.mxu1 %v344_v25  ;;  %v1024_v25 = vld [vmem:[%s4822_s5 + $0xd8] sm:$0xff] }
  0x53   :  { %834 = vmatprep.subr.bf16.mxu1 %v3049_v29  ;;  %v3126_v29 = vcombine.low %v1024_v25, %v1028_v26 }
  0x55   :  { %1368 = vmatpush1.bf16.msra.mxu0 %v1242_v28  ;;  %3042 = vmatmul.mubr.msk.bf16.vlgmr.msra.gmra.mrb[24].mxu1 %vm315_vm1, %v3870_v52  ;;  %v3064_v52 = vcombine.low %v66_v31, %v70_v32  ;;  %v3127_v28 = vcombine.high %v1024_v25, %v1028_v26  ;;  %v3483_v31 = vld [vmem:[%s4823_s7] ss:$8 sps:$4 sm:$0xff]   ;;  %v3488_v32 = vld [vmem:[%s4823_s7 + $0x14] ss:$8 sps:$4 sm:$0xff]   ;;  %v3570_v25 = vld [vmem:[%s4823_s7 + $0x1d0] ss:$8 sps:$4 sm:$0xff]  }
  0x56   :  { %835 = vmatpush1.bf16.msra.mxu1 %v3048_v30  ;;  %550 = vmatprep.mubr.bf16.mxu1 %v3715_v3  ;;  %v3485_v30 = vld [vmem:[%s4823_s7 + $0x4] ss:$8 sps:$4 sm:$0xff]  }
  0x57   :  { %836 = vmatprep.subr.bf16.mxu1 %v3057_v33  ;;  %v3489_v33 = vld [vmem:[%s4823_s7 + $0x20] ss:$8 sps:$4 sm:$0xff]   ;;  %v3575_v26 = vld [vmem:[%s4823_s7 + $0x1e4] ss:$8 sps:$4 sm:$0xff]  }
  0x58   :  { %3140 = vmatmul.mubr.msk.bf16.vlgmr.msra.gmra.mrb[8].mxu0 %vm315_vm1, %v4072_v43 }
  0x59   :  { %1401 = vmatprep.mubr.bf16.mxu0 %v3715_v3 }
  0x5a   :  { %837 = vmatpush1.bf16.msra.mxu1 %v3056_v34  ;;  %v3492_v34 = vld [vmem:[%s4823_s7 + $0x30] ss:$8 sps:$4 sm:$0xff]  }
  0x5b   :  { %838 = vmatprep.subr.bf16.mxu1 %v3065_v39  ;;  %v3495_v39 = vld [vmem:[%s4823_s7 + $0x40] ss:$8 sps:$4 sm:$0xff]  }
  0x5d   :  { %3043 = vmatmul.mubr.msk.bf16.gmra.mrb[28].mxu1 %vm315_vm1, %v3902_v4  ;;  %v3053_v4 = vcombine.high %v52_v42, %v56_v44  ;;  %v3498_v42 = vld [vmem:[%s4823_s7 + $0x50] ss:$8 sps:$4 sm:$0xff]   ;;  %v3537_v44 = vld [vmem:[%s4823_s7 + $0x120] ss:$8 sps:$4 sm:$0xff]  }
  0x5e   :  { %839 = vmatpush1.bf16.msra.mxu1 %v3064_v52  ;;  %866 = vmatprep.mubr.bf16.mxu1 %v3715_v3  ;;  %v3534_v52 = vld [vmem:[%s4823_s7 + $0x110] ss:$8 sps:$4 sm:$0xff]  }
  0x5f   :  { %840 = vmatprep.subr.bf16.mxu1 %v3073_v40  ;;  %v3500_v40 = vld [vmem:[%s4823_s7 + $0x54] ss:$8 sps:$4 sm:$0xff]  }
  0x60   :  { %3141 = vmatmul.mubr.msk.bf16.gmra.mrb[12].mxu0 %vm315_vm1, %v4112_v6 }
  0x62   :  { %841 = vmatpush1.bf16.msra.mxu1 %v3072_v41  ;;  %v3539_v41 = vld [vmem:[%s4823_s7 + $0x124] ss:$8 sps:$4 sm:$0xff]  }
  0x63   :  { %842 = vmatprep.subr.bf16.mxu1 %v3958_v37  ;;  %v72_v37 = vld [vmem:[%s4818_s3 + $0xb8] sm:$0xff] }
  0x64   :  { %v3068_v57 = vcombine.low %v68_v51, %v72_v37 }
  0x66   :  { %843 = vmatpush1.bf16.msra.mxu1 %v3961_v38  ;;  %v3069_v38 = vcombine.high %v68_v51, %v72_v37  ;;  %v3506_v51 = vld [vmem:[%s4823_s7 + $0x74] ss:$8 sps:$4 sm:$0xff]   ;;  %v3543_v37 = vld [vmem:[%s4823_s7 + $0x140] ss:$8 sps:$4 sm:$0xff]  }
  0x67   :  { %940 = vmatprep.subr.bf16.mxu1 %v3053_v4  ;;  %v3503_v4 = vld [vmem:[%s4823_s7 + $0x64] ss:$8 sps:$4 sm:$0xff]  }
  0x69   :  { %3088 = vmatmul.mubr.msk.bf16.vlgmr.msra.gmra.mrb[8].mxu1 %vm315_vm1, %v3881_v56 }
  0x6a   :  { %941 = vmatpush1.bf16.msra.mxu1 %v3052_v47  ;;  %876 = vmatprep.mubr.bf16.mxu1 %v3715_v3  ;;  %v3501_v47 = vld [vmem:[%s4823_s7 + $0x60] ss:$8 sps:$4 sm:$0xff]  }
  0x6b   :  { %942 = vmatprep.subr.bf16.mxu1 %v3061_v50  ;;  %v3545_v50 = vld [vmem:[%s4823_s7 + $0x144] ss:$8 sps:$4 sm:$0xff]  }
  0x6e   :  { %943 = vmatpush1.bf16.msra.mxu1 %v3060_v53  ;;  %v3548_v53 = vld [vmem:[%s4823_s7 + $0x154] ss:$8 sps:$4 sm:$0xff]  }
  0x6f   :  { %944 = vmatprep.subr.bf16.mxu1 %v3069_v38  ;;  %v3504_v38 = vld [vmem:[%s4823_s7 + $0x70] ss:$8 sps:$4 sm:$0xff]  }
  0x71   :  { %3089 = vmatmul.mubr.msk.bf16.gmra.mrb[12].mxu1 %vm315_vm1, %v3927_v13 }
  0x72   :  { %945 = vmatpush1.bf16.msra.mxu1 %v3068_v57  ;;  %972 = vmatprep.mubr.bf16.mxu1 %v3715_v3  ;;  %v3551_v57 = vld [vmem:[%s4823_s7 + $0x164] ss:$8 sps:$4 sm:$0xff]  }
  0x73   :  { %946 = vmatprep.subr.bf16.mxu1 %v3077_v58  ;;  %v3507_v58 = vld [vmem:[%s4823_s7 + $0x80] ss:$8 sps:$4 sm:$0xff]  }
  0x76   :  { %947 = vmatpush1.bf16.msra.mxu1 %v3076_v59  ;;  %v3512_v59 = vld [vmem:[%s4823_s7 + $0x94] ss:$8 sps:$4 sm:$0xff]  }
  0x77   :  { %948 = vmatprep.subr.bf16.mxu1 %v3979_v48  ;;  %v1018_v48 = vld [vmem:[%s4822_s5 + $0xa8] sm:$0xff] }
  0x78   :  { %v3114_v12 = vcombine.low %v1014_v8, %v1018_v48 }
  0x7a   :  { %949 = vmatpush1.bf16.msra.mxu1 %v3982_v49  ;;  %v3115_v49 = vcombine.high %v1014_v8, %v1018_v48  ;;  %v3518_v8 = vld [vmem:[%s4823_s7 + $0xb4] ss:$8 sps:$4 sm:$0xff]   ;;  %v3555_v48 = vld [vmem:[%s4823_s7 + $0x180] ss:$8 sps:$4 sm:$0xff]  }
  0x7b   :  { %1306 = vmatprep.subr.bf16.mxu1 %v3099_v63  ;;  %v3510_v63 = vld [vmem:[%s4823_s7 + $0x90] ss:$8 sps:$4 sm:$0xff]  }
  0x7d   :  { %3092 = vmatmul.mubr.msk.bf16.vlgmr.msra.gmra.mrb[24].mxu1 %vm315_vm1, %v3881_v56  ;;  %v3122_v56 = vcombine.low %v1022_v10, %v1026_v11  ;;  %v3521_v10 = vld [vmem:[%s4823_s7 + $0xc4] ss:$8 sps:$4 sm:$0xff]   ;;  %v3558_v11 = vld [vmem:[%s4823_s7 + $0x190] ss:$8 sps:$4 sm:$0xff]  }
  0x7e   :  { %1307 = vmatpush1.bf16.msra.mxu1 %v3098_v5  ;;  %982 = vmatprep.mubr.bf16.mxu1 %v3715_v3  ;;  %v3557_v5 = vld [vmem:[%s4823_s7 + $0x184] ss:$8 sps:$4 sm:$0xff]  }
  0x7f   :  { %1308 = vmatprep.subr.bf16.mxu1 %v3107_v7  ;;  %v3513_v7 = vld [vmem:[%s4823_s7 + $0xa0] ss:$8 sps:$4 sm:$0xff]  }
  0x82   :  { %1309 = vmatpush1.bf16.msra.mxu1 %v3106_v9  ;;  %v3560_v9 = vld [vmem:[%s4823_s7 + $0x194] ss:$8 sps:$4 sm:$0xff]  }
  0x83   :  { %1310 = vmatprep.subr.bf16.mxu1 %v3115_v49  ;;  %v3516_v49 = vld [vmem:[%s4823_s7 + $0xb0] ss:$8 sps:$4 sm:$0xff]  }
  0x85   :  { %3093 = vmatmul.mubr.msk.bf16.gmra.mrb[28].mxu1 %vm315_vm1, %v3927_v13  ;;  %v1008_v13 = vld [vmem:[%s4822_s5 + $0x58] sm:$0xff] }
  0x86   :  { %1311 = vmatpush1.bf16.msra.mxu1 %v3114_v12  ;;  %1338 = vmatprep.mubr.bf16.mxu1 %v3715_v3  ;;  %v3111_v22 = vcombine.high %v1008_v13, %v1012_v20  ;;  %v3110_v24 = vcombine.low %v1008_v13, %v1012_v20  ;;  %v3563_v12 = vld [vmem:[%s4823_s7 + $0x1a4] ss:$8 sps:$4 sm:$0xff]   ;;  %v3564_v20 = vld [vmem:[%s4823_s7 + $0x1b0] ss:$8 sps:$4 sm:$0xff]  }
  0x87   :  { %1312 = vmatprep.subr.bf16.mxu1 %v3123_v14  ;;  %v3519_v14 = vld [vmem:[%s4823_s7 + $0xc0] ss:$8 sps:$4 sm:$0xff]   ;;  %v3527_v13 = vld [vmem:[%s4823_s7 + $0xe4] ss:$8 sps:$4 sm:$0xff]  }
  0x8a   :  { %1313 = vmatpush1.bf16.msra.mxu1 %v3122_v56  ;;  %v3524_v56 = vld [vmem:[%s4823_s7 + $0xd4] ss:$8 sps:$4 sm:$0xff]  }
  0x8b   :  { %1314 = vmatprep.subr.bf16.mxu1 %v4010_v2  ;;  %v1020_v2 = vld [vmem:[%s4822_s5 + $0xb8] sm:$0xff] }
  0x8c   :  { %v3118_v27 = vcombine.low %v1016_v23, %v1020_v2 }
  0x8e   :  { %1315 = vmatpush1.bf16.msra.mxu1 %v4002_v62  ;;  %v3119_v62 = vcombine.high %v1016_v23, %v1020_v2  ;;  %v3530_v23 = vld [vmem:[%s4823_s7 + $0xf4] ss:$8 sps:$4 sm:$0xff]   ;;  %v3567_v2 = vld [vmem:[%s4823_s7 + $0x1c0] ss:$8 sps:$4 sm:$0xff]  }
  0x8f   :  { %1412 = vmatprep.subr.bf16.mxu1 %v3103_v19  ;;  %v3522_v19 = vld [vmem:[%s4823_s7 + $0xd0] ss:$8 sps:$4 sm:$0xff]  }
  0x91   :  { %3138 = vmatmul.mubr.msk.bf16.vlgmr.msra.gmra.mrb[8].mxu1 %vm315_vm1, %v4072_v43 }
  0x92   :  { %1413 = vmatpush1.bf16.msra.mxu1 %v3102_v21  ;;  %1348 = vmatprep.mubr.bf16.mxu1 %v3715_v3  ;;  %v3569_v21 = vld [vmem:[%s4823_s7 + $0x1c4] ss:$8 sps:$4 sm:$0xff]  }
  0x93   :  { %1414 = vmatprep.subr.bf16.mxu1 %v3111_v22  ;;  %v3525_v22 = vld [vmem:[%s4823_s7 + $0xe0] ss:$8 sps:$4 sm:$0xff]  }
  0x96   :  { %1415 = vmatpush1.bf16.msra.mxu1 %v3110_v24  ;;  %v3572_v24 = vld [vmem:[%s4823_s7 + $0x1d4] ss:$8 sps:$4 sm:$0xff]  }
  0x97   :  { %1416 = vmatprep.subr.bf16.mxu1 %v3119_v62  ;;  %v3528_v62 = vld [vmem:[%s4823_s7 + $0xf0] ss:$8 sps:$4 sm:$0xff]  }
  0x99   :  { %3139 = vmatmul.mubr.msk.bf16.gmra.mrb[12].mxu1 %vm315_vm1, %v4112_v6 }
  0x9a   :  { %1417 = vmatpush1.bf16.msra.mxu1 %v3118_v27  ;;  %1444 = vmatprep.mubr.bf16.mxu1 %v3715_v3  ;;  %v3573_v27 = vld [vmem:[%s4823_s7 + $0x1e0] ss:$8 sps:$4 sm:$0xff]  }
  0x9b   :  { %1418 = vmatprep.subr.bf16.mxu1 %v3127_v28  ;;  %v3578_v28 = vld [vmem:[%s4823_s7 + $0x1f4] ss:$8 sps:$4 sm:$0xff]  }
  0x9e   :  { %1419 = vmatpush1.bf16.msra.mxu1 %v3126_v29  ;;  %v3576_v29 = vld [vmem:[%s4823_s7 + $0x1f0] ss:$8 sps:$4 sm:$0xff]  }
  0x9f   :  { %1420 = vmatprep.subr.bf16.mxu1 %v4030_v15  ;;  %v3486_v15 = vld [vmem:[%s4823_s7 + $0x10] ss:$8 sps:$4 sm:$0xff]  }
  0xa2   :  { %1421 = vmatpush1.bf16.msra.mxu1 %v4033_v16  ;;  %v3491_v16 = vld [vmem:[%s4823_s7 + $0x24] ss:$8 sps:$4 sm:$0xff]  }
  0xa3   :  { %2399 = vmatprep.subr.bf16.mxu1 %v3485_v30 }
  0xa5   :  { %3142 = vmatmul.mubr.msk.bf16.vlgmr.msra.gmra.mrb[24].mxu1 %vm315_vm1, %v4072_v43  ;;  %v3533_v43 = vld [vmem:[%s4823_s7 + $0x104] ss:$8 sps:$4 sm:$0xff]  }
  0xa6   :  { %1454 = vmatprep.mubr.bf16.mxu1 %v3715_v3  ;;  %2400 = vmatpush1.bf16.msra.mxu1 %v3483_v31  ;;  %v3494_v3 = vld [vmem:[%s4823_s7 + $0x34] ss:$8 sps:$4 sm:$0xff]  }
  0xa7   :  { %2401 = vmatprep.subr.bf16.mxu1 %v3488_v32  ;;  %2452 = vmatprep.subr.bf16.mxu0 %v3533_v43  ;;  %v3581_v32 = vld [vmem:[%s4823_s7 + $0x204] ss:$8 sps:$4 sm:$0xff]  }
  0xa8   :  { %2453 = vmatpush1.bf16.msra.mxu0 %v3531_v35  ;;  %v1499_v35 = vlaneseq }
  0xaa   :  { %2402 = vmatpush1.bf16.msra.mxu1 %v3486_v15 }
  0xab   :  { %2403 = vmatprep.subr.bf16.mxu1 %v3491_v16 }
  0xad   :  { %3143 = vmatmul.mubr.msk.bf16.gmra.mrb[28].mxu1 %vm315_vm1, %v4112_v6  ;;  %v3536_v6 = vld [vmem:[%s4823_s7 + $0x114] ss:$8 sps:$4 sm:$0xff]  }
  0xae   :  { %2404 = vmatpush1.bf16.msra.mxu1 %v3489_v33  ;;  %2454 = vmatprep.subr.bf16.mxu0 %v3536_v6 }
  0xaf   :  { %2405 = vmatprep.subr.bf16.mxu1 %v3494_v3  ;;  %2455 = vmatpush1.bf16.msra.mxu0 %v3534_v52 }
  0xb0   :  { %2456 = vmatprep.subr.bf16.mxu0 %v3539_v41 }
  0xb2   :  { %2406 = vmatpush1.bf16.msra.mxu1 %v3492_v34 }
  0xb3   :  { %2407 = vmatprep.subr.bf16.mxu1 %v3497_v36  ;;  %2457 = vmatpush1.bf16.msra.mxu0 %v3537_v44  ;;  %v4458_v36 = vshrl.u32 %v1499_v35, 7 }
  0xb4   :  { %2458 = vmatprep.subr.bf16.mxu0 %v3542_v46 }
  0xb5   :  { %v1501_v6 = vsub.s32 0, %v4458_v36  ;;  %v1505_v52 = vsub.s32 1, %v4458_v36 }
  0xb6   :  { %2408 = vmatpush1.bf16.msra.mxu1 %v3495_v39  ;;  %v4464_v39 = vld [vmem:[%s4824_s6] sm:$0xff] }
  0xb7   :  { %2409 = vmatprep.subr.bf16.mxu1 %v3500_v40  ;;  %2459 = vmatpush1.bf16.msra.mxu0 %v3540_v45  ;;  %v1502_v41 = vrot.slane %v4464_v39, %v1501_v6 }
  0xb8   :  { %2460 = vmatprep.subr.bf16.mxu0 %v3545_v50 }
  0xba   :  { %2410 = vmatpush1.bf16.msra.mxu1 %v3498_v42 }
  0xbb   :  { %2411 = vmatprep.subr.bf16.mxu1 %v3503_v4  ;;  %2461 = vmatpush1.bf16.msra.mxu0 %v3543_v37  ;;  %v1506_v4 = vrot.slane %v4464_v39, %v1505_v52 }
  0xbc   :  { %2462 = vmatprep.subr.bf16.mxu0 %v3548_v53 }
  0xbe   :  { %2412 = vmatpush1.bf16.msra.mxu1 %v3501_v47 }
  0xbf   :  { %2413 = vmatprep.subr.bf16.mxu1 %v3506_v51  ;;  %2463 = vmatpush1.bf16.msra.mxu0 %v3546_v55 }
  0xc0   :  { %2464 = vmatprep.subr.bf16.mxu0 %v3551_v57 }
  0xc2   :  { %2414 = vmatpush1.bf16.msra.mxu1 %v3504_v38 }
  0xc3   :  { %2415 = vmatprep.subr.bf16.mxu1 %v3509_v54  ;;  %2465 = vmatpush1.bf16.msra.mxu0 %v3549_v60 }
  0xc4   :  { %2466 = vmatprep.subr.bf16.mxu0 %v3554_v61 }
  0xc6   :  { %2416 = vmatpush1.bf16.msra.mxu1 %v3507_v58 }
  0xc7   :  { %2417 = vmatprep.subr.bf16.mxu1 %v3512_v59  ;;  %2467 = vmatpush1.bf16.msra.mxu0 %v3552_v1 }
  0xc8   :  { %2468 = vmatprep.subr.bf16.mxu0 %v3557_v5 }
  0xca   :  { %2418 = vmatpush1.bf16.msra.mxu1 %v3510_v63 }
  0xcb   :  { %2419 = vmatprep.subr.bf16.mxu1 %v3515_v0  ;;  %2469 = vmatpush1.bf16.msra.mxu0 %v3555_v48 }
  0xcc   :  { %2470 = vmatprep.subr.bf16.mxu0 %v3560_v9 }
  0xce   :  { %2420 = vmatpush1.bf16.msra.mxu1 %v3513_v7 }
  0xcf   :  { %2421 = vmatprep.subr.bf16.mxu1 %v3518_v8  ;;  %2471 = vmatpush1.bf16.msra.mxu0 %v3558_v11 }
  0xd0   :  { %2472 = vmatprep.subr.bf16.mxu0 %v3563_v12 }
  0xd2   :  { %2422 = vmatpush1.bf16.msra.mxu1 %v3516_v49 }
  0xd3   :  { %2423 = vmatprep.subr.bf16.mxu1 %v3521_v10  ;;  %2473 = vmatpush1.bf16.msra.mxu0 %v3561_v17 }
  0xd4   :  { %2474 = vmatprep.subr.bf16.mxu0 %v3566_v18 }
  0xd6   :  { %2424 = vmatpush1.bf16.msra.mxu1 %v3519_v14 }
  0xd7   :  { %2425 = vmatprep.subr.bf16.mxu1 %v3524_v56  ;;  %2475 = vmatpush1.bf16.msra.mxu0 %v3564_v20 }
  0xd8   :  { %2476 = vmatprep.subr.bf16.mxu0 %v3569_v21 }
  0xda   :  { %2426 = vmatpush1.bf16.msra.mxu1 %v3522_v19 }
  0xdb   :  { %2427 = vmatprep.subr.bf16.mxu1 %v3527_v13  ;;  %2477 = vmatpush1.bf16.msra.mxu0 %v3567_v2  ;;  %v1517_v2 = vsub.s32 4, %v4458_v36 }
  0xdc   :  { %2478 = vmatprep.subr.bf16.mxu0 %v3572_v24 }
  0xde   :  { %2428 = vmatpush1.bf16.msra.mxu1 %v3525_v22 }
  0xdf   :  { %2429 = vmatprep.subr.bf16.mxu1 %v3530_v23  ;;  %2479 = vmatpush1.bf16.msra.mxu0 %v3570_v25  ;;  %v1521_v25 = vsub.s32 5, %v4458_v36 }
  0xe0   :  { %2480 = vmatprep.subr.bf16.mxu0 %v3575_v26 }
  0xe2   :  { %2430 = vmatpush1.bf16.msra.mxu1 %v3528_v62 }
  0xe3   :  { %2481 = vmatpush1.bf16.msra.mxu0 %v3573_v27 }
  0xe4   :  { %2482 = vmatprep.subr.bf16.mxu0 %v3578_v28  ;;  %v1518_v28 = vrot.slane %v4464_v39, %v1517_v2 }
  0xe7   :  { %2483 = vmatpush1.bf16.msra.mxu0 %v3576_v29 }
  0xe8   :  { %2505 = vmatprep.subr.bf16.mxu0 %v3581_v32 }
  0xec   :  { %v383_v30 = vpop.f32.mrb[0].mxu1 }
  0xed   :  { %v385_v31 = vpop.f32.mrb[1].mxu1 }
  0xee   :  { %v387_v15 = vpop.f32.mrb[2].mxu1 }
  0xef   :  { %v389_v16 = vpop.f32.mrb[3].mxu1 }
  0xf4   :  { %v393_v33 = vpop.f32.mrb[4].mxu1 }
  0xf5   :  { %v395_v3 = vpop.f32.mrb[5].mxu1 }
  0xf6   :  { %v397_v43 = vpop.f32.mrb[6].mxu1 }
  0xf7   :  { %v399_v34 = vpop.f32.mrb[7].mxu1 }
 0x114   :  { %v489_v40 = vpop.f32.mrb[16].mxu1 }
 0x115   :  { %v491_v44 = vpop.f32.mrb[17].mxu1 }
 0x116   :  { %v493_v47 = vpop.f32.mrb[18].mxu1 }
 0x117   :  { %v1287_v42 = vpop.f32.mrb[0].mxu0  ;;  %v495_v37 = vpop.f32.mrb[19].mxu1 }
 0x118   :  { %v3356_v45 = vadd.f32 %v1287_v42, %v383_v30  ;;  %v1289_v46 = vpop.f32.mrb[1].mxu0  ;;  %v1522_v30 = vrot.slane %v4464_v39, %v1521_v25  ;;  %v3579_v25 = vld [vmem:[%s4823_s7 + $0x200] ss:$8 sps:$4 sm:$0xff]  }
 0x119   :  { %v3357_v50 = vadd.f32 %v1289_v46, %v385_v31  ;;  %v1291_v51 = vpop.f32.mrb[2].mxu0 }
 0x11a   :  { %v1539_v53 = vadd.f32 %v3356_v45, %v1502_v41  ;;  %v3358_v38 = vadd.f32 %v1291_v51, %v387_v15  ;;  %v1293_v54 = vpop.f32.mrb[3].mxu0 }
 0x11b   :  { %v1540_v55 = vadd.f32 %v3357_v50, %v1506_v4  ;;  %v3359_v57 = vadd.f32 %v1293_v54, %v389_v16 }
 0x11c   :  { %v1547_v58 = vadd.f32 %v3358_v38, %v1502_v41  ;;  %v1571_v60 = vmax.f32 %v1539_v53, 0.0  ;;  %v499_v63 = vpop.f32.mrb[20].mxu1 }
 0x11d   :  { %v1548_v59 = vadd.f32 %v3359_v57, %v1506_v4  ;;  %v1572_v0 = vmax.f32 %v1540_v55, 0.0  ;;  %v501_v7 = vpop.f32.mrb[21].mxu1 }
 0x11e   :  { %v1579_v61 = vmax.f32 %v1547_v58, 0.0  ;;  %v503_v49 = vpop.f32.mrb[22].mxu1 }
 0x11f   :  { %v1580_v1 = vmax.f32 %v1548_v59, 0.0  ;;  %v1297_v5 = vpop.f32.mrb[4].mxu0  ;;  %v505_v14 = vpop.f32.mrb[23].mxu1 }
 0x120   :  { %v1603_v8 = vpack.c.bf16 %v1579_v61, %v1571_v60  ;;  %v3360_v48 = vadd.f32 %v1297_v5, %v393_v33  ;;  %v1299_v9 = vpop.f32.mrb[5].mxu0 }
 0x121   :  { %v3361_v10 = vadd.f32 %v1299_v9, %v395_v3  ;;  %v1301_v11 = vpop.f32.mrb[6].mxu0  ;;  %v1604_v12 = vpack.c.bf16 %v1580_v1, %v1572_v0 }
 0x122   :  { %v1555_v56 = vadd.f32 %v3360_v48, %v1502_v41  ;;  %v3362_v17 = vadd.f32 %v1301_v11, %v397_v43  ;;  %v1303_v18 = vpop.f32.mrb[7].mxu0 }
 0x123   :  { %v1556_v19 = vadd.f32 %v3361_v10, %v1506_v4  ;;  %v3363_v13 = vadd.f32 %v1303_v18, %v399_v34  ;;  %2431 = vmatprep.mubr.bf16.mxu1 %v1604_v12 }
 0x124   :  { %v1563_v20 = vadd.f32 %v3362_v17, %v1502_v41  ;;  %2432 = vmatmul.mubr.bf16.vlgmr.msra.gmra.mrb[32].mxu1 %v1603_v8  ;;  %v1587_v22 = vmax.f32 %v1555_v56, 0.0 }
 0x125   :  { %v1564_v21 = vadd.f32 %v3363_v13, %v1506_v4  ;;  %v1588_v24 = vmax.f32 %v1556_v19, 0.0 }
 0x126   :  { %v1595_v23 = vmax.f32 %v1563_v20, 0.0 }
 0x127   :  { %v1596_v62 = vmax.f32 %v1564_v21, 0.0 }
 0x128   :  { %v1611_v26 = vpack.c.bf16 %v1595_v23, %v1587_v22 }
 0x129   :  { %v1612_v27 = vpack.c.bf16 %v1596_v62, %v1588_v24 }
 0x12b   :  { %v1393_v29 = vpop.f32.mrb[8].mxu0  ;;  %2441 = vmatprep.mubr.bf16.mxu1 %v1612_v27 }
 0x12c   :  { %v3364_v31 = vadd.f32 %v1393_v29, %v489_v40  ;;  %v1395_v32 = vpop.f32.mrb[9].mxu0  ;;  %2442 = vmatmul.mubr.bf16.gmra.mrb[36].mxu1 %v1611_v26 }
 0x12d   :  { %v3365_v15 = vadd.f32 %v1395_v32, %v491_v44  ;;  %v1397_v16 = vpop.f32.mrb[10].mxu0 }
 0x12e   :  { %v1543_v33 = vadd.f32 %v3364_v31, %v1518_v28  ;;  %v3366_v3 = vadd.f32 %v1397_v16, %v493_v47  ;;  %v1399_v43 = vpop.f32.mrb[11].mxu0  ;;  %v3582_v16 = vld [vmem:[%s4823_s7 + $0x210] ss:$8 sps:$4 sm:$0xff]  }
 0x12f   :  { %v1544_v34 = vadd.f32 %v3365_v15, %v1522_v30  ;;  %v3367_v35 = vadd.f32 %v1399_v43, %v495_v37  ;;  %v3587_v43 = vld [vmem:[%s4823_s7 + $0x224] ss:$8 sps:$4 sm:$0xff]  }
 0x130   :  { %v1551_v41 = vadd.f32 %v3366_v3, %v1518_v28  ;;  %v1575_v4 = vmax.f32 %v1543_v33, 0.0 }
 0x131   :  { %v1552_v42 = vadd.f32 %v3367_v35, %v1522_v30  ;;  %v1576_v46 = vmax.f32 %v1544_v34, 0.0  ;;  %v1525_v34 = vsub.s32 6, %v4458_v36 }
 0x132   :  { %v1583_v45 = vmax.f32 %v1551_v41, 0.0 }
 0x133   :  { %v1584_v50 = vmax.f32 %v1552_v42, 0.0  ;;  %v1403_v51 = vpop.f32.mrb[12].mxu0  ;;  %v1529_v42 = vsub.s32 7, %v4458_v36 }
 0x134   :  { %v4477_v53 = vpack.c.bf16 %v1583_v45, %v1575_v4  ;;  %v3368_v38 = vadd.f32 %v1403_v51, %v499_v63  ;;  %v1405_v40 = vpop.f32.mrb[13].mxu0  ;;  %v1509_v63 = vsub.s32 2, %v4458_v36  ;;  %v3590_v51 = vld [vmem:[%s4823_s7 + $0x234] ss:$8 sps:$4 sm:$0xff]  }
 0x135   :  { %v3369_v54 = vadd.f32 %v1405_v40, %v501_v7  ;;  %v1407_v55 = vpop.f32.mrb[14].mxu0  ;;  %v4479_v44 = vpack.c.bf16 %v1584_v50, %v1576_v46  ;;  %v1513_v7 = vsub.s32 3, %v4458_v36  ;;  %v3585_v46 = vld [vmem:[%s4823_s7 + $0x220] ss:$8 sps:$4 sm:$0xff]   ;;  %v1526_v50 = vrot.slane %v4464_v39, %v1525_v34 }
 0x136   :  { %v1559_v57 = vadd.f32 %v3368_v38, %v1518_v28  ;;  %v3370_v47 = vadd.f32 %v1407_v55, %v503_v49  ;;  %v1409_v58 = vpop.f32.mrb[15].mxu0  ;;  %v1510_v10 = vrot.slane %v4464_v39, %v1509_v63  ;;  %v1530_v38 = vrot.slane %v4464_v39, %v1529_v42  ;;  %v3683_v34 = vld [vmem:[%s4825_s9 + $0x60] sm:$0xff]  }
 0x137   :  { %v1560_v59 = vadd.f32 %v3369_v54, %v1522_v30  ;;  %v3371_v37 = vadd.f32 %v1409_v58, %v505_v14  ;;  %v1514_v49 = vrot.slane %v4464_v39, %v1513_v7  ;;  %v3588_v54 = vld [vmem:[%s4823_s7 + $0x230] ss:$8 sps:$4 sm:$0xff]   ;;  %v3684_v42 = vld [vmem:[%s4825_s9 + $0x20] sm:$0xff]  }
 0x138   :  { %v1567_v60 = vadd.f32 %v3370_v47, %v1518_v28  ;;  %v1591_v0 = vmax.f32 %v1559_v57, 0.0  ;;  %v3584_v28 = vld [vmem:[%s4823_s7 + $0x214] ss:$8 sps:$4 sm:$0xff]   ;;  %v3593_v47 = vld [vmem:[%s4823_s7 + $0x244] ss:$8 sps:$4 sm:$0xff]  }
 0x139   :  { %v1568_v61 = vadd.f32 %v3371_v37, %v1522_v30  ;;  %v1592_v5 = vmax.f32 %v1560_v59, 0.0 }
 0x13a   :  { %v1599_v1 = vmax.f32 %v1567_v60, 0.0 }
 0x13b   :  { %v1600_v8 = vmax.f32 %v1568_v61, 0.0 }
 0x13c   :  { %v4481_v48 = vpack.c.bf16 %v1599_v1, %v1591_v0  ;;  %v3596_v1 = vld [vmem:[%s4823_s7 + $0x254] ss:$8 sps:$4 sm:$0xff]  }
 0x13d   :  { %v4483_v9 = vpack.c.bf16 %v1600_v8, %v1592_v5 }
 0x164   :  { %v1340_v11 = vpop.f32.mrb[8].mxu1 }
 0x165   :  { %v1541_v12 = vadd.f32 %v1510_v10, %v1340_v11  ;;  %v1342_v14 = vpop.f32.mrb[9].mxu1 }
 0x166   :  { %v1542_v56 = vadd.f32 %v1514_v49, %v1342_v14  ;;  %v1344_v17 = vpop.f32.mrb[10].mxu1  ;;  %v3599_v14 = vld [vmem:[%s4823_s7 + $0x264] ss:$8 sps:$4 sm:$0xff]  }
 0x167   :  { %v1549_v18 = vadd.f32 %v1510_v10, %v1344_v17  ;;  %v1346_v19 = vpop.f32.mrb[11].mxu1  ;;  %v1573_v20 = vmax.f32 %v1541_v12, 0.0 }
 0x168   :  { %v1550_v13 = vadd.f32 %v1514_v49, %v1346_v19  ;;  %v1574_v22 = vmax.f32 %v1542_v56, 0.0  ;;  %v3675_v19 = vld [vmem:[%s4825_s9 + $0x40] sm:$0xff]  }
 0x169   :  { %v1581_v21 = vmax.f32 %v1549_v18, 0.0  ;;  %v3597_v18 = vld [vmem:[%s4823_s7 + $0x260] ss:$8 sps:$4 sm:$0xff]   ;;  %3298 = vmatprep.subr.bf16.mxu1 %v3675_v19  ;;  %v3662_v19 = vld [vmem:[%s4823_s7 + $0x3b4] ss:$8 sps:$4 sm:$0xff]  }
 0x16a   :  { %v1582_v23 = vmax.f32 %v1550_v13, 0.0 }
 0x16b   :  { %v1605_v2 = vpack.c.bf16 %v1581_v21, %v1573_v20 }
 0x16c   :  { %v1606_v24 = vpack.c.bf16 %v1582_v23, %v1574_v22  ;;  %v1350_v62 = vpop.f32.mrb[12].mxu1  ;;  %v3602_v22 = vld [vmem:[%s4823_s7 + $0x274] ss:$8 sps:$4 sm:$0xff]  }
 0x16d   :  { %v1557_v26 = vadd.f32 %v1510_v10, %v1350_v62  ;;  %v1352_v27 = vpop.f32.mrb[13].mxu1 }
 0x16e   :  { %v1558_v29 = vadd.f32 %v1514_v49, %v1352_v27  ;;  %v1354_v30 = vpop.f32.mrb[14].mxu1  ;;  %2484 = vmatprep.mubr.bf16.mxu0 %v1606_v24  ;;  %v3676_v24 = vld [vmem:[%s4825_s9] sm:$0xff]   ;;  %v3678_v27 = vld [vmem:[%s4825_s9 + $0x8] sm:$0xff]  }
 0x16f   :  { %v1565_v31 = vadd.f32 %v1510_v10, %v1354_v30  ;;  %v1356_v32 = vpop.f32.mrb[15].mxu1  ;;  %2485 = vmatmul.mubr.bf16.vlgmr.msra.gmra.mrb[16].mxu0 %v1605_v2  ;;  %v1589_v33 = vmax.f32 %v1557_v26, 0.0  ;;  %3299 = vmatpush3.bf16.msra.mxu1 %v3676_v24  ;;  %v3669_v24 = vld [vmem:[%s4823_s7 + $0x3e0] ss:$8 sps:$4 sm:$0xff]  }
 0x170   :  { %v1566_v15 = vadd.f32 %v1514_v49, %v1356_v32  ;;  %2506 = vmatpush1.bf16.msra.mxu0 %v3579_v25  ;;  %v1590_v35 = vmax.f32 %v1558_v29, 0.0  ;;  %v3594_v49 = vld [vmem:[%s4823_s7 + $0x250] ss:$8 sps:$4 sm:$0xff]   ;;  %v3677_v25 = vld [vmem:[%s4825_s9 + $0x48] sm:$0xff]  }
 0x171   :  { %v1597_v3 = vmax.f32 %v1565_v31, 0.0  ;;  %2507 = vmatprep.subr.bf16.mxu0 %v3584_v28  ;;  %3300 = vmatprep.subr.bf16.mxu1 %v3677_v25  ;;  %v3679_v29 = vld [vmem:[%s4825_s9 + $0x50] sm:$0xff]   ;;  %v3605_v32 = vld [vmem:[%s4823_s7 + $0x284] ss:$8 sps:$4 sm:$0xff]  }
 0x172   :  { %v1598_v41 = vmax.f32 %v1566_v15, 0.0  ;;  %v3600_v31 = vld [vmem:[%s4823_s7 + $0x270] ss:$8 sps:$4 sm:$0xff]   ;;  %v3603_v15 = vld [vmem:[%s4823_s7 + $0x280] ss:$8 sps:$4 sm:$0xff]  }
 0x173   :  { %v1613_v4 = vpack.c.bf16 %v1597_v3, %v1589_v33  ;;  %3301 = vmatpush3.bf16.msra.mxu1 %v3678_v27  ;;  %v3608_v33 = vld [vmem:[%s4823_s7 + $0x294] ss:$8 sps:$4 sm:$0xff]   ;;  %v3672_v25 = vld [vmem:[%s4823_s7 + $0x3f0] ss:$8 sps:$4 sm:$0xff]  }
 0x174   :  { %v1614_v45 = vpack.c.bf16 %v1598_v41, %v1590_v35  ;;  %2508 = vmatpush1.bf16.msra.mxu0 %v3582_v16  ;;  %v3680_v16 = vld [vmem:[%s4825_s9 + $0x10] sm:$0xff]   ;;  %3302 = vmatprep.subr.bf16.mxu1 %v3679_v29  ;;  %v3681_v3 = vld [vmem:[%s4825_s9 + $0x58] sm:$0xff]   ;;  %v3611_v41 = vld [vmem:[%s4823_s7 + $0x2a4] ss:$8 sps:$4 sm:$0xff]  }
 0x175   :  { %2509 = vmatprep.subr.bf16.mxu0 %v3587_v43  ;;  %v3682_v43 = vld [vmem:[%s4825_s9 + $0x18] sm:$0xff]  }
 0x176   :  { %2494 = vmatprep.mubr.bf16.mxu0 %v1614_v45  ;;  %v3606_v35 = vld [vmem:[%s4823_s7 + $0x290] ss:$8 sps:$4 sm:$0xff]   ;;  %v3609_v45 = vld [vmem:[%s4823_s7 + $0x2a0] ss:$8 sps:$4 sm:$0xff]  }
 0x177   :  { %2495 = vmatmul.mubr.bf16.gmra.mrb[20].mxu0 %v1613_v4  ;;  %3303 = vmatpush3.bf16.msra.mxu1 %v3680_v16  ;;  %v3685_v4 = vld [vmem:[%s4825_s9 + $0x68] sm:$0xff]  }
 0x178   :  { %2510 = vmatpush1.bf16.msra.mxu0 %v3585_v46  ;;  %v1446_v40 = vpop.f32.mrb[24].mxu1  ;;  %2537 = vmatprep.mubr.bf16.mxu0 %v4479_v44  ;;  %v3591_v44 = vld [vmem:[%s4823_s7 + $0x240] ss:$8 sps:$4 sm:$0xff]   ;;  %v3614_v46 = vld [vmem:[%s4823_s7 + $0x2b4] ss:$8 sps:$4 sm:$0xff]  }
 0x179   :  { %v1545_v55 = vadd.f32 %v1526_v50, %v1446_v40  ;;  %v1448_v57 = vpop.f32.mrb[25].mxu1  ;;  %2511 = vmatprep.subr.bf16.mxu0 %v3590_v51  ;;  %3304 = vmatprep.subr.bf16.mxu1 %v3681_v3  ;;  %v3617_v51 = vld [vmem:[%s4823_s7 + $0x2c4] ss:$8 sps:$4 sm:$0xff]   ;;  %v3620_v40 = vld [vmem:[%s4823_s7 + $0x2d4] ss:$8 sps:$4 sm:$0xff]  }
 0x17a   :  { %v1546_v58 = vadd.f32 %v1530_v38, %v1448_v57  ;;  %v1450_v59 = vpop.f32.mrb[26].mxu1  ;;  %v3621_v57 = vld [vmem:[%s4823_s7 + $0x2e0] ss:$8 sps:$4 sm:$0xff]  }
 0x17b   :  { %v1553_v37 = vadd.f32 %v1526_v50, %v1450_v59  ;;  %v1452_v39 = vpop.f32.mrb[27].mxu1  ;;  %v1577_v61 = vmax.f32 %v1545_v55, 0.0  ;;  %3305 = vmatpush3.bf16.msra.mxu1 %v3682_v43  ;;  %v3623_v55 = vld [vmem:[%s4823_s7 + $0x2e4] ss:$8 sps:$4 sm:$0xff]   ;;  %v3690_v43 = vld [vmem:[%s4825_s9 + $0x38] sm:$0xff]  }
 0x17c   :  { %v1554_v60 = vadd.f32 %v1530_v38, %v1452_v39  ;;  %2512 = vmatpush1.bf16.msra.mxu0 %v3588_v54  ;;  %v1578_v5 = vmax.f32 %v1546_v58, 0.0  ;;  %3306 = vmatprep.subr.bf16.mxu1 %v3683_v34  ;;  %v3618_v54 = vld [vmem:[%s4823_s7 + $0x2d0] ss:$8 sps:$4 sm:$0xff]   ;;  %v3629_v59 = vld [vmem:[%s4823_s7 + $0x304] ss:$8 sps:$4 sm:$0xff]  }
 0x17d   :  { %v1585_v0 = vmax.f32 %v1553_v37, 0.0  ;;  %2513 = vmatprep.subr.bf16.mxu0 %v3593_v47  ;;  %v3626_v47 = vld [vmem:[%s4823_s7 + $0x2f4] ss:$8 sps:$4 sm:$0xff]   ;;  %v3624_v58 = vld [vmem:[%s4823_s7 + $0x2f0] ss:$8 sps:$4 sm:$0xff]   ;;  %v3686_v3 = vld [vmem:[%s4825_s9 + $0x28] sm:$0xff]  }
 0x17e   :  { %v1586_v8 = vmax.f32 %v1554_v60, 0.0  ;;  %v3627_v37 = vld [vmem:[%s4823_s7 + $0x300] ss:$8 sps:$4 sm:$0xff]   ;;  %v3632_v39 = vld [vmem:[%s4823_s7 + $0x314] ss:$8 sps:$4 sm:$0xff]  }
 0x17f   :  { %v4524_v63 = vpack.c.bf16 %v1585_v0, %v1577_v61  ;;  %3307 = vmatpush3.bf16.msra.mxu1 %v3684_v42  ;;  %v3630_v60 = vld [vmem:[%s4823_s7 + $0x310] ss:$8 sps:$4 sm:$0xff]   ;;  %v3633_v61 = vld [vmem:[%s4823_s7 + $0x320] ss:$8 sps:$4 sm:$0xff]   ;;  %v3641_v0 = vld [vmem:[%s4823_s7 + $0x344] ss:$8 sps:$4 sm:$0xff]  }
 0x180   :  { %v4526_v7 = vpack.c.bf16 %v1586_v8, %v1578_v5  ;;  %2514 = vmatpush1.bf16.msra.mxu0 %v3591_v44  ;;  %v1456_v10 = vpop.f32.mrb[28].mxu1  ;;  %3308 = vmatprep.subr.bf16.mxu1 %v3685_v4  ;;  %v3635_v44 = vld [vmem:[%s4823_s7 + $0x324] ss:$8 sps:$4 sm:$0xff]   ;;  %v3642_v5 = vld [vmem:[%s4823_s7 + $0x350] ss:$8 sps:$4 sm:$0xff]  }
 0x181   :  { %v1561_v11 = vadd.f32 %v1526_v50, %v1456_v10  ;;  %v1458_v12 = vpop.f32.mrb[29].mxu1  ;;  %2515 = vmatprep.subr.bf16.mxu0 %v3596_v1  ;;  %v3639_v1 = vld [vmem:[%s4823_s7 + $0x340] ss:$8 sps:$4 sm:$0xff]   ;;  %v3647_v8 = vld [vmem:[%s4823_s7 + $0x364] ss:$8 sps:$4 sm:$0xff]  }
 0x182   :  { %v1562_v56 = vadd.f32 %v1530_v38, %v1458_v12  ;;  %v1460_v17 = vpop.f32.mrb[30].mxu1  ;;  %v3650_v10 = vld [vmem:[%s4823_s7 + $0x374] ss:$8 sps:$4 sm:$0xff]   ;;  %v3651_v12 = vld [vmem:[%s4823_s7 + $0x380] ss:$8 sps:$4 sm:$0xff]  }
 0x183   :  { %v1593_v13 = vmax.f32 %v1561_v11, 0.0  ;;  %v1569_v20 = vadd.f32 %v1526_v50, %v1460_v17  ;;  %v1462_v21 = vpop.f32.mrb[31].mxu1  ;;  %v3612_v50 = vld [vmem:[%s4823_s7 + $0x2b0] ss:$8 sps:$4 sm:$0xff]   ;;  %v3653_v11 = vld [vmem:[%s4823_s7 + $0x384] ss:$8 sps:$4 sm:$0xff]   ;;  %3309 = vmatpush3.bf16.msra.mxu1 %v3686_v3 }
 0x184   :  { %v1594_v23 = vmax.f32 %v1562_v56, 0.0  ;;  %v1570_v2 = vadd.f32 %v1530_v38, %v1462_v21  ;;  %2516 = vmatpush1.bf16.msra.mxu0 %v3594_v49  ;;  %v3615_v38 = vld [vmem:[%s4823_s7 + $0x2c0] ss:$8 sps:$4 sm:$0xff]   ;;  %v3648_v49 = vld [vmem:[%s4823_s7 + $0x370] ss:$8 sps:$4 sm:$0xff]  }
 0x185   :  { %v1601_v62 = vmax.f32 %v1569_v20, 0.0  ;;  %2517 = vmatprep.subr.bf16.mxu0 %v3599_v14  ;;  %v3656_v14 = vld [vmem:[%s4823_s7 + $0x394] ss:$8 sps:$4 sm:$0xff]   ;;  %v3654_v56 = vld [vmem:[%s4823_s7 + $0x390] ss:$8 sps:$4 sm:$0xff]   ;;  %v3691_v34 = vld [vmem:[%s4826_s11] sm:$0xff]  }
 0x186   :  { %v1602_v26 = vmax.f32 %v1570_v2, 0.0  ;;  %v3659_v17 = vld [vmem:[%s4823_s7 + $0x3a4] ss:$8 sps:$4 sm:$0xff]   ;;  %v3663_v21 = vld [vmem:[%s4823_s7 + $0x3c0] ss:$8 sps:$4 sm:$0xff]  }
 0x187   :  { %v4552_v28 = vpack.c.bf16 %v1601_v62, %v1593_v13  ;;  %v3660_v13 = vld [vmem:[%s4823_s7 + $0x3b0] ss:$8 sps:$4 sm:$0xff]   ;;  %v3665_v20 = vld [vmem:[%s4823_s7 + $0x3c4] ss:$8 sps:$4 sm:$0xff]   ;;  %v3674_v62 = vld [vmem:[%s4823_s7 + $0x3f4] ss:$8 sps:$4 sm:$0xff]  }
 0x188   :  { %v4557_v30 = vpack.c.bf16 %v1602_v26, %v1594_v23  ;;  %2518 = vmatpush1.bf16.msra.mxu0 %v3597_v18  ;;  %v3657_v18 = vld [vmem:[%s4823_s7 + $0x3a0] ss:$8 sps:$4 sm:$0xff]   ;;  %v3666_v23 = vld [vmem:[%s4823_s7 + $0x3d0] ss:$8 sps:$4 sm:$0xff]   ;;  %v3671_v2 = vld [vmem:[%s4823_s7 + $0x3e4] ss:$8 sps:$4 sm:$0xff]  }
 0x189   :  { %2519 = vmatprep.subr.bf16.mxu0 %v3602_v22  ;;  %v3668_v22 = vld [vmem:[%s4823_s7 + $0x3d4] ss:$8 sps:$4 sm:$0xff]  }
 0x18c   :  { %2520 = vmatpush1.bf16.msra.mxu0 %v3600_v31 }
 0x18d   :  { %2521 = vmatprep.subr.bf16.mxu0 %v3605_v32 }
 0x190   :  { %2522 = vmatpush1.bf16.msra.mxu0 %v3603_v15 }
 0x191   :  { %2523 = vmatprep.subr.bf16.mxu0 %v3608_v33 }
 0x194   :  { %2524 = vmatpush1.bf16.msra.mxu0 %v3606_v35  ;;  %v1747_v35 = vld [vmem:[%s4827_s8] sm:$0x3] }
 0x195   :  { %2525 = vmatprep.subr.bf16.mxu0 %v3611_v41  ;;  %v1752_v41 = vrot.slane %v1747_v35, %v1501_v6  ;;  %v1756_v42 = vrot.slane %v1747_v35, %v1505_v52 }
 0x198   :  { %2526 = vmatpush1.bf16.msra.mxu0 %v3609_v45 }
 0x199   :  { %2527 = vmatprep.subr.bf16.mxu0 %v3614_v46 }
 0x19c   :  { %2528 = vmatpush1.bf16.msra.mxu0 %v3612_v50 }
 0x19d   :  { %2529 = vmatprep.subr.bf16.mxu0 %v3617_v51 }
 0x1a0   :  { %2530 = vmatpush1.bf16.msra.mxu0 %v3615_v38 }
 0x1a1   :  { %2531 = vmatprep.subr.bf16.mxu0 %v3620_v40 }
 0x1a4   :  { %2532 = vmatpush1.bf16.msra.mxu0 %v3618_v54 }
 0x1a5   :  { %2533 = vmatprep.subr.bf16.mxu0 %v3623_v55 }
 0x1a8   :  { %2534 = vmatpush1.bf16.msra.mxu0 %v3621_v57 }
 0x1a9   :  { %2535 = vmatprep.subr.bf16.mxu0 %v3626_v47 }
 0x1ac   :  { %2536 = vmatpush1.bf16.msra.mxu0 %v3624_v58 }
 0x1ad   :  { %2558 = vmatprep.subr.bf16.mxu0 %v3629_v59 }
 0x1af   :  { %2538 = vmatmul.mubr.bf16.vlgmr.msra.gmra.mrb[16].mxu0 %v4477_v53  ;;  %v3638_v53 = vld [vmem:[%s4823_s7 + $0x334] ss:$8 sps:$4 sm:$0xff]  }
 0x1b0   :  { %2547 = vmatprep.mubr.bf16.mxu0 %v4483_v9  ;;  %2559 = vmatpush1.bf16.msra.mxu0 %v3627_v37  ;;  %v3636_v9 = vld [vmem:[%s4823_s7 + $0x330] ss:$8 sps:$4 sm:$0xff]  }
 0x1b1   :  { %2560 = vmatprep.subr.bf16.mxu0 %v3632_v39 }
 0x1b4   :  { %2561 = vmatpush1.bf16.msra.mxu0 %v3630_v60 }
 0x1b5   :  { %2562 = vmatprep.subr.bf16.mxu0 %v3635_v44 }
 0x1b7   :  { %2548 = vmatmul.mubr.bf16.gmra.mrb[20].mxu0 %v4481_v48  ;;  %v3644_v48 = vld [vmem:[%s4823_s7 + $0x354] ss:$8 sps:$4 sm:$0xff]  }
 0x1b8   :  { %2563 = vmatpush1.bf16.msra.mxu0 %v3633_v61  ;;  %2590 = vmatprep.mubr.bf16.mxu0 %v4526_v7  ;;  %v3645_v7 = vld [vmem:[%s4823_s7 + $0x360] ss:$8 sps:$4 sm:$0xff]  }
 0x1b9   :  { %2564 = vmatprep.subr.bf16.mxu0 %v3638_v53 }
 0x1bc   :  { %2565 = vmatpush1.bf16.msra.mxu0 %v3636_v9 }
 0x1bd   :  { %2566 = vmatprep.subr.bf16.mxu0 %v3641_v0 }
 0x1c0   :  { %2567 = vmatpush1.bf16.msra.mxu0 %v3639_v1  ;;  %v3692_v1 = vld [vmem:[%s4826_s11 + $0x8] sm:$0xff]  }
 0x1c1   :  { %2568 = vmatprep.subr.bf16.mxu0 %v3644_v48 }
 0x1c4   :  { %2569 = vmatpush1.bf16.msra.mxu0 %v3642_v5 }
 0x1c5   :  { %2570 = vmatprep.subr.bf16.mxu0 %v3647_v8 }
 0x1c8   :  { %2571 = vmatpush1.bf16.msra.mxu0 %v3645_v7 }
 0x1c9   :  { %2572 = vmatprep.subr.bf16.mxu0 %v3650_v10 }
 0x1cc   :  { %2573 = vmatpush1.bf16.msra.mxu0 %v3648_v49 }
 0x1cd   :  { %2574 = vmatprep.subr.bf16.mxu0 %v3653_v11 }
 0x1d0   :  { %2575 = vmatpush1.bf16.msra.mxu0 %v3651_v12 }
 0x1d1   :  { %2576 = vmatprep.subr.bf16.mxu0 %v3656_v14  ;;  %v3693_v14 = vld [vmem:[%s4826_s11 + $0x10] sm:$0xff]  }
 0x1d4   :  { %2577 = vmatpush1.bf16.msra.mxu0 %v3654_v56 }
 0x1d5   :  { %2578 = vmatprep.subr.bf16.mxu0 %v3659_v17 }
 0x1d8   :  { %2579 = vmatpush1.bf16.msra.mxu0 %v3657_v18 }
 0x1d9   :  { %2580 = vmatprep.subr.bf16.mxu0 %v3662_v19 }
 0x1dc   :  { %2581 = vmatpush1.bf16.msra.mxu0 %v3660_v13  ;;  %v3694_v13 = vld [vmem:[%s4826_s11 + $0x18] sm:$0xff]  }
 0x1dd   :  { %2582 = vmatprep.subr.bf16.mxu0 %v3665_v20  ;;  %v3695_v20 = vld [vmem:[%s4826_s11 + $0x20] sm:$0xff]  }
 0x1e0   :  { %2583 = vmatpush1.bf16.msra.mxu0 %v3663_v21  ;;  %v3696_v21 = vld [vmem:[%s4826_s11 + $0x28] sm:$0xff]  }
 0x1e1   :  { %2584 = vmatprep.subr.bf16.mxu0 %v3668_v22  ;;  %v3697_v22 = vld [vmem:[%s4826_s11 + $0x30] sm:$0xff]  }
 0x1e4   :  { %2585 = vmatpush1.bf16.msra.mxu0 %v3666_v23  ;;  %v3698_v23 = vld [vmem:[%s4826_s11 + $0x38] sm:$0xff]  }
 0x1e5   :  { %2586 = vmatprep.subr.bf16.mxu0 %v3671_v2 }
 0x1e8   :  { %2587 = vmatpush1.bf16.msra.mxu0 %v3669_v24  ;;  %v3272_v24 = vld [vmem:[%s4828_s10] ss:$0 sm:$0xff] }
 0x1e9   :  { %2588 = vmatprep.subr.bf16.mxu0 %v3674_v62 }
 0x1ec   :  { %2589 = vmatpush1.bf16.msra.mxu0 %v3672_v25 }
 0x1ef   :  { %2591 = vmatmul.mubr.bf16.vlgmr.msra.gmra.mrb[16].mxu0 %v4524_v63  ;;  %v3687_v63 = vld [vmem:[%s4825_s9 + $0x70] sm:$0xff]  }
 0x1f0   :  { %2600 = vmatprep.mubr.bf16.mxu0 %v4557_v30  ;;  %v3688_v30 = vld [vmem:[%s4825_s9 + $0x30] sm:$0xff]   ;;  %3310 = vmatprep.subr.bf16.mxu1 %v3687_v63 }
 0x1f1   :  { %3311 = vmatpush3.bf16.msra.mxu1 %v3688_v30 }
 0x1f7   :  { %v2433_v26 = vpop.f32.mrb[32].mxu1  ;;  %2601 = vmatmul.mubr.bf16.gmra.mrb[20].mxu0 %v4552_v28  ;;  %v3689_v28 = vld [vmem:[%s4825_s9 + $0x78] sm:$0xff]  }
 0x1f8   :  { %v2435_v27 = vpop.f32.mrb[33].mxu1  ;;  %3312 = vmatprep.subr.bf16.mxu1 %v3689_v28  ;;  %v2434_v4 = vadd.f32 %v2433_v26, %v1752_v41 }
 0x1f9   :  { %v2437_v29 = vpop.f32.mrb[34].mxu1  ;;  %3313 = vmatpush3.bf16.msra.mxu1 %v3690_v43  ;;  %v2436_v45 = vadd.f32 %v2435_v27, %v1756_v42 }
 0x1fa   :  { %v2439_v31 = vpop.f32.mrb[35].mxu1  ;;  %3336 = vmatprep.subr.bf16.mxu1 %v3691_v34  ;;  %v2438_v50 = vadd.f32 %v2437_v29, %v1752_v41 }
 0x1fb   :  { %v2440_v40 = vadd.f32 %v2439_v31, %v1756_v42 }
 0x1ff   :  { %v2443_v32 = vpop.f32.mrb[36].mxu1 }
 0x200   :  { %v2445_v15 = vpop.f32.mrb[37].mxu1  ;;  %v2444_v6 = vadd.f32 %v2443_v32, %v1752_v41 }
 0x201   :  { %v2447_v16 = vpop.f32.mrb[38].mxu1  ;;  %v2446_v36 = vadd.f32 %v2445_v15, %v1756_v42 }
 0x202   :  { %v2449_v33 = vpop.f32.mrb[39].mxu1  ;;  %v2448_v53 = vadd.f32 %v2447_v16, %v1752_v41 }
 0x203   :  { %v2450_v48 = vadd.f32 %v2449_v33, %v1756_v42 }
 0x2c2   :  { %v2592_v46 = vpop.f32.mrb[16].mxu0 }
 0x2c3   :  { %v3373_v51 = vadd.f32 %v2592_v46, %v2434_v4  ;;  %v2594_v38 = vpop.f32.mrb[17].mxu0  ;;  %v3289_v46 = vld [vmem:[%s4829_s12] ss:$0 sm:$0xff] }
 0x2c4   :  { %v3375_v54 = vadd.f32 %v2594_v38, %v2436_v45  ;;  %v2596_v55 = vpop.f32.mrb[18].mxu0 }
 0x2c5   :  { %v3377_v57 = vadd.f32 %v2596_v55, %v2438_v50  ;;  %v2598_v47 = vpop.f32.mrb[19].mxu0  ;;  %v2611_v59 = vmax.f32 %v3373_v51, 0.0 }
 0x2c6   :  { %v3379_v58 = vadd.f32 %v2598_v47, %v2440_v40  ;;  %v2612_v39 = vmax.f32 %v3375_v54, 0.0 }
 0x2c7   :  { %v2613_v37 = vmax.f32 %v3377_v57, 0.0 }
 0x2c8   :  { %v2614_v60 = vmax.f32 %v3379_v58, 0.0 }
 0x2c9   :  { %v2619_v44 = vpack.c.bf16 %v2613_v37, %v2611_v59 }
 0x2ca   :  { %v2620_v52 = vpack.c.bf16 %v2614_v60, %v2612_v39  ;;  %v2602_v61 = vpop.f32.mrb[20].mxu0 }
 0x2cb   :  { %v3381_v9 = vadd.f32 %v2602_v61, %v2444_v6  ;;  %v2604_v0 = vpop.f32.mrb[21].mxu0 }
 0x2cc   :  { %v3383_v5 = vadd.f32 %v2604_v0, %v2446_v36  ;;  %v2606_v8 = vpop.f32.mrb[22].mxu0  ;;  %2790 = vmatprep.mubr.bf16.mxu1 %v2620_v52 }
 0x2cd   :  { %v3385_v7 = vadd.f32 %v2606_v8, %v2448_v53  ;;  %v2608_v10 = vpop.f32.mrb[23].mxu0  ;;  %2791 = vmatmul.mubr.bf16.vlgmr.msra.gmra.mrb[40].mxu1 %v2619_v44  ;;  %v2615_v11 = vmax.f32 %v3381_v9, 0.0 }
 0x2ce   :  { %v3387_v49 = vadd.f32 %v2608_v10, %v2450_v48  ;;  %3337 = vmatpush3.bf16.msra.mxu1 %v3691_v34  ;;  %v2616_v56 = vmax.f32 %v3383_v5, 0.0 }
 0x2cf   :  { %v2617_v12 = vmax.f32 %v3385_v7, 0.0  ;;  %3338 = vmatprep.subr.bf16.mxu1 %v3692_v1 }
 0x2d0   :  { %v2618_v17 = vmax.f32 %v3387_v49, 0.0 }
 0x2d1   :  { %v2621_v18 = vpack.c.bf16 %v2617_v12, %v2615_v11 }
 0x2d2   :  { %v2622_v19 = vpack.c.bf16 %v2618_v17, %v2616_v56  ;;  %3339 = vmatpush3.bf16.msra.mxu1 %v3692_v1 }
 0x2d3   :  { %3340 = vmatprep.subr.bf16.mxu1 %v3693_v14 }
 0x2d4   :  { %2798 = vmatprep.mubr.bf16.mxu1 %v2622_v19 }
 0x2d5   :  { %2799 = vmatmul.mubr.bf16.gmra.mrb[44].mxu1 %v2621_v18 }
 0x2d6   :  { %3341 = vmatpush3.bf16.msra.mxu1 %v3693_v14 }
 0x2d7   :  { %3342 = vmatprep.subr.bf16.mxu1 %v3694_v13 }
 0x2da   :  { %3343 = vmatpush3.bf16.msra.mxu1 %v3694_v13 }
 0x2db   :  { %3344 = vmatprep.subr.bf16.mxu1 %v3695_v20 }
 0x2de   :  { %3345 = vmatpush3.bf16.msra.mxu1 %v3695_v20 }
 0x2df   :  { %3346 = vmatprep.subr.bf16.mxu1 %v3696_v21 }
 0x2e2   :  { %3347 = vmatpush3.bf16.msra.mxu1 %v3696_v21 }
 0x2e3   :  { %3348 = vmatprep.subr.bf16.mxu1 %v3697_v22 }
 0x2e6   :  { %3349 = vmatpush3.bf16.msra.mxu1 %v3697_v22 }
 0x2e7   :  { %3350 = vmatprep.subr.bf16.mxu1 %v3698_v23 }
 0x2ea   :  { %3351 = vmatpush3.bf16.msra.mxu1 %v3698_v23 }
 0x3a0   :  { %v3314_v2 = vpop.f32.mrb[40].mxu1 }
 0x3a1   :  { %v3315_v62 = vpop.f32.mrb[41].mxu1 }
 0x3a2   :  { %v3316_v25 = vadd.f32 %v3315_v62, %v3314_v2  ;;  %v3317_v26 = vpop.f32.mrb[42].mxu1 }
 0x3a3   :  { %v3318_v27 = vpop.f32.mrb[43].mxu1 }
 0x3a4   :  { %v2793_v29 = vadd.f32 %v3316_v25, %v3272_v24  ;;  %v3319_v31 = vadd.f32 %v3318_v27, %v3317_v26 }
 0x3a6   :  { %v2796_v32 = vadd.f32 %v3319_v31, %v3272_v24  ;;  %v2807_v15 = vmax.f32 %v2793_v29, 0.0 }
 0x3a8   :  { %v2808_v16 = vmax.f32 %v2796_v32, 0.0  ;;  %v3320_v33 = vpop.f32.mrb[44].mxu1 }
 0x3a9   :  { %v3321_v3 = vpop.f32.mrb[45].mxu1 }
 0x3aa   :  { %v3322_v63 = vadd.f32 %v3321_v3, %v3320_v33  ;;  %v3323_v30 = vpop.f32.mrb[46].mxu1  ;;  %v2811_v28 = vpack.c.bf16 %v2808_v16, %v2807_v15 }
 0x3ab   :  { %v3324_v43 = vpop.f32.mrb[47].mxu1 }
 0x3ac   :  { %v2801_v34 = vadd.f32 %v3322_v63, %v3272_v24  ;;  %v3325_v35 = vadd.f32 %v3324_v43, %v3323_v30  ;;  %3352 = vmatprep.mubr.bf16.mxu1 %v2811_v28 }
 0x3ae   :  { %v2804_v41 = vadd.f32 %v3325_v35, %v3272_v24  ;;  %v2809_v42 = vmax.f32 %v2801_v34, 0.0 }
 0x3b0   :  { %v2810_v4 = vmax.f32 %v2804_v41, 0.0 }
 0x3b2   :  { %v2812_v45 = vpack.c.bf16 %v2810_v4, %v2809_v42 }
 0x3b4   :  { %3353 = vmatmul.mubr.bf16.vlgmr.msra.gmra.mrb[48].mxu1 %v2812_v45 }
 0x487   :  { %v3354_v50 = vpop.f32.mrb[48].mxu1 }
 0x488   :  { %v4783_v51 = vadd.f32 %v3354_v50, %v3289_v46  ;;  %v2918_v38 = vpop.f32.mrb[49].mxu1 }
 0x489   :  { %v2919_v40 = vadd.f32 %v3289_v46, %v2918_v38  ;;  %v3355_v54 = vpop.f32.mrb[50].mxu1 }
 0x48a   :  { %v4785_v55 = vadd.f32 %v3355_v54, %v3289_v46  ;;  %v2921_v57 = vpop.f32.mrb[51].mxu1  ;;  %v2940_v47 = vsel %vm2933_vm2, %v4783_v51, -inf }
 0x48b   :  { %v2922_v58 = vadd.f32 %v3289_v46, %v2921_v57  ;;  %2941 = vmax.xlane.f32.xlu1 %v2940_v47  ;;  %v2934_v59 = vsel %vm2933_vm2, %v2919_v40, -inf }
 0x48c   :  { %2935 = vmax.xlane.f32.xlu0 %v2934_v59  ;;  %v2943_v37 = vsel %vm2933_vm2, %v4785_v55, -inf }
 0x48d   :  { %v2937_v39 = vsel %vm2933_vm2, %v2922_v58, -inf }
 0x48f   :  { %2944 = vmax.xlane.f32.xlu1 %v2943_v37 }
 0x490   :  { %2938 = vmax.xlane.f32.xlu0 %v2937_v39 }
 0x518   :  { %v2942_v60 = vpop.xlane.xlu1 %2941 }
 0x519   :  { %v2948_v6 = vsub.f32 %v4783_v51, %v2942_v60  ;;  %v2936_v44 = vpop.xlane.xlu0 %2935 }
 0x51a   :  { %v2946_v36 = vsub.f32 %v2919_v40, %v2936_v44 }
 0x51b   :  { %v2954_v52 = vmul.f32 1.442695, %v2948_v6 }
 0x51c   :  { %v2950_v61 = vmul.f32 1.442695, %v2946_v36  ;;  %v2945_v53 = vpop.xlane.xlu1 %2944 }
 0x51d   :  { %v2949_v9 = vsub.f32 %v4785_v55, %v2945_v53  ;;  %v2939_v0 = vpop.xlane.xlu0 %2938 }
 0x51e   :  { %3699 = vpow2.f32 %v2950_v61  ;;  %v2947_v1 = vsub.f32 %v2922_v58, %v2939_v0 }
 0x51f   :  { %3701 = vpow2.f32 %v2954_v52  ;;  %v2956_v48 = vmul.f32 1.442695, %v2949_v9 }
 0x520   :  { %v2952_v5 = vmul.f32 1.442695, %v2947_v1 }
 0x522   :  { %3703 = vpow2.f32 %v2952_v5 }
 0x523   :  { %3705 = vpow2.f32 %v2956_v48 }
 0x528   :  { %v3700_v8 = vpop.eup %3699 }
 0x529   :  { %v2958_v7 = vsel %vm2933_vm2, %v3700_v8, 0.0  ;;  %v3702_v10 = vpop.eup %3701 }
 0x52a   :  { %2959 = vadd.xlane.f32.xlu0 %v2958_v7  ;;  %v2964_v11 = vsel %vm2933_vm2, %v3702_v10, 0.0 }
 0x52c   :  { %v3704_v49 = vpop.eup %3703 }
 0x52d   :  { %v2961_v12 = vsel %vm2933_vm2, %v3704_v49, 0.0  ;;  %v3706_v14 = vpop.eup %3705 }
 0x52e   :  { %2965 = vadd.xlane.f32.xlu0 %v2964_v11  ;;  %2962 = vadd.xlane.f32.xlu1 %v2961_v12  ;;  %v2967_v56 = vsel %vm2933_vm2, %v3706_v14, 0.0 }
 0x532   :  { %2968 = vadd.xlane.f32.xlu1 %v2967_v56 }
 0x5b7   :  { %v2960_v17 = vpop.xlane.xlu0 %2959 }
 0x5b8   :  { %3707 = vlog2.f32 %v2960_v17 }
 0x5bb   :  { %v2963_v18 = vpop.xlane.xlu1 %2962  ;;  %v2966_v19 = vpop.xlane.xlu0 %2965 }
 0x5bc   :  { %3709 = vlog2.f32 %v2963_v18 }
 0x5bd   :  { %3711 = vlog2.f32 %v2966_v19 }
 0x5bf   :  { %v2969_v13 = vpop.xlane.xlu1 %2968 }
 0x5c0   :  { %3713 = vlog2.f32 %v2969_v13 }
 0x5c2   :  { %v3708_v20 = vpop.eup %3707 }
 0x5c3   :  { %v2971_v21 = vmul.f32 0.6931472, %v3708_v20 }
 0x5c5   :  { %v2978_v22 = vadd.f32 %v2971_v21, %v2936_v44 }
 0x5c6   :  { %v3710_v23 = vpop.eup %3709 }
 0x5c7   :  { %v3712_v2 = vpop.eup %3711  ;;  %v2982_v24 = vsub.f32 %v2919_v40, %v2978_v22  ;;  %v2973_v62 = vmul.f32 0.6931472, %v3710_v23 }
 0x5c8   :  { %v2975_v25 = vmul.f32 0.6931472, %v3712_v2 }
 0x5c9   :  { %2986 = vst.msk [vmem:[%s4830_s13] sm:$0xff] %vm2933_vm2, %v2982_v24  ;;  %v2979_v26 = vadd.f32 %v2973_v62, %v2939_v0 }
 0x5ca   :  { %v3714_v27 = vpop.eup %3713  ;;  %v2980_v29 = vadd.f32 %v2975_v25, %v2942_v60 }
 0x5cb   :  { %v2983_v31 = vsub.f32 %v2922_v58, %v2979_v26  ;;  %v2977_v32 = vmul.f32 0.6931472, %v3714_v27 }
 0x5cc   :  { %v2984_v15 = vsub.f32 %v4783_v51, %v2980_v29 }
 0x5cd   :  { %2987 = vst.msk [vmem:[%s4830_s13 + $0x8] sm:$0xff] %vm2933_vm2, %v2983_v31  ;;  %v2981_v16 = vadd.f32 %v2977_v32, %v2945_v53 }
 0x5ce   :  { %2988 = vst.msk [vmem:[%s4830_s13 + $0x10] sm:$0xff] %vm2933_vm2, %v2984_v15 }
 0x5cf   :  { %v2985_v33 = vsub.f32 %v4785_v55, %v2981_v16 }
 0x5d1   :  { %2989 = vst.msk [vmem:[%s4830_s13 + $0x18] sm:$0xff] %vm2933_vm2, %v2985_v33 }

</bundles_post_ra>
